<compile_context>
chip_gen: v7x
topology: tpu7x:2x2x1
jax: 0.10.0
libtpu: 0.0.40
codegen_flags: <defaults>
</compile_context>

<pallas_src>
import math
import functools

import jax
import jax.numpy as jnp
from jax.experimental import pallas as pl
from jax.experimental.pallas import tpu as pltpu

_EPS = 1e-5                      # PyTorch LayerNorm default


# ---------------------------------------------------------------------------
# Per-generation tuning (VMEM limit / tile preferences)
# ---------------------------------------------------------------------------

def _tpu_vmem_capacity():
    try:
        info = pltpu.get_tpu_info()
        for name in ("vmem_capacity_bytes", "vmem_size_bytes", "vmem_bytes"):
            v = getattr(info, name, None)
            if v:
                return int(v)
    except Exception:
        pass
    return 64 * 1024 * 1024       # conservative fallback (v7x per-TC)


_VMEM_CAP = _tpu_vmem_capacity()
_BIG_VMEM = _VMEM_CAP >= 128 * 1024 * 1024          # v5e / v6e
_VMEM_LIMIT = (100 * 1024 * 1024) if _BIG_VMEM else (48 * 1024 * 1024)
_TM_PREF = 512 if _BIG_VMEM else 256
_TN_PREF = 1024 if _BIG_VMEM else 512
_TK_PREF = 1024 if _BIG_VMEM else 512
_TF_PREF = 1024 if _BIG_VMEM else 512                # bf16 weights halve footprint
_TQ_PREF = 512 if _BIG_VMEM else 256


def _pick_tile(n, pref, step):
    """Largest tile <= pref that divides n (falls back to one full-extent block)."""
    if n <= pref:
        return n
    for t in range(pref, step - 1, -step):
        if n % t == 0:
            return t
    return n


# ---------------------------------------------------------------------------
# Pallas kernels
# ---------------------------------------------------------------------------

def _linear_kernel(x_ref, w_ref, b_ref, o_ref):
    """y = x @ w + b, tiled over (M, N, K); f32 accumulate directly in o_ref."""
    k = pl.program_id(2)

    @pl.when(k == 0)
    def _():
        o_ref[...] = jnp.zeros_like(o_ref)

    o_ref[...] += jnp.dot(x_ref[...].astype(jnp.bfloat16),
                          w_ref[...].astype(jnp.bfloat16),
                          preferred_element_type=jnp.float32)

    @pl.when(k == pl.num_programs(2) - 1)
    def _():
        o_ref[...] += b_ref[...]


def linear(x2d, w, b):
    """y = x @ w + b.  x2d: [M, K] f32, w: [K, N] bf16, b: [N] f32 -> [M, N] f32."""
    M, K = x2d.shape
    N = w.shape[1]
    tm = _pick_tile(M, _TM_PREF, 8)
    tn = _pick_tile(N, _TN_PREF, 128)
    tk = _pick_tile(K, _TK_PREF, 128)
    grid = (M // tm, N // tn, K // tk)
    return pl.pallas_call(
        _linear_kernel,
        out_shape=jax.ShapeDtypeStruct((M, N), jnp.float32),
        grid=grid,
        in_specs=[
            pl.BlockSpec((tm, tk), lambda i, j, k: (i, k)),
            pl.BlockSpec((tk, tn), lambda i, j, k: (k, j)),
            pl.BlockSpec((1, tn), lambda i, j, k: (0, j)),
        ],
        out_specs=pl.BlockSpec((tm, tn), lambda i, j, k: (i, j)),
        compiler_params=pltpu.CompilerParams(
            dimension_semantics=("parallel", "parallel", "arbitrary"),
            vmem_limit_bytes=_VMEM_LIMIT),
    )(x2d, w, b.reshape(1, N))


def _ffn_ln_kernel(x_ref, w1_ref, b1_ref, w2_ref, b2_ref, g_ref, bt_ref, o_ref):
    """out = LayerNorm(x + linear2(relu(linear1(x)))); tiled over (M, d_ff).

    The d_ff partial products accumulate directly into the resident o_ref block.
    """
    f = pl.program_id(1)

    @pl.when(f == 0)
    def _():
        o_ref[...] = jnp.zeros_like(o_ref)

    h = jnp.dot(x_ref[...].astype(jnp.bfloat16), w1_ref[...].astype(jnp.bfloat16),
                preferred_element_type=jnp.float32) + b1_ref[...]
    h = jnp.maximum(h, 0.0)
    o_ref[...] += jnp.dot(h.astype(jnp.bfloat16), w2_ref[...].astype(jnp.bfloat16),
                          preferred_element_type=jnp.float32)

    @pl.when(f == pl.num_programs(1) - 1)
    def _():
        z = o_ref[...] + b2_ref[...] + x_ref[...]          # residual add
        mu = jnp.mean(z, axis=-1, keepdims=True)
        var = jnp.mean((z - mu) ** 2, axis=-1, keepdims=True)
        o_ref[...] = (z - mu) * jax.lax.rsqrt(var + _EPS) * g_ref[...] + bt_ref[...]


def ffn_ln(x2d, p, ln):
    """Fused FeedForward + residual + LayerNorm on the flattened [M, D] view."""
    M, D = x2d.shape
    F = p['w1'].shape[1]
    tm = _pick_tile(M, _TM_PREF, 8)
    tf = _pick_tile(F, _TF_PREF, 128)
    grid = (M // tm, F // tf)
    return pl.pallas_call(
        _ffn_ln_kernel,
        out_shape=jax.ShapeDtypeStruct((M, D), jnp.float32),
        grid=grid,
        in_specs=[
            pl.BlockSpec((tm, D), lambda i, f: (i, 0)),
            pl.BlockSpec((D, tf), lambda i, f: (0, f)),
            pl.BlockSpec((1, tf), lambda i, f: (0, f)),
            pl.BlockSpec((tf, D), lambda i, f: (f, 0)),
            pl.BlockSpec((1, D), lambda i, f: (0, 0)),
            pl.BlockSpec((1, D), lambda i, f: (0, 0)),
            pl.BlockSpec((1, D), lambda i, f: (0, 0)),
        ],
        out_specs=pl.BlockSpec((tm, D), lambda i, f: (i, 0)),
        compiler_params=pltpu.CompilerParams(
            dimension_semantics=("parallel", "arbitrary"),
            vmem_limit_bytes=_VMEM_LIMIT),
    )(x2d, p['w1'], p['b1'].reshape(1, F), p['w2'], p['b2'].reshape(1, D),
      ln['g'].reshape(1, D), ln['b'].reshape(1, D))


def _proj_add_ln_kernel(a_ref, w_ref, b_ref, r_ref, g_ref, bt_ref, o_ref):
    """out = LayerNorm(residual + a @ Wo + bo); grid over M tiles."""
    z = jnp.dot(a_ref[...].astype(jnp.bfloat16), w_ref[...].astype(jnp.bfloat16),
                preferred_element_type=jnp.float32) + b_ref[...] + r_ref[...]
    mu = jnp.mean(z, axis=-1, keepdims=True)
    var = jnp.mean((z - mu) ** 2, axis=-1, keepdims=True)
    o_ref[...] = (z - mu) * jax.lax.rsqrt(var + _EPS) * g_ref[...] + bt_ref[...]


def proj_add_ln(attn2d, residual2d, wo, bo, gamma, beta):
    M, D = attn2d.shape
    tm = _pick_tile(M, _TM_PREF, 8)
    grid = (M // tm,)
    return pl.pallas_call(
        _proj_add_ln_kernel,
        out_shape=jax.ShapeDtypeStruct((M, D), jnp.float32),
        grid=grid,
        in_specs=[
            pl.BlockSpec((tm, D), lambda i: (i, 0)),
            pl.BlockSpec((D, D), lambda i: (0, 0)),
            pl.BlockSpec((1, D), lambda i: (0, 0)),
            pl.BlockSpec((tm, D), lambda i: (i, 0)),
            pl.BlockSpec((1, D), lambda i: (0, 0)),
            pl.BlockSpec((1, D), lambda i: (0, 0)),
        ],
        out_specs=pl.BlockSpec((tm, D), lambda i: (i, 0)),
        compiler_params=pltpu.CompilerParams(
            dimension_semantics=("parallel",),
            vmem_limit_bytes=_VMEM_LIMIT),
    )(attn2d, wo, bo.reshape(1, D), residual2d,
      gamma.reshape(1, D), beta.reshape(1, D))


def _attn_kernel(q_ref, k_ref, v_ref, *rest, num_heads, has_bias):
    """Scaled-dot-product attention for one (batch, Sq-tile) grid step.

    Q block is [1, tq, D]; K/V blocks are [1, Sk, D] and come straight out of
    the fused QKV / KV projection tensor via column-block index maps.  Heads
    are split with static lane slices; the 1/sqrt(dk) scale is folded into Wq.
    When has_bias is False no bias tensor is DMA'd at all.
    """
    if has_bias:
        bias_ref, o_ref = rest
        bias = bias_ref[0]                  # [tq, Sk]
    else:
        (o_ref,) = rest
        bias = None

    q = q_ref[0].astype(jnp.bfloat16)       # [tq, D]
    k = k_ref[0].astype(jnp.bfloat16)       # [Sk, D]
    v = v_ref[0].astype(jnp.bfloat16)       # [Sk, D]
    D = q.shape[-1]
    dk = D // num_heads

    outs = []
    for h in range(num_heads):              # static unrolled loop over heads
        lo = h * dk
        qh = q[:, lo:lo + dk]
        kh = k[:, lo:lo + dk]
        vh = v[:, lo:lo + dk]
        s = jax.lax.dot_general(qh, kh, (((1,), (1,)), ((), ())),
                                preferred_element_type=jnp.float32)
        if bias is not None:
            s = s + bias
        s = s - jnp.max(s, axis=-1, keepdims=True)
        p = jnp.exp(s)
        p = p * pl.reciprocal(jnp.sum(p, axis=-1, keepdims=True), approx=True)
        outs.append(jnp.dot(p.astype(jnp.bfloat16), vh,
                            preferred_element_type=jnp.float32))
    o_ref[0] = jnp.concatenate(outs, axis=-1)        # one lane-dense store


def sdpa(q_src, kv_src, bias, num_heads, *, q_col, k_col, v_col,
         d_model, sq, sk):
    """Attention over fused projection tensors.

    q_src:  [B, sq, q_cols*D]  (Q lives in column block q_col)
    kv_src: [B, sk, kv_cols*D] (K / V live in column blocks k_col / v_col)
    bias:   None or additive mask [1 or B, sq, sk]
    """
    B = q_src.shape[0]
    D = d_model
    tq = _pick_tile(sq, _TQ_PREF, 8)
    grid = (B, sq // tq)
    has_bias = bias is not None

    in_specs = [
        pl.BlockSpec((1, tq, D), lambda b, iq: (b, iq, q_col)),
        pl.BlockSpec((1, sk, D), lambda b, iq: (b, 0, k_col)),
        pl.BlockSpec((1, sk, D), lambda b, iq: (b, 0, v_col)),
    ]
    args = [q_src, kv_src, kv_src]
    if has_bias:
        bias = bias.astype(jnp.float32)
        if bias.shape[0] == B:
            in_specs.append(pl.BlockSpec((1, tq, sk), lambda b, iq: (b, iq, 0)))
        else:
            in_specs.append(pl.BlockSpec((1, tq, sk), lambda b, iq: (0, iq, 0)))
        args.append(bias)

    return pl.pallas_call(
        functools.partial(_attn_kernel, num_heads=num_heads, has_bias=has_bias),
        out_shape=jax.ShapeDtypeStruct((B, sq, D), jnp.float32),
        grid=grid,
        in_specs=in_specs,
        out_specs=pl.BlockSpec((1, tq, D), lambda b, iq: (b, iq, 0)),
        compiler_params=pltpu.CompilerParams(
            dimension_semantics=("parallel", "parallel"),
            vmem_limit_bytes=_VMEM_LIMIT),
    )(*args)


# ---------------------------------------------------------------------------
# Model building blocks (JAX glue around the kernels)
# ---------------------------------------------------------------------------

def attn_block(x_q, x_kv, p, ln, mask_bias, num_heads, *, self_attn):
    """MultiHeadAttention + residual + LayerNorm (output projection fused)."""
    B, Sq, D = x_q.shape
    xq2 = x_q.reshape(B * Sq, D)

    if self_attn:
        qkv = linear(xq2, p['w_qkv'], p['b_qkv']).reshape(B, Sq, 3 * D)
        o = sdpa(qkv, qkv, mask_bias, num_heads,
                 q_col=0, k_col=1, v_col=2, d_model=D, sq=Sq, sk=Sq)
    else:
        Sk = x_kv.shape[1]
        q = linear(xq2, p['w_q'], p['b_q']).reshape(B, Sq, D)
        kv = linear(x_kv.reshape(B * Sk, D), p['w_kv'], p['b_kv']).reshape(B, Sk, 2 * D)
        o = sdpa(q, kv, mask_bias, num_heads,
                 q_col=0, k_col=0, v_col=1, d_model=D, sq=Sq, sk=Sk)

    out = proj_add_ln(o.reshape(B * Sq, D), xq2, p['wo'], p['bo'],
                      ln['g'], ln['b'])
    return out.reshape(B, Sq, D)


def ffn_ln_block(x, ffp, ln):
    B, S, D = x.shape
    return ffn_ln(x.reshape(B * S, D), ffp, ln).reshape(B, S, D)


def make_positional_encoding(max_len, d_model):
    pos = jnp.arange(max_len, dtype=jnp.float32)[:, None]
    div = jnp.exp(jnp.arange(0, d_model, 2, dtype=jnp.float32)
                  * (-math.log(10000.0) / d_model))
    pe = jnp.zeros((max_len, d_model), jnp.float32)
    pe = pe.at[:, 0::2].set(jnp.sin(pos * div))
    pe = pe.at[:, 1::2].set(jnp.cos(pos * div))
    return pe


def transformer_forward(params, src, tgt, pe, src_mask_bias, tgt_mask_bias, *,
                        d_model, num_heads, tgt_vocab):
    B, S = src.shape
    T = tgt.shape[1]
    emb_scale = math.sqrt(d_model)

    # ---- encoder ----
    x = jnp.take(params['src_emb'], src, axis=0) * emb_scale + pe[:S][None]
    for lp in params['encoder']:
        x = attn_block(x, x, lp['self_attn'], lp['ln1'], src_mask_bias,
                       num_heads, self_attn=True)
        x = ffn_ln_block(x, lp['ff'], lp['ln2'])
    enc = x

    # ---- decoder ----
    y = jnp.take(params['tgt_emb'], tgt, axis=0) * emb_scale + pe[:T][None]
    for lp in params['decoder']:
        y = attn_block(y, y, lp['self_attn'], lp['ln1'], tgt_mask_bias,
                       num_heads, self_attn=True)
        y = attn_block(y, enc, lp['cross_attn'], lp['ln2'], src_mask_bias,
                       num_heads, self_attn=False)
        y = ffn_ln_block(y, lp['ff'], lp['ln3'])

    # ---- vocab projection (lane-padded weights; trailing slice is a tail op) ----
    logits = linear(y.reshape(B * T, d_model), params['out_w'], params['out_b'])
    return logits[:, :tgt_vocab].reshape(B, T, tgt_vocab)


# ---------------------------------------------------------------------------
# Deterministic parameter initialization (xavier_uniform for >1D, zero biases,
# ones/zeros LayerNorm — mirrors Transformer.init_weights).  Q weights carry the
# folded 1/sqrt(dk) scale; QKV / KV weights are stored pre-concatenated; matmul
# weights are stored bf16 (MXU-native); the output projection is padded to a
# multiple of 128 columns.
# ---------------------------------------------------------------------------

def init_params(key, src_vocab, tgt_vocab, d_model, num_heads, n_enc, n_dec, d_ff):
    keys = iter(jax.random.split(key, 4096))
    dk = d_model // num_heads
    q_scale = 1.0 / math.sqrt(dk)

    def xavier(shape):
        fan_in, fan_out = shape
        lim = math.sqrt(6.0 / (fan_in + fan_out))
        return jax.random.uniform(next(keys), shape, jnp.float32, -lim, lim)

    def zeros(n):
        return jnp.zeros((n,), jnp.float32)

    def bf16(x):
        return x.astype(jnp.bfloat16)

    def self_attn_params():
        wq, wk, wv = (xavier((d_model, d_model)) for _ in range(3))
        return dict(w_qkv=bf16(jnp.concatenate([wq * q_scale, wk, wv], axis=1)),
                    b_qkv=zeros(3 * d_model),
                    wo=bf16(xavier((d_model, d_model))), bo=zeros(d_model))

    def cross_attn_params():
        wq, wk, wv = (xavier((d_model, d_model)) for _ in range(3))
        return dict(w_q=bf16(wq * q_scale), b_q=zeros(d_model),
                    w_kv=bf16(jnp.concatenate([wk, wv], axis=1)),
                    b_kv=zeros(2 * d_model),
                    wo=bf16(xavier((d_model, d_model))), bo=zeros(d_model))

    def ffn_params():
        return dict(w1=bf16(xavier((d_model, d_ff))), b1=zeros(d_ff),
                    w2=bf16(xavier((d_ff, d_model))), b2=zeros(d_model))

    def ln_params():
        return dict(g=jnp.ones((d_model,), jnp.float32), b=zeros(d_model))

    vocab_pad = ((tgt_vocab + 127) // 128) * 128
    out_w = xavier((d_model, tgt_vocab))
    out_w_pad = jnp.zeros((d_model, vocab_pad), jnp.float32).at[:, :tgt_vocab].set(out_w)

    return dict(
        src_emb=xavier((src_vocab, d_model)),
        tgt_emb=xavier((tgt_vocab, d_model)),
        encoder=[dict(self_attn=self_attn_params(), ff=ffn_params(),
                      ln1=ln_params(), ln2=ln_params()) for _ in range(n_enc)],
        decoder=[dict(self_attn=self_attn_params(), cross_attn=cross_attn_params(),
                      ff=ffn_params(), ln1=ln_params(), ln2=ln_params(),
                      ln3=ln_params()) for _ in range(n_dec)],
        out_w=bf16(out_w_pad),
        out_b=jnp.zeros((vocab_pad,), jnp.float32),
    )


# ---------------------------------------------------------------------------

if __name__ == "__main__":
    # Small config consistent with the module's constructor; d_model / d_ff are
    # multiples of 128 so all kernels run with lane-dense blocks.
    src_vocab, tgt_vocab = 11, 13
    d_model, num_heads, d_ff = 128, 4, 256
    n_enc, n_dec = 2, 2
    max_seq_len = 64
    B, S, T = 2, 16, 16

    key = jax.random.PRNGKey(0)
    pkey, skey, tkey = jax.random.split(key, 3)

    params = init_params(pkey, src_vocab, tgt_vocab, d_model, num_heads,
                         n_enc, n_dec, d_ff)
    pe = make_positional_encoding(max_seq_len, d_model)

    src = jax.random.randint(skey, (B, S), 0, src_vocab)
    tgt = jax.random.randint(tkey, (B, T), 0, tgt_vocab)

    # causal target mask (same convention as Transformer.generate: masked -> -1e9)
    causal = jnp.triu(jnp.ones((T, T), jnp.float32), k=1)
    tgt_mask_bias = jnp.where(causal == 1.0, -1e9, 0.0).astype(jnp.float32)[None]

    fwd = jax.jit(functools.partial(transformer_forward, d_model=d_model,
                                    num_heads=num_heads, tgt_vocab=tgt_vocab))
    out = fwd(params, src, tgt, pe, None, tgt_mask_bias)
    out = jax.block_until_ready(out)

    assert out.shape == (B, T, tgt_vocab)
    assert bool(jnp.all(jnp.isfinite(out)))
    print("KERNEL_OK")
</pallas_src>

<mosaic_0001>
module attributes {stable_mosaic.version = 11 : i64} {
  func.func @_linear_kernel(%arg0: i32, %arg1: i32, %arg2: i32, %arg3: memref<32x128xf32, #tpu.memory_space<vmem>>, %arg4: memref<128x128xbf16, #tpu.memory_space<vmem>>, %arg5: memref<1x128xf32, #tpu.memory_space<vmem>>, %arg6: memref<32x128xf32, #tpu.memory_space<vmem>>) attributes {dimension_semantics = [#tpu.dimension_semantics<parallel>, #tpu.dimension_semantics<parallel>, #tpu.dimension_semantics<arbitrary>], iteration_bounds = array<i64: 1, 1, 1>, scalar_prefetch = 0 : i64, scratch_operands = 0 : i64, tpu.core_type = #tpu.core_type<tc>, window_params = [{transform_indices = @transform_0, window_bounds = array<i64: 32, 128>}, {transform_indices = @transform_1, window_bounds = array<i64: 128, 128>}, {transform_indices = @transform_2, window_bounds = array<i64: 1, 128>}, {transform_indices = @transform_3, window_bounds = array<i64: 32, 128>}]} {
    %c0_i32 = arith.constant 0 : i32
    %0 = arith.cmpi eq, %arg2, %c0_i32 : i32
    %1 = arith.extui %0 : i1 to i32
    %c0_i32_0 = arith.constant 0 : i32
    %2 = arith.cmpi ne, %1, %c0_i32_0 : i32
    scf.if %2 {
      %cst_10 = arith.constant 0.000000e+00 : f32
      %13 = vector.broadcast %cst_10 : f32 to vector<32x128xf32>
      %c0_11 = arith.constant 0 : index
      %c0_12 = arith.constant 0 : index
      %14 = vector.load %arg6[%c0_11, %c0_12] : memref<32x128xf32, #tpu.memory_space<vmem>>, vector<32x128xf32>
      tpu.vector_store %arg6[%c0_11, %c0_12], %13 {strides = array<i32>} : memref<32x128xf32, #tpu.memory_space<vmem>>, vector<32x128xf32>,
    } else {
    }
    %c0 = arith.constant 0 : index
    %c0_1 = arith.constant 0 : index
    %3 = vector.load %arg6[%c0, %c0_1] : memref<32x128xf32, #tpu.memory_space<vmem>>, vector<32x128xf32>
    %c0_2 = arith.constant 0 : index
    %c0_3 = arith.constant 0 : index
    %4 = vector.load %arg3[%c0_2, %c0_3] : memref<32x128xf32, #tpu.memory_space<vmem>>, vector<32x128xf32>
    %5 = arith.truncf %4 : vector<32x128xf32> to vector<32x128xbf16>
    %c0_4 = arith.constant 0 : index
    %c0_5 = arith.constant 0 : index
    %6 = vector.load %arg4[%c0_4, %c0_5] : memref<128x128xbf16, #tpu.memory_space<vmem>>, vector<128x128xbf16>
    %cst = arith.constant dense<0.000000e+00> : vector<32x128xf32>
    %7 = tpu.matmul %5, %6, %cst {dimension_numbers = #tpu.dot_dimension_numbers<[1], [0], [0], [1], [0, 0, 1, 1], [], []>} : vector<32x128xbf16>, vector<128x128xbf16>, vector<32x128xf32> -> vector<32x128xf32>
    %8 = arith.addf %3, %7 : vector<32x128xf32>
    %c0_6 = arith.constant 0 : index
    %c0_7 = arith.constant 0 : index
    %9 = vector.load %arg6[%c0_6, %c0_7] : memref<32x128xf32, #tpu.memory_space<vmem>>, vector<32x128xf32>
    tpu.vector_store %arg6[%c0_6, %c0_7], %8 {strides = array<i32>} : memref<32x128xf32, #tpu.memory_space<vmem>>, vector<32x128xf32>,
    %c0_i32_8 = arith.constant 0 : i32
    %10 = arith.cmpi eq, %arg2, %c0_i32_8 : i32
    %11 = arith.extui %10 : i1 to i32
    %c0_i32_9 = arith.constant 0 : i32
    %12 = arith.cmpi ne, %11, %c0_i32_9 : i32
    scf.if %12 {
      %c0_10 = arith.constant 0 : index
      %c0_11 = arith.constant 0 : index
      %13 = vector.load %arg6[%c0_10, %c0_11] : memref<32x128xf32, #tpu.memory_space<vmem>>, vector<32x128xf32>
      %c0_12 = arith.constant 0 : index
      %c0_13 = arith.constant 0 : index
      %14 = vector.load %arg5[%c0_12, %c0_13] : memref<1x128xf32, #tpu.memory_space<vmem>>, vector<1x128xf32>
      %15 = vector.broadcast %14 : vector<1x128xf32> to vector<32x128xf32>
      %16 = arith.addf %13, %15 : vector<32x128xf32>
      %c0_14 = arith.constant 0 : index
      %c0_15 = arith.constant 0 : index
      %17 = vector.load %arg6[%c0_14, %c0_15] : memref<32x128xf32, #tpu.memory_space<vmem>>, vector<32x128xf32>
      tpu.vector_store %arg6[%c0_14, %c0_15], %16 {strides = array<i32>} : memref<32x128xf32, #tpu.memory_space<vmem>>, vector<32x128xf32>,
    } else {
    }
    return
  }
  func.func @transform_0(%arg0: i32, %arg1: i32, %arg2: i32) -> (i32, i32) {
    %c0_i32 = arith.constant 0 : i32
    return %arg0, %arg2 : i32, i32
  }
  func.func @transform_1(%arg0: i32, %arg1: i32, %arg2: i32) -> (i32, i32) {
    %c0_i32 = arith.constant 0 : i32
    return %arg2, %arg1 : i32, i32
  }
  func.func @transform_2(%arg0: i32, %arg1: i32, %arg2: i32) -> (i32, i32) {
    %c0_i32 = arith.constant 0 : i32
    %c0_i32_0 = arith.constant 0 : i32
    return %c0_i32, %arg1 : i32, i32
  }
  func.func @transform_3(%arg0: i32, %arg1: i32, %arg2: i32) -> (i32, i32) {
    %c0_i32 = arith.constant 0 : i32
    return %arg0, %arg1 : i32, i32
  }
}

module attributes {stable_mosaic.version = 11 : i64} {
  func.func @_proj_add_ln_kernel(%arg0: i32, %arg1: memref<32x128xf32, #tpu.memory_space<vmem>>, %arg2: memref<128x128xbf16, #tpu.memory_space<vmem>>, %arg3: memref<1x128xf32, #tpu.memory_space<vmem>>, %arg4: memref<32x128xf32, #tpu.memory_space<vmem>>, %arg5: memref<1x128xf32, #tpu.memory_space<vmem>>, %arg6: memref<1x128xf32, #tpu.memory_space<vmem>>, %arg7: memref<32x128xf32, #tpu.memory_space<vmem>>) attributes {dimension_semantics = [#tpu.dimension_semantics<parallel>], iteration_bounds = array<i64: 1>, scalar_prefetch = 0 : i64, scratch_operands = 0 : i64, tpu.core_type = #tpu.core_type<tc>, window_params = [{transform_indices = @transform_0, window_bounds = array<i64: 32, 128>}, {pipeline_mode = #tpu.pipeline_mode<synchronous>, transform_indices = @transform_1, window_bounds = array<i64: 128, 128>}, {pipeline_mode = #tpu.pipeline_mode<synchronous>, transform_indices = @transform_2, window_bounds = array<i64: 1, 128>}, {transform_indices = @transform_3, window_bounds = array<i64: 32, 128>}, {pipeline_mode = #tpu.pipeline_mode<synchronous>, transform_indices = @transform_4, window_bounds = array<i64: 1, 128>}, {pipeline_mode = #tpu.pipeline_mode<synchronous>, transform_indices = @transform_5, window_bounds = array<i64: 1, 128>}, {transform_indices = @transform_6, window_bounds = array<i64: 32, 128>}]} {
    %c0 = arith.constant 0 : index
    %c0_0 = arith.constant 0 : index
    %0 = vector.load %arg1[%c0, %c0_0] : memref<32x128xf32, #tpu.memory_space<vmem>>, vector<32x128xf32>
    %1 = arith.truncf %0 : vector<32x128xf32> to vector<32x128xbf16>
    %c0_1 = arith.constant 0 : index
    %c0_2 = arith.constant 0 : index
    %2 = vector.load %arg2[%c0_1, %c0_2] : memref<128x128xbf16, #tpu.memory_space<vmem>>, vector<128x128xbf16>
    %cst = arith.constant dense<0.000000e+00> : vector<32x128xf32>
    %3 = tpu.matmul %1, %2, %cst {dimension_numbers = #tpu.dot_dimension_numbers<[1], [0], [0], [1], [0, 0, 1, 1], [], []>} : vector<32x128xbf16>, vector<128x128xbf16>, vector<32x128xf32> -> vector<32x128xf32>
    %c0_3 = arith.constant 0 : index
    %c0_4 = arith.constant 0 : index
    %4 = vector.load %arg3[%c0_3, %c0_4] : memref<1x128xf32, #tpu.memory_space<vmem>>, vector<1x128xf32>
    %5 = vector.broadcast %4 : vector<1x128xf32> to vector<32x128xf32>
    %6 = arith.addf %3, %5 : vector<32x128xf32>
    %c0_5 = arith.constant 0 : index
    %c0_6 = arith.constant 0 : index
    %7 = vector.load %arg4[%c0_5, %c0_6] : memref<32x128xf32, #tpu.memory_space<vmem>>, vector<32x128xf32>
    %8 = arith.addf %6, %7 : vector<32x128xf32>
    %cst_7 = arith.constant dense<0.000000e+00> : vector<32xf32>
    %9 = vector.multi_reduction <add>, %8, %cst_7 [1] : vector<32x128xf32> to vector<32xf32>
    %10 = vector.shape_cast %9 : vector<32xf32> to vector<32x1xf32>
    %cst_8 = arith.constant 1.280000e+02 : f32
    %11 = vector.broadcast %cst_8 : f32 to vector<32x1xf32>
    %12 = arith.divf %10, %11 : vector<32x1xf32>
    %13 = vector.broadcast %12 : vector<32x1xf32> to vector<32x128xf32>
    %14 = arith.subf %8, %13 : vector<32x128xf32>
    %15 = arith.mulf %14, %14 : vector<32x128xf32>
    %cst_9 = arith.constant dense<0.000000e+00> : vector<32xf32>
    %16 = vector.multi_reduction <add>, %15, %cst_9 [1] : vector<32x128xf32> to vector<32xf32>
    %17 = vector.shape_cast %16 : vector<32xf32> to vector<32x1xf32>
    %cst_10 = arith.constant 1.280000e+02 : f32
    %18 = vector.broadcast %cst_10 : f32 to vector<32x1xf32>
    %19 = arith.divf %17, %18 : vector<32x1xf32>
    %20 = vector.broadcast %12 : vector<32x1xf32> to vector<32x128xf32>
    %21 = arith.subf %8, %20 : vector<32x128xf32>
    %cst_11 = arith.constant 9.99999974E-6 : f32
    %22 = vector.broadcast %cst_11 : f32 to vector<32x1xf32>
    %23 = arith.addf %19, %22 : vector<32x1xf32>
    %24 = math.rsqrt %23 : vector<32x1xf32>
    %25 = vector.broadcast %24 : vector<32x1xf32> to vector<32x128xf32>
    %26 = arith.mulf %21, %25 : vector<32x128xf32>
    %c0_12 = arith.constant 0 : index
    %c0_13 = arith.constant 0 : index
    %27 = vector.load %arg5[%c0_12, %c0_13] : memref<1x128xf32, #tpu.memory_space<vmem>>, vector<1x128xf32>
    %28 = vector.broadcast %27 : vector<1x128xf32> to vector<32x128xf32>
    %29 = arith.mulf %26, %28 : vector<32x128xf32>
    %c0_14 = arith.constant 0 : index
    %c0_15 = arith.constant 0 : index
    %30 = vector.load %arg6[%c0_14, %c0_15] : memref<1x128xf32, #tpu.memory_space<vmem>>, vector<1x128xf32>
    %31 = vector.broadcast %30 : vector<1x128xf32> to vector<32x128xf32>
    %32 = arith.addf %29, %31 : vector<32x128xf32>
    %c0_16 = arith.constant 0 : index
    %c0_17 = arith.constant 0 : index
    %33 = vector.load %arg7[%c0_16, %c0_17] : memref<32x128xf32, #tpu.memory_space<vmem>>, vector<32x128xf32>
    tpu.vector_store %arg7[%c0_16, %c0_17], %32 {strides = array<i32>} : memref<32x128xf32, #tpu.memory_space<vmem>>, vector<32x128xf32>,
    return
  }
  func.func @transform_0(%arg0: i32) -> (i32, i32) {
    %c0_i32 = arith.constant 0 : i32
    %c0_i32_0 = arith.constant 0 : i32
    return %arg0, %c0_i32 : i32, i32
  }
  func.func @transform_1(%arg0: i32) -> (i32, i32) {
    %c0_i32 = arith.constant 0 : i32
    %c0_i32_0 = arith.constant 0 : i32
    %c0_i32_1 = arith.constant 0 : i32
    return %c0_i32, %c0_i32_0 : i32, i32
  }
  func.func @transform_2(%arg0: i32) -> (i32, i32) {
    %c0_i32 = arith.constant 0 : i32
    %c0_i32_0 = arith.constant 0 : i32
    %c0_i32_1 = arith.constant 0 : i32
    return %c0_i32, %c0_i32_0 : i32, i32
  }
  func.func @transform_3(%arg0: i32) -> (i32, i32) {
    %c0_i32 = arith.constant 0 : i32
    %c0_i32_0 = arith.constant 0 : i32
    return %arg0, %c0_i32 : i32, i32
  }
  func.func @transform_4(%arg0: i32) -> (i32, i32) {
    %c0_i32 = arith.constant 0 : i32
    %c0_i32_0 = arith.constant 0 : i32
    %c0_i32_1 = arith.constant 0 : i32
    return %c0_i32, %c0_i32_0 : i32, i32
  }
  func.func @transform_5(%arg0: i32) -> (i32, i32) {
    %c0_i32 = arith.constant 0 : i32
    %c0_i32_0 = arith.constant 0 : i32
    %c0_i32_1 = arith.constant 0 : i32
    return %c0_i32, %c0_i32_0 : i32, i32
  }
  func.func @transform_6(%arg0: i32) -> (i32, i32) {
    %c0_i32 = arith.constant 0 : i32
    %c0_i32_0 = arith.constant 0 : i32
    return %arg0, %c0_i32 : i32, i32
  }
}

module attributes {stable_mosaic.version = 11 : i64} {
  func.func @_attn_kernel(%arg0: i32, %arg1: i32, %arg2: memref<1x16x128xf32, #tpu.memory_space<vmem>>, %arg3: memref<1x16x128xf32, #tpu.memory_space<vmem>>, %arg4: memref<1x16x128xf32, #tpu.memory_space<vmem>>, %arg5: memref<1x16x16xf32, #tpu.memory_space<vmem>>, %arg6: memref<1x16x128xf32, #tpu.memory_space<vmem>>) attributes {dimension_semantics = [#tpu.dimension_semantics<parallel>, #tpu.dimension_semantics<parallel>], iteration_bounds = array<i64: 2, 1>, scalar_prefetch = 0 : i64, scratch_operands = 0 : i64, tpu.core_type = #tpu.core_type<tc>, window_params = [{transform_indices = @transform_0, window_bounds = array<i64: 1, 16, 128>}, {transform_indices = @transform_1, window_bounds = array<i64: 1, 16, 128>}, {transform_indices = @transform_2, window_bounds = array<i64: 1, 16, 128>}, {transform_indices = @transform_3, window_bounds = array<i64: 1, 16, 16>}, {transform_indices = @transform_4, window_bounds = array<i64: 1, 16, 128>}]} {
    %c0 = arith.constant 0 : index
    %c0_0 = arith.constant 0 : index
    %c0_1 = arith.constant 0 : index
    %0 = vector.load %arg5[%c0, %c0_0, %c0_1] : memref<1x16x16xf32, #tpu.memory_space<vmem>>, vector<1x16x16xf32>
    %1 = vector.shape_cast %0 : vector<1x16x16xf32> to vector<16x16xf32>
    %c0_2 = arith.constant 0 : index
    %c0_3 = arith.constant 0 : index
    %c0_4 = arith.constant 0 : index
    %2 = vector.load %arg2[%c0_2, %c0_3, %c0_4] : memref<1x16x128xf32, #tpu.memory_space<vmem>>, vector<1x16x128xf32>
    %3 = vector.shape_cast %2 : vector<1x16x128xf32> to vector<16x128xf32>
    %4 = arith.truncf %3 : vector<16x128xf32> to vector<16x128xbf16>
    %c0_5 = arith.constant 0 : index
    %c0_6 = arith.constant 0 : index
    %c0_7 = arith.constant 0 : index
    %5 = vector.load %arg3[%c0_5, %c0_6, %c0_7] : memref<1x16x128xf32, #tpu.memory_space<vmem>>, vector<1x16x128xf32>
    %6 = vector.shape_cast %5 : vector<1x16x128xf32> to vector<16x128xf32>
    %7 = arith.truncf %6 : vector<16x128xf32> to vector<16x128xbf16>
    %c0_8 = arith.constant 0 : index
    %c0_9 = arith.constant 0 : index
    %c0_10 = arith.constant 0 : index
    %8 = vector.load %arg4[%c0_8, %c0_9, %c0_10] : memref<1x16x128xf32, #tpu.memory_space<vmem>>, vector<1x16x128xf32>
    %9 = vector.shape_cast %8 : vector<1x16x128xf32> to vector<16x128xf32>
    %10 = arith.truncf %9 : vector<16x128xf32> to vector<16x128xbf16>
    %11 = vector.extract_strided_slice %4 {offsets = [0, 0], sizes = [16, 32], strides = [1, 1]} : vector<16x128xbf16> to vector<16x32xbf16>
    %12 = vector.extract_strided_slice %7 {offsets = [0, 0], sizes = [16, 32], strides = [1, 1]} : vector<16x128xbf16> to vector<16x32xbf16>
    %13 = vector.extract_strided_slice %10 {offsets = [0, 0], sizes = [16, 32], strides = [1, 1]} : vector<16x128xbf16> to vector<16x32xbf16>
    %cst = arith.constant dense<0.000000e+00> : vector<16x16xf32>
    %14 = tpu.matmul %11, %12, %cst {dimension_numbers = #tpu.dot_dimension_numbers<[1], [1], [0], [0], [0, 0, 1, 0], [], []>} : vector<16x32xbf16>, vector<16x32xbf16>, vector<16x16xf32> -> vector<16x16xf32>
    %15 = arith.addf %14, %1 : vector<16x16xf32>
    %cst_11 = arith.constant dense<0xFF800000> : vector<16xf32>
    %16 = vector.multi_reduction <maximumf>, %15, %cst_11 [1] : vector<16x16xf32> to vector<16xf32>
    %17 = vector.shape_cast %16 : vector<16xf32> to vector<16x1xf32>
    %18 = vector.broadcast %17 : vector<16x1xf32> to vector<16x16xf32>
    %19 = arith.subf %15, %18 : vector<16x16xf32>
    %20 = math.exp %19 : vector<16x16xf32>
    %cst_12 = arith.constant dense<0.000000e+00> : vector<16xf32>
    %21 = vector.multi_reduction <add>, %20, %cst_12 [1] : vector<16x16xf32> to vector<16xf32>
    %22 = vector.shape_cast %21 : vector<16xf32> to vector<16x1xf32>
    %23 = tpu.reciprocal %22 {approx = true} : vector<16x1xf32> -> vector<16x1xf32>
    %24 = vector.broadcast %23 : vector<16x1xf32> to vector<16x16xf32>
    %25 = arith.mulf %20, %24 : vector<16x16xf32>
    %26 = arith.truncf %25 : vector<16x16xf32> to vector<16x16xbf16>
    %cst_13 = arith.constant dense<0.000000e+00> : vector<16x32xf32>
    %27 = tpu.matmul %26, %13, %cst_13 {dimension_numbers = #tpu.dot_dimension_numbers<[1], [0], [0], [1], [0, 0, 1, 1], [], []>} : vector<16x16xbf16>, vector<16x32xbf16>, vector<16x32xf32> -> vector<16x32xf32>
    %28 = vector.extract_strided_slice %4 {offsets = [0, 32], sizes = [16, 32], strides = [1, 1]} : vector<16x128xbf16> to vector<16x32xbf16>
    %29 = vector.extract_strided_slice %7 {offsets = [0, 32], sizes = [16, 32], strides = [1, 1]} : vector<16x128xbf16> to vector<16x32xbf16>
    %30 = vector.extract_strided_slice %10 {offsets = [0, 32], sizes = [16, 32], strides = [1, 1]} : vector<16x128xbf16> to vector<16x32xbf16>
    %cst_14 = arith.constant dense<0.000000e+00> : vector<16x16xf32>
    %31 = tpu.matmul %28, %29, %cst_14 {dimension_numbers = #tpu.dot_dimension_numbers<[1], [1], [0], [0], [0, 0, 1, 0], [], []>} : vector<16x32xbf16>, vector<16x32xbf16>, vector<16x16xf32> -> vector<16x16xf32>
    %32 = arith.addf %31, %1 : vector<16x16xf32>
    %cst_15 = arith.constant dense<0xFF800000> : vector<16xf32>
    %33 = vector.multi_reduction <maximumf>, %32, %cst_15 [1] : vector<16x16xf32> to vector<16xf32>
    %34 = vector.shape_cast %33 : vector<16xf32> to vector<16x1xf32>
    %35 = vector.broadcast %34 : vector<16x1xf32> to vector<16x16xf32>
    %36 = arith.subf %32, %35 : vector<16x16xf32>
    %37 = math.exp %36 : vector<16x16xf32>
    %cst_16 = arith.constant dense<0.000000e+00> : vector<16xf32>
    %38 = vector.multi_reduction <add>, %37, %cst_16 [1] : vector<16x16xf32> to vector<16xf32>
    %39 = vector.shape_cast %38 : vector<16xf32> to vector<16x1xf32>
    %40 = tpu.reciprocal %39 {approx = true} : vector<16x1xf32> -> vector<16x1xf32>
    %41 = vector.broadcast %40 : vector<16x1xf32> to vector<16x16xf32>
    %42 = arith.mulf %37, %41 : vector<16x16xf32>
    %43 = arith.truncf %42 : vector<16x16xf32> to vector<16x16xbf16>
    %cst_17 = arith.constant dense<0.000000e+00> : vector<16x32xf32>
    %44 = tpu.matmul %43, %30, %cst_17 {dimension_numbers = #tpu.dot_dimension_numbers<[1], [0], [0], [1], [0, 0, 1, 1], [], []>} : vector<16x16xbf16>, vector<16x32xbf16>, vector<16x32xf32> -> vector<16x32xf32>
    %45 = vector.extract_strided_slice %4 {offsets = [0, 64], sizes = [16, 32], strides = [1, 1]} : vector<16x128xbf16> to vector<16x32xbf16>
    %46 = vector.extract_strided_slice %7 {offsets = [0, 64], sizes = [16, 32], strides = [1, 1]} : vector<16x128xbf16> to vector<16x32xbf16>
    %47 = vector.extract_strided_slice %10 {offsets = [0, 64], sizes = [16, 32], strides = [1, 1]} : vector<16x128xbf16> to vector<16x32xbf16>
    %cst_18 = arith.constant dense<0.000000e+00> : vector<16x16xf32>
    %48 = tpu.matmul %45, %46, %cst_18 {dimension_numbers = #tpu.dot_dimension_numbers<[1], [1], [0], [0], [0, 0, 1, 0], [], []>} : vector<16x32xbf16>, vector<16x32xbf16>, vector<16x16xf32> -> vector<16x16xf32>
    %49 = arith.addf %48, %1 : vector<16x16xf32>
    %cst_19 = arith.constant dense<0xFF800000> : vector<16xf32>
    %50 = vector.multi_reduction <maximumf>, %49, %cst_19 [1] : vector<16x16xf32> to vector<16xf32>
    %51 = vector.shape_cast %50 : vector<16xf32> to vector<16x1xf32>
    %52 = vector.broadcast %51 : vector<16x1xf32> to vector<16x16xf32>
    %53 = arith.subf %49, %52 : vector<16x16xf32>
    %54 = math.exp %53 : vector<16x16xf32>
    %cst_20 = arith.constant dense<0.000000e+00> : vector<16xf32>
    %55 = vector.multi_reduction <add>, %54, %cst_20 [1] : vector<16x16xf32> to vector<16xf32>
    %56 = vector.shape_cast %55 : vector<16xf32> to vector<16x1xf32>
    %57 = tpu.reciprocal %56 {approx = true} : vector<16x1xf32> -> vector<16x1xf32>
    %58 = vector.broadcast %57 : vector<16x1xf32> to vector<16x16xf32>
    %59 = arith.mulf %54, %58 : vector<16x16xf32>
    %60 = arith.truncf %59 : vector<16x16xf32> to vector<16x16xbf16>
    %cst_21 = arith.constant dense<0.000000e+00> : vector<16x32xf32>
    %61 = tpu.matmul %60, %47, %cst_21 {dimension_numbers = #tpu.dot_dimension_numbers<[1], [0], [0], [1], [0, 0, 1, 1], [], []>} : vector<16x16xbf16>, vector<16x32xbf16>, vector<16x32xf32> -> vector<16x32xf32>
    %62 = vector.extract_strided_slice %4 {offsets = [0, 96], sizes = [16, 32], strides = [1, 1]} : vector<16x128xbf16> to vector<16x32xbf16>
    %63 = vector.extract_strided_slice %7 {offsets = [0, 96], sizes = [16, 32], strides = [1, 1]} : vector<16x128xbf16> to vector<16x32xbf16>
    %64 = vector.extract_strided_slice %10 {offsets = [0, 96], sizes = [16, 32], strides = [1, 1]} : vector<16x128xbf16> to vector<16x32xbf16>
    %cst_22 = arith.constant dense<0.000000e+00> : vector<16x16xf32>
    %65 = tpu.matmul %62, %63, %cst_22 {dimension_numbers = #tpu.dot_dimension_numbers<[1], [1], [0], [0], [0, 0, 1, 0], [], []>} : vector<16x32xbf16>, vector<16x32xbf16>, vector<16x16xf32> -> vector<16x16xf32>
    %66 = arith.addf %65, %1 : vector<16x16xf32>
    %cst_23 = arith.constant dense<0xFF800000> : vector<16xf32>
    %67 = vector.multi_reduction <maximumf>, %66, %cst_23 [1] : vector<16x16xf32> to vector<16xf32>
    %68 = vector.shape_cast %67 : vector<16xf32> to vector<16x1xf32>
    %69 = vector.broadcast %68 : vector<16x1xf32> to vector<16x16xf32>
    %70 = arith.subf %66, %69 : vector<16x16xf32>
    %71 = math.exp %70 : vector<16x16xf32>
    %cst_24 = arith.constant dense<0.000000e+00> : vector<16xf32>
    %72 = vector.multi_reduction <add>, %71, %cst_24 [1] : vector<16x16xf32> to vector<16xf32>
    %73 = vector.shape_cast %72 : vector<16xf32> to vector<16x1xf32>
    %74 = tpu.reciprocal %73 {approx = true} : vector<16x1xf32> -> vector<16x1xf32>
    %75 = vector.broadcast %74 : vector<16x1xf32> to vector<16x16xf32>
    %76 = arith.mulf %71, %75 : vector<16x16xf32>
    %77 = arith.truncf %76 : vector<16x16xf32> to vector<16x16xbf16>
    %cst_25 = arith.constant dense<0.000000e+00> : vector<16x32xf32>
    %78 = tpu.matmul %77, %64, %cst_25 {dimension_numbers = #tpu.dot_dimension_numbers<[1], [0], [0], [1], [0, 0, 1, 1], [], []>} : vector<16x16xbf16>, vector<16x32xbf16>, vector<16x32xf32> -> vector<16x32xf32>
    %79 = tpu.concatenate %27, %44, %61, %78 in 1 : vector<16x32xf32>, vector<16x32xf32>, vector<16x32xf32>, vector<16x32xf32> -> vector<16x128xf32>
    %c0_26 = arith.constant 0 : index
    %c0_27 = arith.constant 0 : index
    %c0_28 = arith.constant 0 : index
    %80 = vector.load %arg6[%c0_26, %c0_27, %c0_28] : memref<1x16x128xf32, #tpu.memory_space<vmem>>, vector<1x16x128xf32>
    %81 = vector.shape_cast %80 : vector<1x16x128xf32> to vector<16x128xf32>
    %82 = vector.shape_cast %79 : vector<16x128xf32> to vector<1x16x128xf32>
    tpu.vector_store %arg6[%c0_26, %c0_27, %c0_28], %82 {strides = array<i32>} : memref<1x16x128xf32, #tpu.memory_space<vmem>>, vector<1x16x128xf32>,
    return
  }
  func.func @transform_0(%arg0: i32, %arg1: i32) -> (i32, i32, i32) {
    %c0_i32 = arith.constant 0 : i32
    %c0_i32_0 = arith.constant 0 : i32
    return %arg0, %arg1, %c0_i32 : i32, i32, i32
  }
  func.func @transform_1(%arg0: i32, %arg1: i32) -> (i32, i32, i32) {
    %c0_i32 = arith.constant 0 : i32
    %c1_i32 = arith.constant 1 : i32
    %c0_i32_0 = arith.constant 0 : i32
    return %arg0, %c0_i32, %c1_i32 : i32, i32, i32
  }
  func.func @transform_2(%arg0: i32, %arg1: i32) -> (i32, i32, i32) {
    %c0_i32 = arith.constant 0 : i32
    %c2_i32 = arith.constant 2 : i32
    %c0_i32_0 = arith.constant 0 : i32
    return %arg0, %c0_i32, %c2_i32 : i32, i32, i32
  }
  func.func @transform_3(%arg0: i32, %arg1: i32) -> (i32, i32, i32) {
    %c0_i32 = arith.constant 0 : i32
    %c0_i32_0 = arith.constant 0 : i32
    %c0_i32_1 = arith.constant 0 : i32
    return %c0_i32, %arg1, %c0_i32_0 : i32, i32, i32
  }
  func.func @transform_4(%arg0: i32, %arg1: i32) -> (i32, i32, i32) {
    %c0_i32 = arith.constant 0 : i32
    %c0_i32_0 = arith.constant 0 : i32
    return %arg0, %arg1, %c0_i32 : i32, i32, i32
  }
}

module attributes {stable_mosaic.version = 11 : i64} {
  func.func @_linear_kernel(%arg0: i32, %arg1: i32, %arg2: i32, %arg3: memref<32x128xf32, #tpu.memory_space<vmem>>, %arg4: memref<128x384xbf16, #tpu.memory_space<vmem>>, %arg5: memref<1x384xf32, #tpu.memory_space<vmem>>, %arg6: memref<32x384xf32, #tpu.memory_space<vmem>>) attributes {dimension_semantics = [#tpu.dimension_semantics<parallel>, #tpu.dimension_semantics<parallel>, #tpu.dimension_semantics<arbitrary>], iteration_bounds = array<i64: 1, 1, 1>, scalar_prefetch = 0 : i64, scratch_operands = 0 : i64, tpu.core_type = #tpu.core_type<tc>, window_params = [{transform_indices = @transform_0, window_bounds = array<i64: 32, 128>}, {transform_indices = @transform_1, window_bounds = array<i64: 128, 384>}, {transform_indices = @transform_2, window_bounds = array<i64: 1, 384>}, {transform_indices = @transform_3, window_bounds = array<i64: 32, 384>}]} {
    %c0_i32 = arith.constant 0 : i32
    %0 = arith.cmpi eq, %arg2, %c0_i32 : i32
    %1 = arith.extui %0 : i1 to i32
    %c0_i32_0 = arith.constant 0 : i32
    %2 = arith.cmpi ne, %1, %c0_i32_0 : i32
    scf.if %2 {
      %cst_10 = arith.constant 0.000000e+00 : f32
      %13 = vector.broadcast %cst_10 : f32 to vector<32x384xf32>
      %c0_11 = arith.constant 0 : index
      %c0_12 = arith.constant 0 : index
      %14 = vector.load %arg6[%c0_11, %c0_12] : memref<32x384xf32, #tpu.memory_space<vmem>>, vector<32x384xf32>
      tpu.vector_store %arg6[%c0_11, %c0_12], %13 {strides = array<i32>} : memref<32x384xf32, #tpu.memory_space<vmem>>, vector<32x384xf32>,
    } else {
    }
    %c0 = arith.constant 0 : index
    %c0_1 = arith.constant 0 : index
    %3 = vector.load %arg6[%c0, %c0_1] : memref<32x384xf32, #tpu.memory_space<vmem>>, vector<32x384xf32>
    %c0_2 = arith.constant 0 : index
    %c0_3 = arith.constant 0 : index
    %4 = vector.load %arg3[%c0_2, %c0_3] : memref<32x128xf32, #tpu.memory_space<vmem>>, vector<32x128xf32>
    %5 = arith.truncf %4 : vector<32x128xf32> to vector<32x128xbf16>
    %c0_4 = arith.constant 0 : index
    %c0_5 = arith.constant 0 : index
    %6 = vector.load %arg4[%c0_4, %c0_5] : memref<128x384xbf16, #tpu.memory_space<vmem>>, vector<128x384xbf16>
    %cst = arith.constant dense<0.000000e+00> : vector<32x384xf32>
    %7 = tpu.matmul %5, %6, %cst {dimension_numbers = #tpu.dot_dimension_numbers<[1], [0], [0], [1], [0, 0, 1, 1], [], []>} : vector<32x128xbf16>, vector<128x384xbf16>, vector<32x384xf32> -> vector<32x384xf32>
    %8 = arith.addf %3, %7 : vector<32x384xf32>
    %c0_6 = arith.constant 0 : index
    %c0_7 = arith.constant 0 : index
    %9 = vector.load %arg6[%c0_6, %c0_7] : memref<32x384xf32, #tpu.memory_space<vmem>>, vector<32x384xf32>
    tpu.vector_store %arg6[%c0_6, %c0_7], %8 {strides = array<i32>} : memref<32x384xf32, #tpu.memory_space<vmem>>, vector<32x384xf32>,
    %c0_i32_8 = arith.constant 0 : i32
    %10 = arith.cmpi eq, %arg2, %c0_i32_8 : i32
    %11 = arith.extui %10 : i1 to i32
    %c0_i32_9 = arith.constant 0 : i32
    %12 = arith.cmpi ne, %11, %c0_i32_9 : i32
    scf.if %12 {
      %c0_10 = arith.constant 0 : index
      %c0_11 = arith.constant 0 : index
      %13 = vector.load %arg6[%c0_10, %c0_11] : memref<32x384xf32, #tpu.memory_space<vmem>>, vector<32x384xf32>
      %c0_12 = arith.constant 0 : index
      %c0_13 = arith.constant 0 : index
      %14 = vector.load %arg5[%c0_12, %c0_13] : memref<1x384xf32, #tpu.memory_space<vmem>>, vector<1x384xf32>
      %15 = vector.broadcast %14 : vector<1x384xf32> to vector<32x384xf32>
      %16 = arith.addf %13, %15 : vector<32x384xf32>
      %c0_14 = arith.constant 0 : index
      %c0_15 = arith.constant 0 : index
      %17 = vector.load %arg6[%c0_14, %c0_15] : memref<32x384xf32, #tpu.memory_space<vmem>>, vector<32x384xf32>
      tpu.vector_store %arg6[%c0_14, %c0_15], %16 {strides = array<i32>} : memref<32x384xf32, #tpu.memory_space<vmem>>, vector<32x384xf32>,
    } else {
    }
    return
  }
  func.func @transform_0(%arg0: i32, %arg1: i32, %arg2: i32) -> (i32, i32) {
    %c0_i32 = arith.constant 0 : i32
    return %arg0, %arg2 : i32, i32
  }
  func.func @transform_1(%arg0: i32, %arg1: i32, %arg2: i32) -> (i32, i32) {
    %c0_i32 = arith.constant 0 : i32
    return %arg2, %arg1 : i32, i32
  }
  func.func @transform_2(%arg0: i32, %arg1: i32, %arg2: i32) -> (i32, i32) {
    %c0_i32 = arith.constant 0 : i32
    %c0_i32_0 = arith.constant 0 : i32
    return %c0_i32, %arg1 : i32, i32
  }
  func.func @transform_3(%arg0: i32, %arg1: i32, %arg2: i32) -> (i32, i32) {
    %c0_i32 = arith.constant 0 : i32
    return %arg0, %arg1 : i32, i32
  }
}

module attributes {stable_mosaic.version = 11 : i64} {
  func.func @_attn_kernel(%arg0: i32, %arg1: i32, %arg2: memref<1x16x128xf32, #tpu.memory_space<vmem>>, %arg3: memref<1x16x128xf32, #tpu.memory_space<vmem>>, %arg4: memref<1x16x128xf32, #tpu.memory_space<vmem>>, %arg5: memref<1x16x128xf32, #tpu.memory_space<vmem>>) attributes {dimension_semantics = [#tpu.dimension_semantics<parallel>, #tpu.dimension_semantics<parallel>], iteration_bounds = array<i64: 2, 1>, scalar_prefetch = 0 : i64, scratch_operands = 0 : i64, tpu.core_type = #tpu.core_type<tc>, window_params = [{transform_indices = @transform_0, window_bounds = array<i64: 1, 16, 128>}, {transform_indices = @transform_1, window_bounds = array<i64: 1, 16, 128>}, {transform_indices = @transform_2, window_bounds = array<i64: 1, 16, 128>}, {transform_indices = @transform_3, window_bounds = array<i64: 1, 16, 128>}]} {
    %c0 = arith.constant 0 : index
    %c0_0 = arith.constant 0 : index
    %c0_1 = arith.constant 0 : index
    %0 = vector.load %arg2[%c0, %c0_0, %c0_1] : memref<1x16x128xf32, #tpu.memory_space<vmem>>, vector<1x16x128xf32>
    %1 = vector.shape_cast %0 : vector<1x16x128xf32> to vector<16x128xf32>
    %2 = arith.truncf %1 : vector<16x128xf32> to vector<16x128xbf16>
    %c0_2 = arith.constant 0 : index
    %c0_3 = arith.constant 0 : index
    %c0_4 = arith.constant 0 : index
    %3 = vector.load %arg3[%c0_2, %c0_3, %c0_4] : memref<1x16x128xf32, #tpu.memory_space<vmem>>, vector<1x16x128xf32>
    %4 = vector.shape_cast %3 : vector<1x16x128xf32> to vector<16x128xf32>
    %5 = arith.truncf %4 : vector<16x128xf32> to vector<16x128xbf16>
    %c0_5 = arith.constant 0 : index
    %c0_6 = arith.constant 0 : index
    %c0_7 = arith.constant 0 : index
    %6 = vector.load %arg4[%c0_5, %c0_6, %c0_7] : memref<1x16x128xf32, #tpu.memory_space<vmem>>, vector<1x16x128xf32>
    %7 = vector.shape_cast %6 : vector<1x16x128xf32> to vector<16x128xf32>
    %8 = arith.truncf %7 : vector<16x128xf32> to vector<16x128xbf16>
    %9 = vector.extract_strided_slice %2 {offsets = [0, 0], sizes = [16, 32], strides = [1, 1]} : vector<16x128xbf16> to vector<16x32xbf16>
    %10 = vector.extract_strided_slice %5 {offsets = [0, 0], sizes = [16, 32], strides = [1, 1]} : vector<16x128xbf16> to vector<16x32xbf16>
    %11 = vector.extract_strided_slice %8 {offsets = [0, 0], sizes = [16, 32], strides = [1, 1]} : vector<16x128xbf16> to vector<16x32xbf16>
    %cst = arith.constant dense<0.000000e+00> : vector<16x16xf32>
    %12 = tpu.matmul %9, %10, %cst {dimension_numbers = #tpu.dot_dimension_numbers<[1], [1], [0], [0], [0, 0, 1, 0], [], []>} : vector<16x32xbf16>, vector<16x32xbf16>, vector<16x16xf32> -> vector<16x16xf32>
    %cst_8 = arith.constant dense<0xFF800000> : vector<16xf32>
    %13 = vector.multi_reduction <maximumf>, %12, %cst_8 [1] : vector<16x16xf32> to vector<16xf32>
    %14 = vector.shape_cast %13 : vector<16xf32> to vector<16x1xf32>
    %15 = vector.broadcast %14 : vector<16x1xf32> to vector<16x16xf32>
    %16 = arith.subf %12, %15 : vector<16x16xf32>
    %17 = math.exp %16 : vector<16x16xf32>
    %cst_9 = arith.constant dense<0.000000e+00> : vector<16xf32>
    %18 = vector.multi_reduction <add>, %17, %cst_9 [1] : vector<16x16xf32> to vector<16xf32>
    %19 = vector.shape_cast %18 : vector<16xf32> to vector<16x1xf32>
    %20 = tpu.reciprocal %19 {approx = true} : vector<16x1xf32> -> vector<16x1xf32>
    %21 = vector.broadcast %20 : vector<16x1xf32> to vector<16x16xf32>
    %22 = arith.mulf %17, %21 : vector<16x16xf32>
    %23 = arith.truncf %22 : vector<16x16xf32> to vector<16x16xbf16>
    %cst_10 = arith.constant dense<0.000000e+00> : vector<16x32xf32>
    %24 = tpu.matmul %23, %11, %cst_10 {dimension_numbers = #tpu.dot_dimension_numbers<[1], [0], [0], [1], [0, 0, 1, 1], [], []>} : vector<16x16xbf16>, vector<16x32xbf16>, vector<16x32xf32> -> vector<16x32xf32>
    %25 = vector.extract_strided_slice %2 {offsets = [0, 32], sizes = [16, 32], strides = [1, 1]} : vector<16x128xbf16> to vector<16x32xbf16>
    %26 = vector.extract_strided_slice %5 {offsets = [0, 32], sizes = [16, 32], strides = [1, 1]} : vector<16x128xbf16> to vector<16x32xbf16>
    %27 = vector.extract_strided_slice %8 {offsets = [0, 32], sizes = [16, 32], strides = [1, 1]} : vector<16x128xbf16> to vector<16x32xbf16>
    %cst_11 = arith.constant dense<0.000000e+00> : vector<16x16xf32>
    %28 = tpu.matmul %25, %26, %cst_11 {dimension_numbers = #tpu.dot_dimension_numbers<[1], [1], [0], [0], [0, 0, 1, 0], [], []>} : vector<16x32xbf16>, vector<16x32xbf16>, vector<16x16xf32> -> vector<16x16xf32>
    %cst_12 = arith.constant dense<0xFF800000> : vector<16xf32>
    %29 = vector.multi_reduction <maximumf>, %28, %cst_12 [1] : vector<16x16xf32> to vector<16xf32>
    %30 = vector.shape_cast %29 : vector<16xf32> to vector<16x1xf32>
    %31 = vector.broadcast %30 : vector<16x1xf32> to vector<16x16xf32>
    %32 = arith.subf %28, %31 : vector<16x16xf32>
    %33 = math.exp %32 : vector<16x16xf32>
    %cst_13 = arith.constant dense<0.000000e+00> : vector<16xf32>
    %34 = vector.multi_reduction <add>, %33, %cst_13 [1] : vector<16x16xf32> to vector<16xf32>
    %35 = vector.shape_cast %34 : vector<16xf32> to vector<16x1xf32>
    %36 = tpu.reciprocal %35 {approx = true} : vector<16x1xf32> -> vector<16x1xf32>
    %37 = vector.broadcast %36 : vector<16x1xf32> to vector<16x16xf32>
    %38 = arith.mulf %33, %37 : vector<16x16xf32>
    %39 = arith.truncf %38 : vector<16x16xf32> to vector<16x16xbf16>
    %cst_14 = arith.constant dense<0.000000e+00> : vector<16x32xf32>
    %40 = tpu.matmul %39, %27, %cst_14 {dimension_numbers = #tpu.dot_dimension_numbers<[1], [0], [0], [1], [0, 0, 1, 1], [], []>} : vector<16x16xbf16>, vector<16x32xbf16>, vector<16x32xf32> -> vector<16x32xf32>
    %41 = vector.extract_strided_slice %2 {offsets = [0, 64], sizes = [16, 32], strides = [1, 1]} : vector<16x128xbf16> to vector<16x32xbf16>
    %42 = vector.extract_strided_slice %5 {offsets = [0, 64], sizes = [16, 32], strides = [1, 1]} : vector<16x128xbf16> to vector<16x32xbf16>
    %43 = vector.extract_strided_slice %8 {offsets = [0, 64], sizes = [16, 32], strides = [1, 1]} : vector<16x128xbf16> to vector<16x32xbf16>
    %cst_15 = arith.constant dense<0.000000e+00> : vector<16x16xf32>
    %44 = tpu.matmul %41, %42, %cst_15 {dimension_numbers = #tpu.dot_dimension_numbers<[1], [1], [0], [0], [0, 0, 1, 0], [], []>} : vector<16x32xbf16>, vector<16x32xbf16>, vector<16x16xf32> -> vector<16x16xf32>
    %cst_16 = arith.constant dense<0xFF800000> : vector<16xf32>
    %45 = vector.multi_reduction <maximumf>, %44, %cst_16 [1] : vector<16x16xf32> to vector<16xf32>
    %46 = vector.shape_cast %45 : vector<16xf32> to vector<16x1xf32>
    %47 = vector.broadcast %46 : vector<16x1xf32> to vector<16x16xf32>
    %48 = arith.subf %44, %47 : vector<16x16xf32>
    %49 = math.exp %48 : vector<16x16xf32>
    %cst_17 = arith.constant dense<0.000000e+00> : vector<16xf32>
    %50 = vector.multi_reduction <add>, %49, %cst_17 [1] : vector<16x16xf32> to vector<16xf32>
    %51 = vector.shape_cast %50 : vector<16xf32> to vector<16x1xf32>
    %52 = tpu.reciprocal %51 {approx = true} : vector<16x1xf32> -> vector<16x1xf32>
    %53 = vector.broadcast %52 : vector<16x1xf32> to vector<16x16xf32>
    %54 = arith.mulf %49, %53 : vector<16x16xf32>
    %55 = arith.truncf %54 : vector<16x16xf32> to vector<16x16xbf16>
    %cst_18 = arith.constant dense<0.000000e+00> : vector<16x32xf32>
    %56 = tpu.matmul %55, %43, %cst_18 {dimension_numbers = #tpu.dot_dimension_numbers<[1], [0], [0], [1], [0, 0, 1, 1], [], []>} : vector<16x16xbf16>, vector<16x32xbf16>, vector<16x32xf32> -> vector<16x32xf32>
    %57 = vector.extract_strided_slice %2 {offsets = [0, 96], sizes = [16, 32], strides = [1, 1]} : vector<16x128xbf16> to vector<16x32xbf16>
    %58 = vector.extract_strided_slice %5 {offsets = [0, 96], sizes = [16, 32], strides = [1, 1]} : vector<16x128xbf16> to vector<16x32xbf16>
    %59 = vector.extract_strided_slice %8 {offsets = [0, 96], sizes = [16, 32], strides = [1, 1]} : vector<16x128xbf16> to vector<16x32xbf16>
    %cst_19 = arith.constant dense<0.000000e+00> : vector<16x16xf32>
    %60 = tpu.matmul %57, %58, %cst_19 {dimension_numbers = #tpu.dot_dimension_numbers<[1], [1], [0], [0], [0, 0, 1, 0], [], []>} : vector<16x32xbf16>, vector<16x32xbf16>, vector<16x16xf32> -> vector<16x16xf32>
    %cst_20 = arith.constant dense<0xFF800000> : vector<16xf32>
    %61 = vector.multi_reduction <maximumf>, %60, %cst_20 [1] : vector<16x16xf32> to vector<16xf32>
    %62 = vector.shape_cast %61 : vector<16xf32> to vector<16x1xf32>
    %63 = vector.broadcast %62 : vector<16x1xf32> to vector<16x16xf32>
    %64 = arith.subf %60, %63 : vector<16x16xf32>
    %65 = math.exp %64 : vector<16x16xf32>
    %cst_21 = arith.constant dense<0.000000e+00> : vector<16xf32>
    %66 = vector.multi_reduction <add>, %65, %cst_21 [1] : vector<16x16xf32> to vector<16xf32>
    %67 = vector.shape_cast %66 : vector<16xf32> to vector<16x1xf32>
    %68 = tpu.reciprocal %67 {approx = true} : vector<16x1xf32> -> vector<16x1xf32>
    %69 = vector.broadcast %68 : vector<16x1xf32> to vector<16x16xf32>
    %70 = arith.mulf %65, %69 : vector<16x16xf32>
    %71 = arith.truncf %70 : vector<16x16xf32> to vector<16x16xbf16>
    %cst_22 = arith.constant dense<0.000000e+00> : vector<16x32xf32>
    %72 = tpu.matmul %71, %59, %cst_22 {dimension_numbers = #tpu.dot_dimension_numbers<[1], [0], [0], [1], [0, 0, 1, 1], [], []>} : vector<16x16xbf16>, vector<16x32xbf16>, vector<16x32xf32> -> vector<16x32xf32>
    %73 = tpu.concatenate %24, %40, %56, %72 in 1 : vector<16x32xf32>, vector<16x32xf32>, vector<16x32xf32>, vector<16x32xf32> -> vector<16x128xf32>
    %c0_23 = arith.constant 0 : index
    %c0_24 = arith.constant 0 : index
    %c0_25 = arith.constant 0 : index
    %74 = vector.load %arg5[%c0_23, %c0_24, %c0_25] : memref<1x16x128xf32, #tpu.memory_space<vmem>>, vector<1x16x128xf32>
    %75 = vector.shape_cast %74 : vector<1x16x128xf32> to vector<16x128xf32>
    %76 = vector.shape_cast %73 : vector<16x128xf32> to vector<1x16x128xf32>
    tpu.vector_store %arg5[%c0_23, %c0_24, %c0_25], %76 {strides = array<i32>} : memref<1x16x128xf32, #tpu.memory_space<vmem>>, vector<1x16x128xf32>,
    return
  }
  func.func @transform_0(%arg0: i32, %arg1: i32) -> (i32, i32, i32) {
    %c0_i32 = arith.constant 0 : i32
    %c0_i32_0 = arith.constant 0 : i32
    return %arg0, %arg1, %c0_i32 : i32, i32, i32
  }
  func.func @transform_1(%arg0: i32, %arg1: i32) -> (i32, i32, i32) {
    %c0_i32 = arith.constant 0 : i32
    %c1_i32 = arith.constant 1 : i32
    %c0_i32_0 = arith.constant 0 : i32
    return %arg0, %c0_i32, %c1_i32 : i32, i32, i32
  }
  func.func @transform_2(%arg0: i32, %arg1: i32) -> (i32, i32, i32) {
    %c0_i32 = arith.constant 0 : i32
    %c2_i32 = arith.constant 2 : i32
    %c0_i32_0 = arith.constant 0 : i32
    return %arg0, %c0_i32, %c2_i32 : i32, i32, i32
  }
  func.func @transform_3(%arg0: i32, %arg1: i32) -> (i32, i32, i32) {
    %c0_i32 = arith.constant 0 : i32
    %c0_i32_0 = arith.constant 0 : i32
    return %arg0, %arg1, %c0_i32 : i32, i32, i32
  }
}

module attributes {stable_mosaic.version = 11 : i64} {
  func.func @_ffn_ln_kernel(%arg0: i32, %arg1: i32, %arg2: memref<32x128xf32, #tpu.memory_space<vmem>>, %arg3: memref<128x256xbf16, #tpu.memory_space<vmem>>, %arg4: memref<1x256xf32, #tpu.memory_space<vmem>>, %arg5: memref<256x128xbf16, #tpu.memory_space<vmem>>, %arg6: memref<1x128xf32, #tpu.memory_space<vmem>>, %arg7: memref<1x128xf32, #tpu.memory_space<vmem>>, %arg8: memref<1x128xf32, #tpu.memory_space<vmem>>, %arg9: memref<32x128xf32, #tpu.memory_space<vmem>>) attributes {dimension_semantics = [#tpu.dimension_semantics<parallel>, #tpu.dimension_semantics<arbitrary>], iteration_bounds = array<i64: 1, 1>, scalar_prefetch = 0 : i64, scratch_operands = 0 : i64, tpu.core_type = #tpu.core_type<tc>, window_params = [{transform_indices = @transform_0, window_bounds = array<i64: 32, 128>}, {transform_indices = @transform_1, window_bounds = array<i64: 128, 256>}, {transform_indices = @transform_2, window_bounds = array<i64: 1, 256>}, {transform_indices = @transform_3, window_bounds = array<i64: 256, 128>}, {pipeline_mode = #tpu.pipeline_mode<synchronous>, transform_indices = @transform_4, window_bounds = array<i64: 1, 128>}, {pipeline_mode = #tpu.pipeline_mode<synchronous>, transform_indices = @transform_5, window_bounds = array<i64: 1, 128>}, {pipeline_mode = #tpu.pipeline_mode<synchronous>, transform_indices = @transform_6, window_bounds = array<i64: 1, 128>}, {transform_indices = @transform_7, window_bounds = array<i64: 32, 128>}]} {
    %c0_i32 = arith.constant 0 : i32
    %0 = arith.cmpi eq, %arg1, %c0_i32 : i32
    %1 = arith.extui %0 : i1 to i32
    %c0_i32_0 = arith.constant 0 : i32
    %2 = arith.cmpi ne, %1, %c0_i32_0 : i32
    scf.if %2 {
      %cst_16 = arith.constant 0.000000e+00 : f32
      %21 = vector.broadcast %cst_16 : f32 to vector<32x128xf32>
      %c0_17 = arith.constant 0 : index
      %c0_18 = arith.constant 0 : index
      %22 = vector.load %arg9[%c0_17, %c0_18] : memref<32x128xf32, #tpu.memory_space<vmem>>, vector<32x128xf32>
      tpu.vector_store %arg9[%c0_17, %c0_18], %21 {strides = array<i32>} : memref<32x128xf32, #tpu.memory_space<vmem>>, vector<32x128xf32>,
    } else {
    }
    %c0 = arith.constant 0 : index
    %c0_1 = arith.constant 0 : index
    %3 = vector.load %arg2[%c0, %c0_1] : memref<32x128xf32, #tpu.memory_space<vmem>>, vector<32x128xf32>
    %4 = arith.truncf %3 : vector<32x128xf32> to vector<32x128xbf16>
    %c0_2 = arith.constant 0 : index
    %c0_3 = arith.constant 0 : index
    %5 = vector.load %arg3[%c0_2, %c0_3] : memref<128x256xbf16, #tpu.memory_space<vmem>>, vector<128x256xbf16>
    %cst = arith.constant dense<0.000000e+00> : vector<32x256xf32>
    %6 = tpu.matmul %4, %5, %cst {dimension_numbers = #tpu.dot_dimension_numbers<[1], [0], [0], [1], [0, 0, 1, 1], [], []>} : vector<32x128xbf16>, vector<128x256xbf16>, vector<32x256xf32> -> vector<32x256xf32>
    %c0_4 = arith.constant 0 : index
    %c0_5 = arith.constant 0 : index
    %7 = vector.load %arg4[%c0_4, %c0_5] : memref<1x256xf32, #tpu.memory_space<vmem>>, vector<1x256xf32>
    %8 = vector.broadcast %7 : vector<1x256xf32> to vector<32x256xf32>
    %9 = arith.addf %6, %8 : vector<32x256xf32>
    %cst_6 = arith.constant 0.000000e+00 : f32
    %10 = vector.broadcast %cst_6 : f32 to vector<32x256xf32>
    %11 = arith.maximumf %9, %10 : vector<32x256xf32>
    %c0_7 = arith.constant 0 : index
    %c0_8 = arith.constant 0 : index
    %12 = vector.load %arg9[%c0_7, %c0_8] : memref<32x128xf32, #tpu.memory_space<vmem>>, vector<32x128xf32>
    %13 = arith.truncf %11 : vector<32x256xf32> to vector<32x256xbf16>
    %c0_9 = arith.constant 0 : index
    %c0_10 = arith.constant 0 : index
    %14 = vector.load %arg5[%c0_9, %c0_10] : memref<256x128xbf16, #tpu.memory_space<vmem>>, vector<256x128xbf16>
    %cst_11 = arith.constant dense<0.000000e+00> : vector<32x128xf32>
    %15 = tpu.matmul %13, %14, %cst_11 {dimension_numbers = #tpu.dot_dimension_numbers<[1], [0], [0], [1], [0, 0, 1, 1], [], []>} : vector<32x256xbf16>, vector<256x128xbf16>, vector<32x128xf32> -> vector<32x128xf32>
    %16 = arith.addf %12, %15 : vector<32x128xf32>
    %c0_12 = arith.constant 0 : index
    %c0_13 = arith.constant 0 : index
    %17 = vector.load %arg9[%c0_12, %c0_13] : memref<32x128xf32, #tpu.memory_space<vmem>>, vector<32x128xf32>
    tpu.vector_store %arg9[%c0_12, %c0_13], %16 {strides = array<i32>} : memref<32x128xf32, #tpu.memory_space<vmem>>, vector<32x128xf32>,
    %c0_i32_14 = arith.constant 0 : i32
    %18 = arith.cmpi eq, %arg1, %c0_i32_14 : i32
    %19 = arith.extui %18 : i1 to i32
    %c0_i32_15 = arith.constant 0 : i32
    %20 = arith.cmpi ne, %19, %c0_i32_15 : i32
    scf.if %20 {
      %c0_16 = arith.constant 0 : index
      %c0_17 = arith.constant 0 : index
      %21 = vector.load %arg9[%c0_16, %c0_17] : memref<32x128xf32, #tpu.memory_space<vmem>>, vector<32x128xf32>
      %c0_18 = arith.constant 0 : index
      %c0_19 = arith.constant 0 : index
      %22 = vector.load %arg6[%c0_18, %c0_19] : memref<1x128xf32, #tpu.memory_space<vmem>>, vector<1x128xf32>
      %23 = vector.broadcast %22 : vector<1x128xf32> to vector<32x128xf32>
      %24 = arith.addf %21, %23 : vector<32x128xf32>
      %c0_20 = arith.constant 0 : index
      %c0_21 = arith.constant 0 : index
      %25 = vector.load %arg2[%c0_20, %c0_21] : memref<32x128xf32, #tpu.memory_space<vmem>>, vector<32x128xf32>
      %26 = arith.addf %24, %25 : vector<32x128xf32>
      %cst_22 = arith.constant dense<0.000000e+00> : vector<32xf32>
      %27 = vector.multi_reduction <add>, %26, %cst_22 [1] : vector<32x128xf32> to vector<32xf32>
      %28 = vector.shape_cast %27 : vector<32xf32> to vector<32x1xf32>
      %cst_23 = arith.constant 1.280000e+02 : f32
      %29 = vector.broadcast %cst_23 : f32 to vector<32x1xf32>
      %30 = arith.divf %28, %29 : vector<32x1xf32>
      %31 = vector.broadcast %30 : vector<32x1xf32> to vector<32x128xf32>
      %32 = arith.subf %26, %31 : vector<32x128xf32>
      %33 = arith.mulf %32, %32 : vector<32x128xf32>
      %cst_24 = arith.constant dense<0.000000e+00> : vector<32xf32>
      %34 = vector.multi_reduction <add>, %33, %cst_24 [1] : vector<32x128xf32> to vector<32xf32>
      %35 = vector.shape_cast %34 : vector<32xf32> to vector<32x1xf32>
      %cst_25 = arith.constant 1.280000e+02 : f32
      %36 = vector.broadcast %cst_25 : f32 to vector<32x1xf32>
      %37 = arith.divf %35, %36 : vector<32x1xf32>
      %38 = vector.broadcast %30 : vector<32x1xf32> to vector<32x128xf32>
      %39 = arith.subf %26, %38 : vector<32x128xf32>
      %cst_26 = arith.constant 9.99999974E-6 : f32
      %40 = vector.broadcast %cst_26 : f32 to vector<32x1xf32>
      %41 = arith.addf %37, %40 : vector<32x1xf32>
      %42 = math.rsqrt %41 : vector<32x1xf32>
      %43 = vector.broadcast %42 : vector<32x1xf32> to vector<32x128xf32>
      %44 = arith.mulf %39, %43 : vector<32x128xf32>
      %c0_27 = arith.constant 0 : index
      %c0_28 = arith.constant 0 : index
      %45 = vector.load %arg7[%c0_27, %c0_28] : memref<1x128xf32, #tpu.memory_space<vmem>>, vector<1x128xf32>
      %46 = vector.broadcast %45 : vector<1x128xf32> to vector<32x128xf32>
      %47 = arith.mulf %44, %46 : vector<32x128xf32>
      %c0_29 = arith.constant 0 : index
      %c0_30 = arith.constant 0 : index
      %48 = vector.load %arg8[%c0_29, %c0_30] : memref<1x128xf32, #tpu.memory_space<vmem>>, vector<1x128xf32>
      %49 = vector.broadcast %48 : vector<1x128xf32> to vector<32x128xf32>
      %50 = arith.addf %47, %49 : vector<32x128xf32>
      %c0_31 = arith.constant 0 : index
      %c0_32 = arith.constant 0 : index
      %51 = vector.load %arg9[%c0_31, %c0_32] : memref<32x128xf32, #tpu.memory_space<vmem>>, vector<32x128xf32>
      tpu.vector_store %arg9[%c0_31, %c0_32], %50 {strides = array<i32>} : memref<32x128xf32, #tpu.memory_space<vmem>>, vector<32x128xf32>,
    } else {
    }
    return
  }
  func.func @transform_0(%arg0: i32, %arg1: i32) -> (i32, i32) {
    %c0_i32 = arith.constant 0 : i32
    %c0_i32_0 = arith.constant 0 : i32
    return %arg0, %c0_i32 : i32, i32
  }
  func.func @transform_1(%arg0: i32, %arg1: i32) -> (i32, i32) {
    %c0_i32 = arith.constant 0 : i32
    %c0_i32_0 = arith.constant 0 : i32
    return %c0_i32, %arg1 : i32, i32
  }
  func.func @transform_2(%arg0: i32, %arg1: i32) -> (i32, i32) {
    %c0_i32 = arith.constant 0 : i32
    %c0_i32_0 = arith.constant 0 : i32
    return %c0_i32, %arg1 : i32, i32
  }
  func.func @transform_3(%arg0: i32, %arg1: i32) -> (i32, i32) {
    %c0_i32 = arith.constant 0 : i32
    %c0_i32_0 = arith.constant 0 : i32
    return %arg1, %c0_i32 : i32, i32
  }
  func.func @transform_4(%arg0: i32, %arg1: i32) -> (i32, i32) {
    %c0_i32 = arith.constant 0 : i32
    %c0_i32_0 = arith.constant 0 : i32
    %c0_i32_1 = arith.constant 0 : i32
    return %c0_i32, %c0_i32_0 : i32, i32
  }
  func.func @transform_5(%arg0: i32, %arg1: i32) -> (i32, i32) {
    %c0_i32 = arith.constant 0 : i32
    %c0_i32_0 = arith.constant 0 : i32
    %c0_i32_1 = arith.constant 0 : i32
    return %c0_i32, %c0_i32_0 : i32, i32
  }
  func.func @transform_6(%arg0: i32, %arg1: i32) -> (i32, i32) {
    %c0_i32 = arith.constant 0 : i32
    %c0_i32_0 = arith.constant 0 : i32
    %c0_i32_1 = arith.constant 0 : i32
    return %c0_i32, %c0_i32_0 : i32, i32
  }
  func.func @transform_7(%arg0: i32, %arg1: i32) -> (i32, i32) {
    %c0_i32 = arith.constant 0 : i32
    %c0_i32_0 = arith.constant 0 : i32
    return %arg0, %c0_i32 : i32, i32
  }
}

module attributes {stable_mosaic.version = 11 : i64} {
  func.func @_linear_kernel(%arg0: i32, %arg1: i32, %arg2: i32, %arg3: memref<32x128xf32, #tpu.memory_space<vmem>>, %arg4: memref<128x256xbf16, #tpu.memory_space<vmem>>, %arg5: memref<1x256xf32, #tpu.memory_space<vmem>>, %arg6: memref<32x256xf32, #tpu.memory_space<vmem>>) attributes {dimension_semantics = [#tpu.dimension_semantics<parallel>, #tpu.dimension_semantics<parallel>, #tpu.dimension_semantics<arbitrary>], iteration_bounds = array<i64: 1, 1, 1>, scalar_prefetch = 0 : i64, scratch_operands = 0 : i64, tpu.core_type = #tpu.core_type<tc>, window_params = [{transform_indices = @transform_0, window_bounds = array<i64: 32, 128>}, {transform_indices = @transform_1, window_bounds = array<i64: 128, 256>}, {transform_indices = @transform_2, window_bounds = array<i64: 1, 256>}, {transform_indices = @transform_3, window_bounds = array<i64: 32, 256>}]} {
    %c0_i32 = arith.constant 0 : i32
    %0 = arith.cmpi eq, %arg2, %c0_i32 : i32
    %1 = arith.extui %0 : i1 to i32
    %c0_i32_0 = arith.constant 0 : i32
    %2 = arith.cmpi ne, %1, %c0_i32_0 : i32
    scf.if %2 {
      %cst_10 = arith.constant 0.000000e+00 : f32
      %13 = vector.broadcast %cst_10 : f32 to vector<32x256xf32>
      %c0_11 = arith.constant 0 : index
      %c0_12 = arith.constant 0 : index
      %14 = vector.load %arg6[%c0_11, %c0_12] : memref<32x256xf32, #tpu.memory_space<vmem>>, vector<32x256xf32>
      tpu.vector_store %arg6[%c0_11, %c0_12], %13 {strides = array<i32>} : memref<32x256xf32, #tpu.memory_space<vmem>>, vector<32x256xf32>,
    } else {
    }
    %c0 = arith.constant 0 : index
    %c0_1 = arith.constant 0 : index
    %3 = vector.load %arg6[%c0, %c0_1] : memref<32x256xf32, #tpu.memory_space<vmem>>, vector<32x256xf32>
    %c0_2 = arith.constant 0 : index
    %c0_3 = arith.constant 0 : index
    %4 = vector.load %arg3[%c0_2, %c0_3] : memref<32x128xf32, #tpu.memory_space<vmem>>, vector<32x128xf32>
    %5 = arith.truncf %4 : vector<32x128xf32> to vector<32x128xbf16>
    %c0_4 = arith.constant 0 : index
    %c0_5 = arith.constant 0 : index
    %6 = vector.load %arg4[%c0_4, %c0_5] : memref<128x256xbf16, #tpu.memory_space<vmem>>, vector<128x256xbf16>
    %cst = arith.constant dense<0.000000e+00> : vector<32x256xf32>
    %7 = tpu.matmul %5, %6, %cst {dimension_numbers = #tpu.dot_dimension_numbers<[1], [0], [0], [1], [0, 0, 1, 1], [], []>} : vector<32x128xbf16>, vector<128x256xbf16>, vector<32x256xf32> -> vector<32x256xf32>
    %8 = arith.addf %3, %7 : vector<32x256xf32>
    %c0_6 = arith.constant 0 : index
    %c0_7 = arith.constant 0 : index
    %9 = vector.load %arg6[%c0_6, %c0_7] : memref<32x256xf32, #tpu.memory_space<vmem>>, vector<32x256xf32>
    tpu.vector_store %arg6[%c0_6, %c0_7], %8 {strides = array<i32>} : memref<32x256xf32, #tpu.memory_space<vmem>>, vector<32x256xf32>,
    %c0_i32_8 = arith.constant 0 : i32
    %10 = arith.cmpi eq, %arg2, %c0_i32_8 : i32
    %11 = arith.extui %10 : i1 to i32
    %c0_i32_9 = arith.constant 0 : i32
    %12 = arith.cmpi ne, %11, %c0_i32_9 : i32
    scf.if %12 {
      %c0_10 = arith.constant 0 : index
      %c0_11 = arith.constant 0 : index
      %13 = vector.load %arg6[%c0_10, %c0_11] : memref<32x256xf32, #tpu.memory_space<vmem>>, vector<32x256xf32>
      %c0_12 = arith.constant 0 : index
      %c0_13 = arith.constant 0 : index
      %14 = vector.load %arg5[%c0_12, %c0_13] : memref<1x256xf32, #tpu.memory_space<vmem>>, vector<1x256xf32>
      %15 = vector.broadcast %14 : vector<1x256xf32> to vector<32x256xf32>
      %16 = arith.addf %13, %15 : vector<32x256xf32>
      %c0_14 = arith.constant 0 : index
      %c0_15 = arith.constant 0 : index
      %17 = vector.load %arg6[%c0_14, %c0_15] : memref<32x256xf32, #tpu.memory_space<vmem>>, vector<32x256xf32>
      tpu.vector_store %arg6[%c0_14, %c0_15], %16 {strides = array<i32>} : memref<32x256xf32, #tpu.memory_space<vmem>>, vector<32x256xf32>,
    } else {
    }
    return
  }
  func.func @transform_0(%arg0: i32, %arg1: i32, %arg2: i32) -> (i32, i32) {
    %c0_i32 = arith.constant 0 : i32
    return %arg0, %arg2 : i32, i32
  }
  func.func @transform_1(%arg0: i32, %arg1: i32, %arg2: i32) -> (i32, i32) {
    %c0_i32 = arith.constant 0 : i32
    return %arg2, %arg1 : i32, i32
  }
  func.func @transform_2(%arg0: i32, %arg1: i32, %arg2: i32) -> (i32, i32) {
    %c0_i32 = arith.constant 0 : i32
    %c0_i32_0 = arith.constant 0 : i32
    return %c0_i32, %arg1 : i32, i32
  }
  func.func @transform_3(%arg0: i32, %arg1: i32, %arg2: i32) -> (i32, i32) {
    %c0_i32 = arith.constant 0 : i32
    return %arg0, %arg1 : i32, i32
  }
}

module attributes {stable_mosaic.version = 11 : i64} {
  func.func @_attn_kernel(%arg0: i32, %arg1: i32, %arg2: memref<1x16x128xf32, #tpu.memory_space<vmem>>, %arg3: memref<1x16x128xf32, #tpu.memory_space<vmem>>, %arg4: memref<1x16x128xf32, #tpu.memory_space<vmem>>, %arg5: memref<1x16x128xf32, #tpu.memory_space<vmem>>) attributes {dimension_semantics = [#tpu.dimension_semantics<parallel>, #tpu.dimension_semantics<parallel>], iteration_bounds = array<i64: 2, 1>, scalar_prefetch = 0 : i64, scratch_operands = 0 : i64, tpu.core_type = #tpu.core_type<tc>, window_params = [{transform_indices = @transform_0, window_bounds = array<i64: 1, 16, 128>}, {transform_indices = @transform_1, window_bounds = array<i64: 1, 16, 128>}, {transform_indices = @transform_2, window_bounds = array<i64: 1, 16, 128>}, {transform_indices = @transform_3, window_bounds = array<i64: 1, 16, 128>}]} {
    %c0 = arith.constant 0 : index
    %c0_0 = arith.constant 0 : index
    %c0_1 = arith.constant 0 : index
    %0 = vector.load %arg2[%c0, %c0_0, %c0_1] : memref<1x16x128xf32, #tpu.memory_space<vmem>>, vector<1x16x128xf32>
    %1 = vector.shape_cast %0 : vector<1x16x128xf32> to vector<16x128xf32>
    %2 = arith.truncf %1 : vector<16x128xf32> to vector<16x128xbf16>
    %c0_2 = arith.constant 0 : index
    %c0_3 = arith.constant 0 : index
    %c0_4 = arith.constant 0 : index
    %3 = vector.load %arg3[%c0_2, %c0_3, %c0_4] : memref<1x16x128xf32, #tpu.memory_space<vmem>>, vector<1x16x128xf32>
    %4 = vector.shape_cast %3 : vector<1x16x128xf32> to vector<16x128xf32>
    %5 = arith.truncf %4 : vector<16x128xf32> to vector<16x128xbf16>
    %c0_5 = arith.constant 0 : index
    %c0_6 = arith.constant 0 : index
    %c0_7 = arith.constant 0 : index
    %6 = vector.load %arg4[%c0_5, %c0_6, %c0_7] : memref<1x16x128xf32, #tpu.memory_space<vmem>>, vector<1x16x128xf32>
    %7 = vector.shape_cast %6 : vector<1x16x128xf32> to vector<16x128xf32>
    %8 = arith.truncf %7 : vector<16x128xf32> to vector<16x128xbf16>
    %9 = vector.extract_strided_slice %2 {offsets = [0, 0], sizes = [16, 32], strides = [1, 1]} : vector<16x128xbf16> to vector<16x32xbf16>
    %10 = vector.extract_strided_slice %5 {offsets = [0, 0], sizes = [16, 32], strides = [1, 1]} : vector<16x128xbf16> to vector<16x32xbf16>
    %11 = vector.extract_strided_slice %8 {offsets = [0, 0], sizes = [16, 32], strides = [1, 1]} : vector<16x128xbf16> to vector<16x32xbf16>
    %cst = arith.constant dense<0.000000e+00> : vector<16x16xf32>
    %12 = tpu.matmul %9, %10, %cst {dimension_numbers = #tpu.dot_dimension_numbers<[1], [1], [0], [0], [0, 0, 1, 0], [], []>} : vector<16x32xbf16>, vector<16x32xbf16>, vector<16x16xf32> -> vector<16x16xf32>
    %cst_8 = arith.constant dense<0xFF800000> : vector<16xf32>
    %13 = vector.multi_reduction <maximumf>, %12, %cst_8 [1] : vector<16x16xf32> to vector<16xf32>
    %14 = vector.shape_cast %13 : vector<16xf32> to vector<16x1xf32>
    %15 = vector.broadcast %14 : vector<16x1xf32> to vector<16x16xf32>
    %16 = arith.subf %12, %15 : vector<16x16xf32>
    %17 = math.exp %16 : vector<16x16xf32>
    %cst_9 = arith.constant dense<0.000000e+00> : vector<16xf32>
    %18 = vector.multi_reduction <add>, %17, %cst_9 [1] : vector<16x16xf32> to vector<16xf32>
    %19 = vector.shape_cast %18 : vector<16xf32> to vector<16x1xf32>
    %20 = tpu.reciprocal %19 {approx = true} : vector<16x1xf32> -> vector<16x1xf32>
    %21 = vector.broadcast %20 : vector<16x1xf32> to vector<16x16xf32>
    %22 = arith.mulf %17, %21 : vector<16x16xf32>
    %23 = arith.truncf %22 : vector<16x16xf32> to vector<16x16xbf16>
    %cst_10 = arith.constant dense<0.000000e+00> : vector<16x32xf32>
    %24 = tpu.matmul %23, %11, %cst_10 {dimension_numbers = #tpu.dot_dimension_numbers<[1], [0], [0], [1], [0, 0, 1, 1], [], []>} : vector<16x16xbf16>, vector<16x32xbf16>, vector<16x32xf32> -> vector<16x32xf32>
    %25 = vector.extract_strided_slice %2 {offsets = [0, 32], sizes = [16, 32], strides = [1, 1]} : vector<16x128xbf16> to vector<16x32xbf16>
    %26 = vector.extract_strided_slice %5 {offsets = [0, 32], sizes = [16, 32], strides = [1, 1]} : vector<16x128xbf16> to vector<16x32xbf16>
    %27 = vector.extract_strided_slice %8 {offsets = [0, 32], sizes = [16, 32], strides = [1, 1]} : vector<16x128xbf16> to vector<16x32xbf16>
    %cst_11 = arith.constant dense<0.000000e+00> : vector<16x16xf32>
    %28 = tpu.matmul %25, %26, %cst_11 {dimension_numbers = #tpu.dot_dimension_numbers<[1], [1], [0], [0], [0, 0, 1, 0], [], []>} : vector<16x32xbf16>, vector<16x32xbf16>, vector<16x16xf32> -> vector<16x16xf32>
    %cst_12 = arith.constant dense<0xFF800000> : vector<16xf32>
    %29 = vector.multi_reduction <maximumf>, %28, %cst_12 [1] : vector<16x16xf32> to vector<16xf32>
    %30 = vector.shape_cast %29 : vector<16xf32> to vector<16x1xf32>
    %31 = vector.broadcast %30 : vector<16x1xf32> to vector<16x16xf32>
    %32 = arith.subf %28, %31 : vector<16x16xf32>
    %33 = math.exp %32 : vector<16x16xf32>
    %cst_13 = arith.constant dense<0.000000e+00> : vector<16xf32>
    %34 = vector.multi_reduction <add>, %33, %cst_13 [1] : vector<16x16xf32> to vector<16xf32>
    %35 = vector.shape_cast %34 : vector<16xf32> to vector<16x1xf32>
    %36 = tpu.reciprocal %35 {approx = true} : vector<16x1xf32> -> vector<16x1xf32>
    %37 = vector.broadcast %36 : vector<16x1xf32> to vector<16x16xf32>
    %38 = arith.mulf %33, %37 : vector<16x16xf32>
    %39 = arith.truncf %38 : vector<16x16xf32> to vector<16x16xbf16>
    %cst_14 = arith.constant dense<0.000000e+00> : vector<16x32xf32>
    %40 = tpu.matmul %39, %27, %cst_14 {dimension_numbers = #tpu.dot_dimension_numbers<[1], [0], [0], [1], [0, 0, 1, 1], [], []>} : vector<16x16xbf16>, vector<16x32xbf16>, vector<16x32xf32> -> vector<16x32xf32>
    %41 = vector.extract_strided_slice %2 {offsets = [0, 64], sizes = [16, 32], strides = [1, 1]} : vector<16x128xbf16> to vector<16x32xbf16>
    %42 = vector.extract_strided_slice %5 {offsets = [0, 64], sizes = [16, 32], strides = [1, 1]} : vector<16x128xbf16> to vector<16x32xbf16>
    %43 = vector.extract_strided_slice %8 {offsets = [0, 64], sizes = [16, 32], strides = [1, 1]} : vector<16x128xbf16> to vector<16x32xbf16>
    %cst_15 = arith.constant dense<0.000000e+00> : vector<16x16xf32>
    %44 = tpu.matmul %41, %42, %cst_15 {dimension_numbers = #tpu.dot_dimension_numbers<[1], [1], [0], [0], [0, 0, 1, 0], [], []>} : vector<16x32xbf16>, vector<16x32xbf16>, vector<16x16xf32> -> vector<16x16xf32>
    %cst_16 = arith.constant dense<0xFF800000> : vector<16xf32>
    %45 = vector.multi_reduction <maximumf>, %44, %cst_16 [1] : vector<16x16xf32> to vector<16xf32>
    %46 = vector.shape_cast %45 : vector<16xf32> to vector<16x1xf32>
    %47 = vector.broadcast %46 : vector<16x1xf32> to vector<16x16xf32>
    %48 = arith.subf %44, %47 : vector<16x16xf32>
    %49 = math.exp %48 : vector<16x16xf32>
    %cst_17 = arith.constant dense<0.000000e+00> : vector<16xf32>
    %50 = vector.multi_reduction <add>, %49, %cst_17 [1] : vector<16x16xf32> to vector<16xf32>
    %51 = vector.shape_cast %50 : vector<16xf32> to vector<16x1xf32>
    %52 = tpu.reciprocal %51 {approx = true} : vector<16x1xf32> -> vector<16x1xf32>
    %53 = vector.broadcast %52 : vector<16x1xf32> to vector<16x16xf32>
    %54 = arith.mulf %49, %53 : vector<16x16xf32>
    %55 = arith.truncf %54 : vector<16x16xf32> to vector<16x16xbf16>
    %cst_18 = arith.constant dense<0.000000e+00> : vector<16x32xf32>
    %56 = tpu.matmul %55, %43, %cst_18 {dimension_numbers = #tpu.dot_dimension_numbers<[1], [0], [0], [1], [0, 0, 1, 1], [], []>} : vector<16x16xbf16>, vector<16x32xbf16>, vector<16x32xf32> -> vector<16x32xf32>
    %57 = vector.extract_strided_slice %2 {offsets = [0, 96], sizes = [16, 32], strides = [1, 1]} : vector<16x128xbf16> to vector<16x32xbf16>
    %58 = vector.extract_strided_slice %5 {offsets = [0, 96], sizes = [16, 32], strides = [1, 1]} : vector<16x128xbf16> to vector<16x32xbf16>
    %59 = vector.extract_strided_slice %8 {offsets = [0, 96], sizes = [16, 32], strides = [1, 1]} : vector<16x128xbf16> to vector<16x32xbf16>
    %cst_19 = arith.constant dense<0.000000e+00> : vector<16x16xf32>
    %60 = tpu.matmul %57, %58, %cst_19 {dimension_numbers = #tpu.dot_dimension_numbers<[1], [1], [0], [0], [0, 0, 1, 0], [], []>} : vector<16x32xbf16>, vector<16x32xbf16>, vector<16x16xf32> -> vector<16x16xf32>
    %cst_20 = arith.constant dense<0xFF800000> : vector<16xf32>
    %61 = vector.multi_reduction <maximumf>, %60, %cst_20 [1] : vector<16x16xf32> to vector<16xf32>
    %62 = vector.shape_cast %61 : vector<16xf32> to vector<16x1xf32>
    %63 = vector.broadcast %62 : vector<16x1xf32> to vector<16x16xf32>
    %64 = arith.subf %60, %63 : vector<16x16xf32>
    %65 = math.exp %64 : vector<16x16xf32>
    %cst_21 = arith.constant dense<0.000000e+00> : vector<16xf32>
    %66 = vector.multi_reduction <add>, %65, %cst_21 [1] : vector<16x16xf32> to vector<16xf32>
    %67 = vector.shape_cast %66 : vector<16xf32> to vector<16x1xf32>
    %68 = tpu.reciprocal %67 {approx = true} : vector<16x1xf32> -> vector<16x1xf32>
    %69 = vector.broadcast %68 : vector<16x1xf32> to vector<16x16xf32>
    %70 = arith.mulf %65, %69 : vector<16x16xf32>
    %71 = arith.truncf %70 : vector<16x16xf32> to vector<16x16xbf16>
    %cst_22 = arith.constant dense<0.000000e+00> : vector<16x32xf32>
    %72 = tpu.matmul %71, %59, %cst_22 {dimension_numbers = #tpu.dot_dimension_numbers<[1], [0], [0], [1], [0, 0, 1, 1], [], []>} : vector<16x16xbf16>, vector<16x32xbf16>, vector<16x32xf32> -> vector<16x32xf32>
    %73 = tpu.concatenate %24, %40, %56, %72 in 1 : vector<16x32xf32>, vector<16x32xf32>, vector<16x32xf32>, vector<16x32xf32> -> vector<16x128xf32>
    %c0_23 = arith.constant 0 : index
    %c0_24 = arith.constant 0 : index
    %c0_25 = arith.constant 0 : index
    %74 = vector.load %arg5[%c0_23, %c0_24, %c0_25] : memref<1x16x128xf32, #tpu.memory_space<vmem>>, vector<1x16x128xf32>
    %75 = vector.shape_cast %74 : vector<1x16x128xf32> to vector<16x128xf32>
    %76 = vector.shape_cast %73 : vector<16x128xf32> to vector<1x16x128xf32>
    tpu.vector_store %arg5[%c0_23, %c0_24, %c0_25], %76 {strides = array<i32>} : memref<1x16x128xf32, #tpu.memory_space<vmem>>, vector<1x16x128xf32>,
    return
  }
  func.func @transform_0(%arg0: i32, %arg1: i32) -> (i32, i32, i32) {
    %c0_i32 = arith.constant 0 : i32
    %c0_i32_0 = arith.constant 0 : i32
    return %arg0, %arg1, %c0_i32 : i32, i32, i32
  }
  func.func @transform_1(%arg0: i32, %arg1: i32) -> (i32, i32, i32) {
    %c0_i32 = arith.constant 0 : i32
    %c0_i32_0 = arith.constant 0 : i32
    %c0_i32_1 = arith.constant 0 : i32
    return %arg0, %c0_i32, %c0_i32_0 : i32, i32, i32
  }
  func.func @transform_2(%arg0: i32, %arg1: i32) -> (i32, i32, i32) {
    %c0_i32 = arith.constant 0 : i32
    %c1_i32 = arith.constant 1 : i32
    %c0_i32_0 = arith.constant 0 : i32
    return %arg0, %c0_i32, %c1_i32 : i32, i32, i32
  }
  func.func @transform_3(%arg0: i32, %arg1: i32) -> (i32, i32, i32) {
    %c0_i32 = arith.constant 0 : i32
    %c0_i32_0 = arith.constant 0 : i32
    return %arg0, %arg1, %c0_i32 : i32, i32, i32
  }
}

</mosaic_0001>

<bundles_post_ra>
// kernel: transformer_forward.35
= control target key start
LH: loop header
LB: loop body
LE: loop exit
PB: predicated region body
PF: predicated region fallthrough
CT: control target
= control target key end

     0   :  { %s394_s1 = inlined_call_operand.vmem [shape: bf16[128,128], index: 1, kind: input, shape index: {}]   ;;  %s395_s0 = inlined_call_operand.vmem [shape: f32[32,128], index: 0, kind: input, shape index: {}]   ;;  %s396_s2 = inlined_call_operand.vmem [shape: f32[1,128], index: 2, kind: input, shape index: {}]   ;;  %s397_s3 = inlined_call_operand.vmem [shape: f32[32,128], index: 3, kind: input, shape index: {}]   ;;  %s398_s4 = inlined_call_operand.vmem [shape: f32[1,128], index: 4, kind: input, shape index: {}]   ;;  %s399_s5 = inlined_call_operand.vmem [shape: f32[1,128], index: 5, kind: input, shape index: {}]   ;;  %s400_s6 = inlined_call_operand.vmem [shape: f32[32,128], index: 6, kind: output, shape index: {}]  }
   0x1   :  { %v274_v0 = vld [vmem:[%s394_s1] sm:$0xff]   ;;  %v275_v1 = vld [vmem:[%s394_s1 + $0x8] sm:$0xff]   ;;  %v276_v2 = vld [vmem:[%s394_s1 + $0x10] sm:$0xff]  }
   0x2   :  { %254 = vmatprep.subr.bf16.mxu0 %v274_v0  ;;  %v277_v3 = vld [vmem:[%s394_s1 + $0x18] sm:$0xff]   ;;  %v24_v4 = vld [vmem:[%s395_s0] sm:$0xff]  ;;  %v25_v5 = vld [vmem:[%s395_s0 + $0x8] sm:$0xff] }
   0x3   :  { %255 = vmatpush3.bf16.msra.mxu0 %v274_v0  ;;  %v28_v6 = vpack.c.bf16 %v25_v5, %v24_v4  ;;  %v278_v7 = vld [vmem:[%s394_s1 + $0x20] sm:$0xff]   ;;  %v279_v8 = vld [vmem:[%s394_s1 + $0x28] sm:$0xff]   ;;  %v280_v9 = vld [vmem:[%s394_s1 + $0x30] sm:$0xff]  }
   0x4   :  { %256 = vmatprep.subr.bf16.mxu0 %v275_v1  ;;  %v281_v10 = vld [vmem:[%s394_s1 + $0x38] sm:$0xff]   ;;  %v26_v11 = vld [vmem:[%s395_s0 + $0x10] sm:$0xff]  ;;  %v233_v14 = vld [vmem:[%s396_s2] ss:$0 sm:$0xff] }
   0x5   :  { %270 = vmatprep.mubr.bf16.mxu0 %v28_v6  ;;  %v27_v12 = vld [vmem:[%s395_s0 + $0x18] sm:$0xff]  ;;  %v152_v16 = vld [vmem:[%s397_s3 + $0x10] sm:$0xff]  ;;  %v150_v19 = vld [vmem:[%s397_s3] sm:$0xff] }
   0x6   :  { %v29_v13 = vpack.c.bf16 %v27_v12, %v26_v11  ;;  %v153_v27 = vld [vmem:[%s397_s3 + $0x18] sm:$0xff]  ;;  %v151_v28 = vld [vmem:[%s397_s3 + $0x8] sm:$0xff]  ;;  %v242_v60 = vld [vmem:[%s398_s4] ss:$0 sm:$0xff] }
   0x7   :  { %257 = vmatpush3.bf16.msra.mxu0 %v275_v1  ;;  %v243_v62 = vld [vmem:[%s399_s5] ss:$0 sm:$0xff] }
   0x8   :  { %258 = vmatprep.subr.bf16.mxu0 %v276_v2 }
   0xb   :  { %259 = vmatpush3.bf16.msra.mxu0 %v276_v2 }
   0xc   :  { %260 = vmatprep.subr.bf16.mxu0 %v277_v3 }
   0xf   :  { %261 = vmatpush3.bf16.msra.mxu0 %v277_v3 }
  0x10   :  { %262 = vmatprep.subr.bf16.mxu0 %v278_v7 }
  0x13   :  { %263 = vmatpush3.bf16.msra.mxu0 %v278_v7 }
  0x14   :  { %264 = vmatprep.subr.bf16.mxu0 %v279_v8 }
  0x17   :  { %265 = vmatpush3.bf16.msra.mxu0 %v279_v8 }
  0x18   :  { %266 = vmatprep.subr.bf16.mxu0 %v280_v9 }
  0x1b   :  { %267 = vmatpush3.bf16.msra.mxu0 %v280_v9 }
  0x1c   :  { %268 = vmatprep.subr.bf16.mxu0 %v281_v10 }
  0x1f   :  { %269 = vmatpush3.bf16.msra.mxu0 %v281_v10 }
  0x22   :  { %271 = vmatmul.mubr.bf16.vlgmr.msra.gmra.mrb[0].mxu0 %v29_v13 }
  0xf5   :  { %v272_v15 = vpop.f32.mrb[0].mxu0 }
  0xf6   :  { %v144_v17 = vadd.f32 %v272_v15, %v233_v14  ;;  %v135_v18 = vpop.f32.mrb[1].mxu0 }
  0xf7   :  { %v136_v20 = vadd.f32 %v233_v14, %v135_v18  ;;  %v273_v21 = vpop.f32.mrb[2].mxu0 }
  0xf8   :  { %v147_v22 = vadd.f32 %v273_v21, %v233_v14  ;;  %v138_v23 = vpop.f32.mrb[3].mxu0  ;;  %v156_v24 = vadd.f32 %v152_v16, %v144_v17 }
  0xf9   :  { %v139_v25 = vadd.f32 %v233_v14, %v138_v23  ;;  %v154_v26 = vadd.f32 %v150_v19, %v136_v20 }
  0xfa   :  { %162 = vadd.xlane.f32.xlu1 %v156_v24  ;;  %v157_v29 = vadd.f32 %v153_v27, %v147_v22 }
  0xfb   :  { %158 = vadd.xlane.f32.xlu0 %v154_v26  ;;  %v155_v30 = vadd.f32 %v151_v28, %v139_v25 }
  0xfe   :  { %164 = vadd.xlane.f32.xlu1 %v157_v29 }
  0xff   :  { %160 = vadd.xlane.f32.xlu0 %v155_v30 }
 0x187   :  { %v163_v31 = vpop.xlane.xlu1 %162 }
 0x188   :  { %v159_v32 = vpop.xlane.xlu0 %158  ;;  %v169_v33 = vmul.f32 0.0078125, %v163_v31 }
 0x189   :  { %v167_v34 = vmul.f32 0.0078125, %v159_v32 }
 0x18a   :  { %v173_v38 = vsub.f32 %v156_v24, %v169_v33 }
 0x18b   :  { %v171_v35 = vsub.f32 %v154_v26, %v167_v34  ;;  %v165_v36 = vpop.xlane.xlu1 %164 }
 0x18c   :  { %v161_v37 = vpop.xlane.xlu0 %160  ;;  %v170_v39 = vmul.f32 0.0078125, %v165_v36  ;;  %v177_v44 = vmul.f32 %v173_v38, %v173_v38 }
 0x18d   :  { %v168_v40 = vmul.f32 0.0078125, %v161_v37  ;;  %v175_v41 = vmul.f32 %v171_v35, %v171_v35 }
 0x18e   :  { %v174_v43 = vsub.f32 %v157_v29, %v170_v39 }
 0x18f   :  { %v172_v42 = vsub.f32 %v155_v30, %v168_v40  ;;  %179 = vadd.xlane.f32.xlu0 %v175_v41 }
 0x190   :  { %v178_v46 = vmul.f32 %v174_v43, %v174_v43 }
 0x191   :  { %v176_v45 = vmul.f32 %v172_v42, %v172_v42 }
 0x193   :  { %183 = vadd.xlane.f32.xlu0 %v177_v44  ;;  %181 = vadd.xlane.f32.xlu1 %v176_v45 }
 0x197   :  { %185 = vadd.xlane.f32.xlu1 %v178_v46 }
 0x21c   :  { %v180_v47 = vpop.xlane.xlu0 %179 }
 0x21d   :  { %v187_v48 = vmul.f32 0.0078125, %v180_v47 }
 0x21f   :  { %v191_v49 = vadd.f32 1e-05, %v187_v48 }
 0x220   :  { %v182_v50 = vpop.xlane.xlu1 %181  ;;  %v184_v51 = vpop.xlane.xlu0 %183 }
 0x221   :  { %282 = vrsqrt.f32 %v191_v49  ;;  %v188_v52 = vmul.f32 0.0078125, %v182_v50  ;;  %v189_v53 = vmul.f32 0.0078125, %v184_v51 }
 0x223   :  { %v192_v54 = vadd.f32 1e-05, %v188_v52  ;;  %v193_v55 = vadd.f32 1e-05, %v189_v53 }
 0x224   :  { %v186_v56 = vpop.xlane.xlu1 %185 }
 0x225   :  { %284 = vrsqrt.f32 %v192_v54  ;;  %v190_v57 = vmul.f32 0.0078125, %v186_v56 }
 0x226   :  { %286 = vrsqrt.f32 %v193_v55 }
 0x227   :  { %v194_v58 = vadd.f32 1e-05, %v190_v57 }
 0x229   :  { %288 = vrsqrt.f32 %v194_v58 }
 0x22b   :  { %v283_v59 = vpop.eup %282 }
 0x22c   :  { %v199_v61 = vmul.f32 %v283_v59, %v171_v35 }
 0x22e   :  { %v210_v63 = vmul.f32 %v242_v60, %v199_v61 }
 0x22f   :  { %v285_v0 = vpop.eup %284 }
 0x230   :  { %v287_v1 = vpop.eup %286  ;;  %v221_v2 = vadd.f32 %v243_v62, %v210_v63  ;;  %v200_v3 = vmul.f32 %v285_v0, %v172_v42 }
 0x231   :  { %v201_v4 = vmul.f32 %v287_v1, %v173_v38 }
 0x232   :  { %225 = vst [vmem:[%s400_s6] sm:$0xff] %v221_v2  ;;  %v211_v5 = vmul.f32 %v242_v60, %v200_v3 }
 0x233   :  { %v289_v6 = vpop.eup %288  ;;  %v212_v7 = vmul.f32 %v242_v60, %v201_v4 }
 0x234   :  { %v222_v8 = vadd.f32 %v243_v62, %v211_v5  ;;  %v202_v9 = vmul.f32 %v289_v6, %v174_v43 }
 0x235   :  { %v223_v10 = vadd.f32 %v243_v62, %v212_v7 }
 0x236   :  { %226 = vst [vmem:[%s400_s6 + $0x8] sm:$0xff] %v222_v8  ;;  %v213_v11 = vmul.f32 %v242_v60, %v202_v9 }
 0x237   :  { %227 = vst [vmem:[%s400_s6 + $0x10] sm:$0xff] %v223_v10 }
 0x238   :  { %v224_v12 = vadd.f32 %v243_v62, %v213_v11 }
 0x23a   :  { %228 = vst [vmem:[%s400_s6 + $0x18] sm:$0xff] %v224_v12 }

// kernel: transformer_forward.36
= control target key start
LH: loop header
LB: loop body
LE: loop exit
PB: predicated region body
PF: predicated region fallthrough
CT: control target
= control target key end

     0   :  { %s299_s1 = inlined_call_operand.vmem [shape: bf16[128,128], index: 1, kind: input, shape index: {}]   ;;  %s300_s0 = inlined_call_operand.vmem [shape: f32[32,128], index: 0, kind: input, shape index: {}]   ;;  %s301_s2 = inlined_call_operand.vmem [shape: f32[1,128], index: 2, kind: input, shape index: {}]   ;;  %s302_s3 = inlined_call_operand.vmem [shape: f32[32,128], index: 3, kind: output, shape index: {}]  }
   0x1   :  { %v220_v0 = vld [vmem:[%s299_s1] sm:$0xff]   ;;  %v221_v1 = vld [vmem:[%s299_s1 + $0x8] sm:$0xff]   ;;  %v222_v2 = vld [vmem:[%s299_s1 + $0x10] sm:$0xff]  }
   0x2   :  { %199 = vmatprep.subr.bf16.mxu0 %v220_v0  ;;  %v223_v3 = vld [vmem:[%s299_s1 + $0x18] sm:$0xff]   ;;  %v27_v4 = vld [vmem:[%s300_s0] sm:$0xff]  ;;  %v28_v5 = vld [vmem:[%s300_s0 + $0x8] sm:$0xff] }
   0x3   :  { %200 = vmatpush3.bf16.msra.mxu0 %v220_v0  ;;  %v31_v6 = vpack.c.bf16 %v28_v5, %v27_v4  ;;  %v224_v7 = vld [vmem:[%s299_s1 + $0x20] sm:$0xff]   ;;  %v225_v8 = vld [vmem:[%s299_s1 + $0x28] sm:$0xff]   ;;  %v226_v9 = vld [vmem:[%s299_s1 + $0x30] sm:$0xff]  }
   0x4   :  { %201 = vmatprep.subr.bf16.mxu0 %v221_v1  ;;  %v227_v10 = vld [vmem:[%s299_s1 + $0x38] sm:$0xff]   ;;  %v29_v11 = vld [vmem:[%s300_s0 + $0x10] sm:$0xff]  ;;  %v188_v15 = vld [vmem:[%s301_s2] ss:$0 sm:$0xff] }
   0x5   :  { %215 = vmatprep.mubr.bf16.mxu0 %v31_v6  ;;  %v30_v12 = vld [vmem:[%s300_s0 + $0x18] sm:$0xff] }
   0x6   :  { %v32_v13 = vpack.c.bf16 %v30_v12, %v29_v11 }
   0x7   :  { %202 = vmatpush3.bf16.msra.mxu0 %v221_v1 }
   0x8   :  { %203 = vmatprep.subr.bf16.mxu0 %v222_v2 }
   0xb   :  { %204 = vmatpush3.bf16.msra.mxu0 %v222_v2 }
   0xc   :  { %205 = vmatprep.subr.bf16.mxu0 %v223_v3 }
   0xf   :  { %206 = vmatpush3.bf16.msra.mxu0 %v223_v3 }
  0x10   :  { %207 = vmatprep.subr.bf16.mxu0 %v224_v7 }
  0x13   :  { %208 = vmatpush3.bf16.msra.mxu0 %v224_v7 }
  0x14   :  { %209 = vmatprep.subr.bf16.mxu0 %v225_v8 }
  0x17   :  { %210 = vmatpush3.bf16.msra.mxu0 %v225_v8 }
  0x18   :  { %211 = vmatprep.subr.bf16.mxu0 %v226_v9 }
  0x1b   :  { %212 = vmatpush3.bf16.msra.mxu0 %v226_v9 }
  0x1c   :  { %213 = vmatprep.subr.bf16.mxu0 %v227_v10 }
  0x1f   :  { %214 = vmatpush3.bf16.msra.mxu0 %v227_v10 }
  0x22   :  { %216 = vmatmul.mubr.bf16.vlgmr.msra.gmra.mrb[0].mxu0 %v32_v13 }
  0xf5   :  { %v217_v14 = vpop.f32.mrb[0].mxu0 }
  0xf6   :  { %v131_v16 = vpop.f32.mrb[1].mxu0  ;;  %v170_v18 = vadd.f32 %v217_v14, %v188_v15 }
  0xf7   :  { %v218_v17 = vpop.f32.mrb[2].mxu0  ;;  %v168_v20 = vadd.f32 %v188_v15, %v131_v16 }
  0xf8   :  { %v134_v19 = vpop.f32.mrb[3].mxu0  ;;  %174 = vst [vmem:[%s302_s3 + $0x10] sm:$0xff] %v170_v18  ;;  %v171_v21 = vadd.f32 %v218_v17, %v188_v15 }
  0xf9   :  { %172 = vst [vmem:[%s302_s3] sm:$0xff] %v168_v20  ;;  %v169_v22 = vadd.f32 %v188_v15, %v134_v19 }
  0xfa   :  { %175 = vst [vmem:[%s302_s3 + $0x18] sm:$0xff] %v171_v21 }
  0xfb   :  { %173 = vst [vmem:[%s302_s3 + $0x8] sm:$0xff] %v169_v22 }

// kernel: transformer_forward.34
= control target key start
LH: loop header
LB: loop body
LE: loop exit
PB: predicated region body
PF: predicated region fallthrough
CT: control target
= control target key end

     0   :  { %s1325_s15 = smov 0   ;;  %s1327_s16 = smov 0   ;;  %s1515_s0 = inlined_call_operand.vmem [shape: f32[2,16,384], index: 0, kind: input, shape index: {}, may-alias: {0,1,2}]   ;;  %s1516_s1 = inlined_call_operand.vmem [shape: f32[2,16,384], index: 1, kind: input, shape index: {}, may-alias: {0,1,2}]   ;;  %s1517_s2 = inlined_call_operand.vmem [shape: f32[2,16,384], index: 2, kind: input, shape index: {}, may-alias: {0,1,2}]   ;;  %s1518_s3 = inlined_call_operand.vmem [shape: f32[1,16,16], index: 3, kind: input, shape index: {}]   ;;  %s1519_s4 = inlined_call_operand.vmem [shape: f32[2,16,128], index: 4, kind: output, shape index: {}]  }
   0x1   :  { %s1329_s17 = smov 0   ;;  %s1331_s18 = smov 0  }
   0x2   :  { %s1333_s19 = smov 0  }
   0x3 LB: > { %s26_s20 = sadd.s32 1, %s1289_s18  ;;  %p42_p1 = scmp.ne.s32.totalorder %s1281_s16, %s1277_s15  ;;  %s1293_s19 = sphi %s1333_s19, %s14_s19   ;;  %s1289_s18 = sphi %s1331_s18, %s1524_s18   ;;  %s1285_s17 = sphi %s1329_s17, %s1523_s17   ;;  %s1281_s16 = sphi %s1327_s16, %s1522_s16   ;;  %s1277_s15 = sphi %s1325_s15, %s1521_s15  }
   0x4   : > { %p28_p0 = scmp.ge.s32.totalorder %s26_s20, 2  ;;  %p43_p2 = scmp.eq.s32.totalorder %s1293_s19, 0 }
   0x5   : > { %s35_s23 = sadd.s32 1, %s1281_s16  ;;  %p1085_p5 = scmp.ge.s32.totalorder %s1293_s19, 2 }
   0x6   : > { %s1526_s20 = smov (%p28_p0, %s26_s20), 0  ;;  %p1356_p3 = por %p43_p2, %p42_p1 }
   0x7   : > { %s30_s22 = ssub.s32 %s1289_s18, %s1526_s20  ;;  %183 = sbr.rel (%p1085_p5) target bundleno = 35 (0x23), region = 20 }
   0x8   : > { %p33_p4 = scmp.eq.s32.totalorder %s30_s22, 0 }
   0xa   : > { %s1364_s24 = scalar_select %p33_p4, %s1281_s16, %s35_s23  }
   0xe   : > { %186 = sbr.rel (!%p1356_p3) target bundleno = 21 (0x15), region = 24  ;;  %s188_s25 = sand.u32 (%p1356_p3), 1, %s1281_s16  }
   0xf   : > { %s1177_s26 = smul.u32 (%p1356_p3), 48, %s1289_s18  ;;  %s1086_s27 = sshll.u32 (%p1356_p3), %s188_s25, 4 }
  0x10   : > { %s190_s5 = scalar_lea.vmem (%p1356_p3), [#allocation2], %s1086_s27 }
  0x11   : > { %s196_s30 = scalar_lea.vmem (%p1356_p3), %s1515_s0, %s1177_s26 }
  0x12   : > { %v226_v0 = vld [vmem:[%s196_s30] sm:$0xff] (%p1356_p3)  ;;  %v228_v1 = vld [vmem:[%s196_s30 + $0x18] sm:$0xff] (%p1356_p3) }
  0x13   : > { %227 = vst [vmem:[%s190_s5] sm:$0xff] (%p1356_p3), %v226_v0  ;;  %229 = vst [vmem:[%s190_s5 + $0x8] sm:$0xff] (%p1356_p3), %v228_v1 }
  0x15 PF: > { %235 = sbr.rel (!%p1356_p3) target bundleno = 28 (0x1c), region = 62  ;;  %s237_s6 = sand.u32 (%p1356_p3), 1, %s1281_s16  }
  0x16   : > { %s1089_s7 = smul.u32 (%p1356_p3), 48, %s1289_s18  ;;  %s1088_s8 = sshll.u32 (%p1356_p3), %s237_s6, 4 }
  0x17   : > { %s239_s12 = scalar_lea.vmem (%p1356_p3), [#allocation3], %s1088_s8 }
  0x18   : > { %s979_s11 = scalar_lea.vmem (%p1356_p3), %s1516_s1, %s1089_s7 }
  0x19   : > { %v1090_v2 = vld [vmem:[%s979_s11 + $0x8] sm:$0xff] (%p1356_p3)  ;;  %v1091_v3 = vld [vmem:[%s979_s11 + $0x20] sm:$0xff] (%p1356_p3) }
  0x1a   : > { %274 = vst [vmem:[%s239_s12] sm:$0xff] (%p1356_p3), %v1090_v2  ;;  %276 = vst [vmem:[%s239_s12 + $0x8] sm:$0xff] (%p1356_p3), %v1091_v3 }
  0x1c PF: > { %282 = sbr.rel (!%p1356_p3) target bundleno = 35 (0x23), region = 100  ;;  %s284_s13 = sand.u32 (%p1356_p3), 1, %s1281_s16  }
  0x1d   : > { %s1093_s14 = smul.u32 (%p1356_p3), 48, %s1289_s18  ;;  %s1092_s22 = sshll.u32 (%p1356_p3), %s284_s13, 4 }
  0x1e   : > { %s286_s27 = scalar_lea.vmem (%p1356_p3), [#allocation4], %s1092_s22 }
  0x1f   : > { %s985_s26 = scalar_lea.vmem (%p1356_p3), %s1517_s2, %s1093_s14 }
  0x20   : > { %v1094_v4 = vld [vmem:[%s985_s26 + $0x10] sm:$0xff] (%p1356_p3)  ;;  %v1095_v5 = vld [vmem:[%s985_s26 + $0x28] sm:$0xff] (%p1356_p3) }
  0x21   : > { %321 = vst [vmem:[%s286_s27] sm:$0xff] (%p1356_p3), %v1094_v4  ;;  %323 = vst [vmem:[%s286_s27 + $0x8] sm:$0xff] (%p1356_p3), %v1095_v5 }
  0x23 PF: > { %p1096_p6 = scmp.ge.s32.totalorder %s1293_s19, 1  ;;  %p328_p7 = scmp.lt.s32.totalorder %s1293_s19, 3 }
  0x25   : > { %p329_p8 = pnand %p1096_p6, %p328_p7 }
  0x26   : > { %s335_s21 = sand.u32 (!%p329_p8), 1, %s1277_s15   ;;  %v1295_v6 = vmov (!%p329_p8), 0.0   ;;  %vm1296_vm0 = vmmov (!%p329_p8), 0   ;;  %vm420_vm1 = vcmask (!%p329_p8), 261120   ;;  %v1409_v14 = vld [vmem:[%s1518_s3] sm:$0xff] (!%p329_p8)  ;;  %v1414_v16 = vld [vmem:[%s1518_s3 + $0x8] sm:$0xff] (!%p329_p8) }
  0x27   : > { %332 = sbr.rel (%p329_p8) target bundleno = 1520 (0x5f0), region = 138  ;;  %1129 = vmatprep.subr.bf16.mxu0 (!%p329_p8), %v1295_v6  ;;  %s1392_s28 = sshll.u32 (!%p329_p8), %s335_s21, 4  ;;  %1131 = vmatprep.mubr.msk.bf16.mxu0 (!%p329_p8), %vm1296_vm0, %v1295_v6  ;;  %vm468_vm2 = vcmask (!%p329_p8), 130048   ;;  %vm928_vm3 = vcmask (!%p329_p8), 523264   ;;  %vm931_vm4 = vcmask (!%p329_p8), 785408  }
  0x28   : > { %1135 = vmatprep.subr.bf16.mxu1 (!%p329_p8), %v1295_v6  ;;  %1137 = vmatprep.mubr.msk.bf16.mxu1 (!%p329_p8), %vm1296_vm0, %v1295_v6  ;;  %s344_s29 = scalar_lea.vmem (!%p329_p8), [#allocation3], %s1392_s28  ;;  %s337_s15 = scalar_lea.vmem (!%p329_p8), [#allocation2], %s1392_s28 }
  0x29   : > { %v414_v7 = vld [vmem:[%s344_s29] sm:$0xff] (!%p329_p8)  ;;  %v415_v8 = vld [vmem:[%s344_s29 + $0x8] sm:$0xff] (!%p329_p8)  ;;  %s1297_s8 = smov (!%p329_p8), 96   ;;  %s1298_s9 = smov (!%p329_p8), 32  }
  0x2a   : > { %v416_v9 = vpack.c.bf16 (!%p329_p8), %v415_v8, %v414_v7  ;;  %v411_v11 = vld [vmem:[%s337_s15] sm:$0xff] (!%p329_p8)  ;;  %v412_v12 = vld [vmem:[%s337_s15 + $0x8] sm:$0xff] (!%p329_p8)  ;;  %s351_s10 = scalar_lea.vmem (!%p329_p8), [#allocation4], %s1392_s28  ;;  %s1299_s11 = smov (!%p329_p8), 64  }
  0x2b   : > { %v413_v13 = vpack.c.bf16 (!%p329_p8), %v412_v12, %v411_v11  ;;  %v417_v34 = vld [vmem:[%s351_s10] sm:$0xff] (!%p329_p8)  ;;  %v418_v35 = vld [vmem:[%s351_s10 + $0x8] sm:$0xff] (!%p329_p8)  ;;  %p399_p9 = scmp.lt.s32.totalorder (!%p329_p8), %s1285_s17, 1 }
  0x2c   : > { %v425_v10 = vsel (!%p329_p8), %vm420_vm1, %v416_v9, 0  ;;  %v1425_v36 = vpack.c.bf16 (!%p329_p8), %v418_v35, %v417_v34 }
  0x2d   : > { %1130 = vmatpush3.bf16.xpose.msra.mxu0 (!%p329_p8), %v425_v10 }
  0x2e   : > { %1147 = vmatprep.subr.bf16.mxu0 %v1295_v6  ;;  %1136 = vmatpush3.bf16.msra.mxu1 %v1425_v36  ;;  %s1528_s17 = smov (!%p399_p9, %s1285_s17), 1 }
  0x2f   : > { %1141 = vmatprep.subr.bf16.mxu1 %v1295_v6  ;;  %s1112_s12 = sshll.u32 %s1528_s17, 4 }
  0x30   : > { %s406_s22 = scalar_lea.vmem %s1519_s4, %s1112_s12 }
  0x34   : > { %1132 = vmatmul.mubr.msk.bf16.vlgmr.msra.gmra.mrb[0].mxu0 %vm420_vm1, %v413_v13 }
  0x35   : > { %1149 = vmatprep.mubr.msk.bf16.mxu0 %vm1296_vm0, %v1295_v6 }
 0x107   : > { %v461_v15 = vpop.f32.mrb[0].mxu0 }
 0x108   : > { %v462_v17 = vadd.f32 %v461_v15, %v1409_v14  ;;  %v1133_v18 = vpop.f32.mrb[1].mxu0 }
 0x109   : > { %v464_v19 = vpop.f32.mrb[2].mxu0 }
 0x10a   : > { %v465_v20 = vadd.f32 %v464_v19, %v1414_v16  ;;  %v1134_v21 = vpop.f32.mrb[3].mxu0  ;;  %v469_v22 = vsel %vm468_vm2, %v462_v17, -inf }
 0x10b   : > { %470 = vmax.xlane.f32.xlu0 %v469_v22 }
 0x10c   : > { %v472_v23 = vsel %vm468_vm2, %v465_v20, -inf }
 0x10f   : > { %473 = vmax.xlane.f32.xlu0 %v472_v23 }
 0x125   : > { %540 = vrot.lane.b32.xlu0 %v416_v9, %s1297_s8 }
 0x129   : > { %783 = vrot.lane.b32.xlu0 %v416_v9, %s1298_s9 }
 0x198   : > { %v471_v24 = vpop.xlane.xlu0 %470 }
 0x199   : > { %v475_v25 = vsub.f32 %v462_v17, %v471_v24 }
 0x19b   : > { %v477_v26 = vmul.f32 1.442695, %v475_v25 }
 0x19c   : > { %v474_v27 = vpop.xlane.xlu0 %473 }
 0x19d   : > { %1223 = vpow2.f32 %v477_v26  ;;  %v476_v28 = vsub.f32 %v465_v20, %v474_v27 }
 0x19f   : > { %v479_v29 = vmul.f32 1.442695, %v476_v28 }
 0x1a0   : > { %v541_v41 = vpop.permute.xlu0 %540 }
 0x1a1   : > { %1225 = vpow2.f32 %v479_v29  ;;  %v546_v45 = vsel %vm420_vm1, %v541_v41, 0 }
 0x1a4   : > { %v784_v49 = vpop.permute.xlu0 %783 }
 0x1a5   : > { %v789_v51 = vsel %vm420_vm1, %v784_v49, 0 }
 0x1a7   : > { %v1224_v30 = vpop.eup %1223 }
 0x1a8   : > { %v481_v31 = vsel %vm468_vm2, %v1224_v30, 0.0 }
 0x1a9   : > { %482 = vadd.xlane.f32.xlu1 %v481_v31 }
 0x1ab   : > { %v1226_v32 = vpop.eup %1225 }
 0x1ac   : > { %v484_v33 = vsel %vm468_vm2, %v1226_v32, 0.0 }
 0x1ad   : > { %485 = vadd.xlane.f32.xlu1 %v484_v33 }
 0x1be   : > { %537 = vrot.lane.b32.xlu1 %v413_v13, %s1297_s8 }
 0x1c2   : > { %662 = vrot.lane.b32.xlu1 %v416_v9, %s1299_s11 }
 0x1c6   : > { %660 = vrot.lane.b32.xlu1 %v413_v13, %s1299_s11 }
 0x1ca   : > { %781 = vrot.lane.b32.xlu1 %v413_v13, %s1298_s9 }
 0x236   : > { %v483_v37 = vpop.xlane.xlu1 %482 }
 0x237   : > { %1227 = vrcp.f32 %v483_v37 }
 0x23a   : > { %v486_v38 = vpop.xlane.xlu1 %485 }
 0x23b   : > { %1229 = vrcp.f32 %v486_v38 }
 0x23e   : > { %v538_v44 = vpop.permute.xlu1 %537 }
 0x241   : > { %v1228_v39 = vpop.eup %1227 }
 0x242   : > { %v489_v42 = vmul.f32 %v1228_v39, %v1224_v30  ;;  %v663_v47 = vpop.permute.xlu1 %662 }
 0x243   : > { %v668_v48 = vsel %vm420_vm1, %v663_v47, 0 }
 0x245   : > { %v1230_v40 = vpop.eup %1229 }
 0x246   : > { %v490_v43 = vmul.f32 %v1230_v40, %v1226_v32  ;;  %v661_v50 = vpop.permute.xlu1 %660 }
 0x248   : > { %v491_v46 = vpack.c.bf16 %v490_v43, %v489_v42 }
 0x24a   : > { %1138 = vmatmul.mubr.msk.bf16.vlgmr.msra.gmra.mrb[0].mxu1 %vm468_vm2, %v491_v46  ;;  %v782_v52 = vpop.permute.xlu1 %781 }
 0x24b   : > { %1142 = vmatpush3.bf16.xpose.msra.mxu1 %v546_v45  ;;  %1143 = vmatprep.mubr.msk.bf16.mxu1 %vm1296_vm0, %v1295_v6 }
 0x24c   : > { %1153 = vmatprep.subr.bf16.mxu1 %v1295_v6 }
 0x252   : > { %1144 = vmatmul.mubr.msk.bf16.vlgmr.msra.gmra.mrb[4].mxu1 %vm420_vm1, %v538_v44 }
 0x253   : > { %1154 = vmatpush3.bf16.xpose.msra.mxu1 %v668_v48  ;;  %1155 = vmatprep.mubr.msk.bf16.mxu1 %vm1296_vm0, %v1295_v6 }
 0x254   : > { %1165 = vmatprep.subr.bf16.mxu1 %v1295_v6 }
 0x25a   : > { %1156 = vmatmul.mubr.msk.bf16.vlgmr.msra.gmra.mrb[8].mxu1 %vm420_vm1, %v661_v50 }
 0x25b   : > { %1166 = vmatpush3.bf16.xpose.msra.mxu1 %v789_v51  ;;  %1167 = vmatprep.mubr.msk.bf16.mxu1 %vm1296_vm0, %v1295_v6 }
 0x262   : > { %1168 = vmatmul.mubr.msk.bf16.vlgmr.msra.gmra.mrb[12].mxu1 %vm420_vm1, %v782_v52 }
 0x31d   : > { %v1448_v53 = vpop.f32.mrb[0].mxu1 }
 0x31e   : > { %v1139_v54 = vpop.f32.mrb[1].mxu1 }
 0x31f   : > { %v1450_v55 = vpop.f32.mrb[2].mxu1 }
 0x320   : > { %v1140_v56 = vpop.f32.mrb[3].mxu1 }
 0x325   : > { %v582_v57 = vpop.f32.mrb[4].mxu1 }
 0x326   : > { %v583_v58 = vadd.f32 %v582_v57, %v1409_v14  ;;  %v1145_v59 = vpop.f32.mrb[5].mxu1 }
 0x327   : > { %v585_v60 = vpop.f32.mrb[6].mxu1 }
 0x328   : > { %v586_v61 = vadd.f32 %v585_v60, %v1414_v16  ;;  %v1146_v62 = vpop.f32.mrb[7].mxu1  ;;  %v589_v63 = vsel %vm468_vm2, %v583_v58, -inf }
 0x329   : > { %590 = vmax.xlane.f32.xlu0 %v589_v63 }
 0x32a   : > { %v592_v0 = vsel %vm468_vm2, %v586_v61, -inf }
 0x32b   : > { %593 = vmax.xlane.f32.xlu1 %v592_v0 }
 0x32d   : > { %v704_v1 = vpop.f32.mrb[8].mxu1 }
 0x32e   : > { %v705_v2 = vadd.f32 %v704_v1, %v1409_v14  ;;  %v1157_v3 = vpop.f32.mrb[9].mxu1 }
 0x32f   : > { %v707_v4 = vpop.f32.mrb[10].mxu1 }
 0x330   : > { %v708_v5 = vadd.f32 %v707_v4, %v1414_v16  ;;  %v1158_v7 = vpop.f32.mrb[11].mxu1  ;;  %v711_v8 = vsel %vm468_vm2, %v705_v2, -inf }
 0x331   : > { %712 = vmax.xlane.f32.xlu0 %v711_v8 }
 0x332   : > { %v714_v9 = vsel %vm468_vm2, %v708_v5, -inf }
 0x335   : > { %715 = vmax.xlane.f32.xlu0 %v714_v9  ;;  %v825_v10 = vpop.f32.mrb[12].mxu1 }
 0x336   : > { %v826_v11 = vadd.f32 %v825_v10, %v1409_v14  ;;  %v1169_v12 = vpop.f32.mrb[13].mxu1 }
 0x337   : > { %v828_v13 = vpop.f32.mrb[14].mxu1 }
 0x338   : > { %v829_v15 = vadd.f32 %v828_v13, %v1414_v16  ;;  %v832_v17 = vsel %vm468_vm2, %v826_v11, -inf  ;;  %v1170_v18 = vpop.f32.mrb[15].mxu1 }
 0x339   : > { %833 = vmax.xlane.f32.xlu0 %v832_v17 }
 0x33a   : > { %v835_v19 = vsel %vm468_vm2, %v829_v15, -inf }
 0x33b   : > { %836 = vmax.xlane.f32.xlu1 %v835_v19 }
 0x3b6   : > { %v591_v20 = vpop.xlane.xlu0 %590 }
 0x3b7   : > { %v595_v21 = vsub.f32 %v583_v58, %v591_v20 }
 0x3b8   : > { %v594_v22 = vpop.xlane.xlu1 %593 }
 0x3b9   : > { %v597_v23 = vmul.f32 1.442695, %v595_v21  ;;  %v596_v24 = vsub.f32 %v586_v61, %v594_v22 }
 0x3bb   : > { %1231 = vpow2.f32 %v597_v23  ;;  %v599_v25 = vmul.f32 1.442695, %v596_v24 }
 0x3bd   : > { %1233 = vpow2.f32 %v599_v25 }
 0x3be   : > { %v713_v14 = vpop.xlane.xlu0 %712 }
 0x3bf   : > { %v717_v26 = vsub.f32 %v705_v2, %v713_v14 }
 0x3c1   : > { %v719_v27 = vmul.f32 1.442695, %v717_v26 }
 0x3c2   : > { %v716_v28 = vpop.xlane.xlu0 %715 }
 0x3c3   : > { %1235 = vpow2.f32 %v719_v27  ;;  %v718_v16 = vsub.f32 %v708_v5, %v716_v28 }
 0x3c5   : > { %v1232_v29 = vpop.eup %1231  ;;  %v721_v30 = vmul.f32 1.442695, %v718_v16 }
 0x3c6   : > { %v834_v31 = vpop.xlane.xlu0 %833  ;;  %v601_v32 = vsel %vm468_vm2, %v1232_v29, 0.0 }
 0x3c7   : > { %v1234_v33 = vpop.eup %1233  ;;  %1237 = vpow2.f32 %v721_v30  ;;  %v838_v34 = vsub.f32 %v826_v11, %v834_v31  ;;  %602 = vadd.xlane.f32.xlu0 %v601_v32 }
 0x3c8   : > { %v604_v35 = vsel %vm468_vm2, %v1234_v33, 0.0  ;;  %v837_v44 = vpop.xlane.xlu1 %836 }
 0x3c9   : > { %v840_v37 = vmul.f32 1.442695, %v838_v34  ;;  %605 = vadd.xlane.f32.xlu1 %v604_v35  ;;  %v839_v45 = vsub.f32 %v829_v15, %v837_v44 }
 0x3cb   : > { %1239 = vpow2.f32 %v840_v37  ;;  %v842_v46 = vmul.f32 1.442695, %v839_v45 }
 0x3cd   : > { %v1236_v38 = vpop.eup %1235  ;;  %1241 = vpow2.f32 %v842_v46 }
 0x3ce   : > { %v723_v39 = vsel %vm468_vm2, %v1236_v38, 0.0 }
 0x3cf   : > { %724 = vadd.xlane.f32.xlu0 %v723_v39 }
 0x3d1   : > { %v1238_v40 = vpop.eup %1237 }
 0x3d2   : > { %v726_v41 = vsel %vm468_vm2, %v1238_v40, 0.0 }
 0x3d3   : > { %727 = vadd.xlane.f32.xlu1 %v726_v41 }
 0x3d5   : > { %v1240_v42 = vpop.eup %1239 }
 0x3d6   : > { %v844_v43 = vsel %vm468_vm2, %v1240_v42, 0.0 }
 0x3d7   : > { %845 = vadd.xlane.f32.xlu0 %v844_v43  ;;  %v1242_v47 = vpop.eup %1241 }
 0x3d8   : > { %v847_v48 = vsel %vm468_vm2, %v1242_v47, 0.0 }
 0x3e4   : > { %734 = vrot.lane.b32.xlu1 %v1425_v36, %s1299_s11 }
 0x3ed   : > { %613 = vrot.lane.b32.xlu0 %v1425_v36, %s1297_s8 }
 0x408   : > { %848 = vadd.xlane.f32.xlu1 %v847_v48 }
 0x419   : > { %855 = vrot.lane.b32.xlu1 %v1425_v36, %s1298_s9 }
 0x454   : > { %v603_v50 = vpop.xlane.xlu0 %602 }
 0x456   : > { %v606_v49 = vpop.xlane.xlu1 %605 }
 0x457   : > { %1243 = vrcp.f32 %v606_v49 }
 0x458   : > { %1245 = vrcp.f32 %v603_v50 }
 0x45c   : > { %v725_v51 = vpop.xlane.xlu0 %724 }
 0x460   : > { %v728_v52 = vpop.xlane.xlu1 %727 }
 0x461   : > { %1247 = vrcp.f32 %v728_v52  ;;  %v1244_v54 = vpop.eup %1243 }
 0x462   : > { %1249 = vrcp.f32 %v725_v51  ;;  %v1246_v57 = vpop.eup %1245  ;;  %v610_v58 = vmul.f32 %v1244_v54, %v1234_v33 }
 0x463   : > { %v609_v59 = vmul.f32 %v1246_v57, %v1232_v29 }
 0x464   : > { %v846_v56 = vpop.xlane.xlu0 %845  ;;  %v735_v36 = vpop.permute.xlu1 %734 }
 0x465   : > { %v611_v61 = vpack.c.bf16 %v610_v58, %v609_v59  ;;  %1251 = vrcp.f32 %v846_v56 }
 0x468   : > { %v614_v60 = vpop.permute.xlu0 %613 }
 0x469   : > { %1148 = vmatpush3.bf16.msra.mxu0 %v614_v60 }
 0x46a   : > { %1159 = vmatprep.subr.bf16.mxu0 %v1295_v6 }
 0x46b   : > { %v1248_v62 = vpop.eup %1247 }
 0x46c   : > { %1150 = vmatmul.mubr.msk.bf16.vlgmr.msra.gmra.mrb[4].mxu0 %vm468_vm2, %v611_v61  ;;  %v1250_v63 = vpop.eup %1249  ;;  %v732_v0 = vmul.f32 %v1248_v62, %v1238_v40 }
 0x46d   : > { %1160 = vmatpush3.bf16.msra.mxu0 %v735_v36  ;;  %1161 = vmatprep.mubr.msk.bf16.mxu0 %vm1296_vm0, %v1295_v6  ;;  %v731_v1 = vmul.f32 %v1250_v63, %v1236_v38 }
 0x46e   : > { %1171 = vmatprep.subr.bf16.mxu0 %v1295_v6 }
 0x46f   : > { %v733_v2 = vpack.c.bf16 %v732_v0, %v731_v1  ;;  %v1252_v5 = vpop.eup %1251 }
 0x470   : > { %v852_v8 = vmul.f32 %v1252_v5, %v1240_v42 }
 0x474   : > { %1162 = vmatmul.mubr.msk.bf16.vlgmr.msra.gmra.mrb[8].mxu0 %vm468_vm2, %v733_v2 }
 0x475   : > { %1173 = vmatprep.mubr.msk.bf16.mxu0 %vm1296_vm0, %v1295_v6 }
 0x495   : > { %v849_v3 = vpop.xlane.xlu1 %848 }
 0x496   : > { %1253 = vrcp.f32 %v849_v3 }
 0x499   : > { %v856_v4 = vpop.permute.xlu1 %855 }
 0x49a   : > { %1172 = vmatpush3.bf16.msra.mxu0 %v856_v4 }
 0x4a0   : > { %v1254_v7 = vpop.eup %1253 }
 0x4a1   : > { %v853_v9 = vmul.f32 %v1254_v7, %v1242_v47 }
 0x4a3   : > { %v854_v10 = vpack.c.bf16 %v853_v9, %v852_v8 }
 0x4a5   : > { %1174 = vmatmul.mubr.msk.bf16.vlgmr.msra.gmra.mrb[12].mxu0 %vm468_vm2, %v854_v10 }
 0x53f   : > { %v653_v11 = vpop.f32.mrb[4].mxu0 }
 0x540   : > { %904 = vrot.lane.b32.xlu1 %v653_v11, %s1298_s9  ;;  %v1151_v12 = vpop.f32.mrb[5].mxu0 }
 0x541   : > { %v656_v13 = vpop.f32.mrb[6].mxu0 }
 0x542   : > { %906 = vrot.lane.b32.xlu0 %v656_v13, %s1298_s9  ;;  %v1152_v6 = vpop.f32.mrb[7].mxu0 }
 0x547   : > { %v774_v15 = vpop.f32.mrb[8].mxu0 }
 0x548   : > { %912 = vrot.lane.b32.xlu1 %v774_v15, %s1299_s11  ;;  %v1163_v17 = vpop.f32.mrb[9].mxu0 }
 0x549   : > { %v777_v18 = vpop.f32.mrb[10].mxu0 }
 0x54a   : > { %914 = vrot.lane.b32.xlu0 %v777_v18, %s1299_s11  ;;  %v1164_v19 = vpop.f32.mrb[11].mxu0 }
 0x578   : > { %v895_v20 = vpop.f32.mrb[12].mxu0 }
 0x579   : > { %920 = vrot.lane.b32.xlu1 %v895_v20, %s1297_s8  ;;  %v1175_v21 = vpop.f32.mrb[13].mxu0 }
 0x57a   : > { %v898_v22 = vpop.f32.mrb[14].mxu0 }
 0x57b   : > { %922 = vrot.lane.b32.xlu0 %v898_v22, %s1297_s8  ;;  %v1176_v23 = vpop.f32.mrb[15].mxu0 }
 0x5b2   : > { %v905_v24 = vpop.permute.xlu1 %904 }
 0x5b3   : > { %v926_v27 = vsel %vm420_vm1, %v1448_v53, %v905_v24 }
 0x5b4   : > { %v907_v25 = vpop.permute.xlu0 %906 }
 0x5b5   : > { %v927_v29 = vsel %vm420_vm1, %v1450_v55, %v907_v25 }
 0x5ba   : > { %v913_v14 = vpop.permute.xlu1 %912 }
 0x5bb   : > { %v929_v28 = vsel %vm928_vm3, %v926_v27, %v913_v14 }
 0x5bc   : > { %v915_v26 = vpop.permute.xlu0 %914 }
 0x5bd   : > { %v930_v31 = vsel %vm928_vm3, %v927_v29, %v915_v26 }
 0x5eb   : > { %v921_v16 = vpop.permute.xlu1 %920 }
 0x5ec   : > { %v932_v30 = vsel %vm931_vm4, %v929_v28, %v921_v16 }
 0x5ed   : > { %934 = vst [vmem:[%s406_s22] sm:$0xff] %v932_v30  ;;  %v923_v32 = vpop.permute.xlu0 %922 }
 0x5ee   : > { %v933_v33 = vsel %vm931_vm4, %v930_v31, %v923_v32 }
 0x5ef   : > { %935 = vst [vmem:[%s406_s22 + $0x8] sm:$0xff] %v933_v33 }
 0x5f0 PF: > { %s14_s19 = sadd.s32 1, %s1293_s19   ;;  %s1521_s15 = smov %s1281_s16 }
 0x5f1   : > { %p11_p10 = scmp.ge.s32.totalorder %s14_s19, 4   ;;  %s1522_s16 = smov %s1364_s24 }
 0x5f2   : > { %s1523_s17 = smov %s1289_s18  ;;  %s1524_s18 = smov %s1526_s20 }
 0x5f3   :  { %13 = sbr.rel (!%p11_p10) target bundleno = 3 (0x3), region = 204 }

// kernel: transformer_forward.33
= control target key start
LH: loop header
LB: loop body
LE: loop exit
PB: predicated region body
PF: predicated region fallthrough
CT: control target
= control target key end

     0   :  { %v483_v1 = vmov 0   ;;  %v352_v31 = vlaneseq  ;;  %s629_s1 = inlined_call_operand.vmem [shape: bf16[128,384], index: 1, kind: input, shape index: {}]   ;;  %s630_s0 = inlined_call_operand.vmem [shape: f32[32,128], index: 0, kind: input, shape index: {}]   ;;  %s631_s2 = inlined_call_operand.vmem [shape: f32[1,384], index: 2, kind: input, shape index: {}]   ;;  %s632_s3 = inlined_call_operand.vmem [shape: f32[32,384], index: 3, kind: output, shape index: {}]  }
   0x1   :  { %v451_v0 = vld [vmem:[%s629_s1 + $0x4] ss:$12 sps:$4 sm:$0xff]   ;;  %241 = vmatprep.mubr.bf16.mxu0 %v483_v1  ;;  %v453_v2 = vld [vmem:[%s629_s1] ss:$12 sps:$4 sm:$0xff]   ;;  %v454_v3 = vld [vmem:[%s629_s1 + $0x1c] ss:$12 sps:$4 sm:$0xff]  }
   0x2   :  { %209 = vmatprep.subr.bf16.mxu0 %v451_v0  ;;  %v456_v4 = vld [vmem:[%s629_s1 + $0x18] ss:$12 sps:$4 sm:$0xff]   ;;  %v457_v5 = vld [vmem:[%s629_s1 + $0x8] ss:$12 sps:$4 sm:$0xff]   ;;  %v461_v7 = vld [vmem:[%s629_s1 + $0x20] ss:$12 sps:$4 sm:$0xff]  }
   0x3   :  { %210 = vmatpush1.bf16.msra.mxu0 %v453_v2  ;;  %v458_v6 = vld [vmem:[%s629_s1 + $0x34] ss:$12 sps:$4 sm:$0xff]   ;;  %429 = vmatprep.subr.bf16.mxu1 %v457_v5  ;;  %v460_v8 = vld [vmem:[%s629_s1 + $0x30] ss:$12 sps:$4 sm:$0xff]   ;;  %v462_v9 = vld [vmem:[%s629_s1 + $0x4c] ss:$12 sps:$4 sm:$0xff]  }
   0x4   :  { %211 = vmatprep.subr.bf16.mxu0 %v454_v3  ;;  %430 = vmatpush3.bf16.msra.mxu1 %v457_v5  ;;  %v465_v10 = vld [vmem:[%s629_s1 + $0x38] ss:$12 sps:$4 sm:$0xff]   ;;  %v464_v11 = vld [vmem:[%s629_s1 + $0x48] ss:$12 sps:$4 sm:$0xff]   ;;  %v469_v12 = vld [vmem:[%s629_s1 + $0x50] ss:$12 sps:$4 sm:$0xff]  }
   0x5   :  { %431 = vmatprep.subr.bf16.mxu1 %v461_v7  ;;  %v466_v13 = vld [vmem:[%s629_s1 + $0x64] ss:$12 sps:$4 sm:$0xff]   ;;  %v468_v14 = vld [vmem:[%s629_s1 + $0x60] ss:$12 sps:$4 sm:$0xff]   ;;  %v473_v15 = vld [vmem:[%s629_s1 + $0x68] ss:$12 sps:$4 sm:$0xff]  }
   0x6   :  { %v470_v16 = vld [vmem:[%s629_s1 + $0x7c] ss:$12 sps:$4 sm:$0xff]   ;;  %v43_v17 = vld [vmem:[%s630_s0] sm:$0xff]  ;;  %v478_v25 = vld [vmem:[%s629_s1 + $0xac] ss:$12 sps:$4 sm:$0xff]   ;;  %v353_v32 = vshrl.u32 %v352_v31, 7 }
   0x7   :  { %212 = vmatpush1.bf16.msra.mxu0 %v456_v4  ;;  %v44_v18 = vld [vmem:[%s630_s0 + $0x8] sm:$0xff]  ;;  %v472_v19 = vld [vmem:[%s629_s1 + $0x78] ss:$12 sps:$4 sm:$0xff]   ;;  %v474_v22 = vld [vmem:[%s629_s1 + $0x94] ss:$12 sps:$4 sm:$0xff]  }
   0x8   :  { %213 = vmatprep.subr.bf16.mxu0 %v458_v6  ;;  %432 = vmatpush3.bf16.msra.mxu1 %v461_v7  ;;  %v477_v20 = vld [vmem:[%s629_s1 + $0x80] ss:$12 sps:$4 sm:$0xff]   ;;  %v47_v21 = vpack.c.bf16 %v44_v18, %v43_v17  ;;  %v476_v23 = vld [vmem:[%s629_s1 + $0x90] ss:$12 sps:$4 sm:$0xff]   ;;  %v481_v24 = vld [vmem:[%s629_s1 + $0x98] ss:$12 sps:$4 sm:$0xff]  }
   0x9   :  { %433 = vmatprep.subr.bf16.mxu1 %v465_v10  ;;  %v480_v26 = vld [vmem:[%s629_s1 + $0xa8] ss:$12 sps:$4 sm:$0xff]   ;;  %v482_v27 = vld [vmem:[%s629_s1 + $0xb0] ss:$12 sps:$4 sm:$0xff]   ;;  %v354_v33 = vsub.s32 0, %v353_v32  ;;  %v358_v35 = vsub.s32 1, %v353_v32 }
   0xa   :  { %445 = vmatprep.mubr.bf16.mxu1 %v47_v21  ;;  %v45_v28 = vld [vmem:[%s630_s0 + $0x10] sm:$0xff]  ;;  %v46_v29 = vld [vmem:[%s630_s0 + $0x18] sm:$0xff]  ;;  %v350_v34 = vld [vmem:[%s631_s2] sm:$0x7]  ;;  %v362_v36 = vsub.s32 2, %v353_v32 }
   0xb   :  { %214 = vmatpush1.bf16.msra.mxu0 %v460_v8  ;;  %v48_v30 = vpack.c.bf16 %v46_v29, %v45_v28  ;;  %v355_v37 = vrot.slane %v350_v34, %v354_v33  ;;  %v359_v39 = vrot.slane %v350_v34, %v358_v35 }
   0xc   :  { %215 = vmatprep.subr.bf16.mxu0 %v462_v9  ;;  %434 = vmatpush3.bf16.msra.mxu1 %v465_v10  ;;  %v363_v42 = vrot.slane %v350_v34, %v362_v36 }
   0xd   :  { %435 = vmatprep.subr.bf16.mxu1 %v469_v12 }
   0xf   :  { %216 = vmatpush1.bf16.msra.mxu0 %v464_v11 }
  0x10   :  { %217 = vmatprep.subr.bf16.mxu0 %v466_v13  ;;  %436 = vmatpush3.bf16.msra.mxu1 %v469_v12 }
  0x11   :  { %437 = vmatprep.subr.bf16.mxu1 %v473_v15 }
  0x13   :  { %218 = vmatpush1.bf16.msra.mxu0 %v468_v14 }
  0x14   :  { %219 = vmatprep.subr.bf16.mxu0 %v470_v16  ;;  %438 = vmatpush3.bf16.msra.mxu1 %v473_v15 }
  0x15   :  { %439 = vmatprep.subr.bf16.mxu1 %v477_v20 }
  0x17   :  { %220 = vmatpush1.bf16.msra.mxu0 %v472_v19 }
  0x18   :  { %221 = vmatprep.subr.bf16.mxu0 %v474_v22  ;;  %440 = vmatpush3.bf16.msra.mxu1 %v477_v20 }
  0x19   :  { %441 = vmatprep.subr.bf16.mxu1 %v481_v24 }
  0x1b   :  { %222 = vmatpush1.bf16.msra.mxu0 %v476_v23 }
  0x1c   :  { %223 = vmatprep.subr.bf16.mxu0 %v478_v25  ;;  %442 = vmatpush3.bf16.msra.mxu1 %v481_v24 }
  0x1d   :  { %443 = vmatprep.subr.bf16.mxu1 %v482_v27 }
  0x1f   :  { %224 = vmatpush1.bf16.msra.mxu0 %v480_v26 }
  0x20   :  { %444 = vmatpush3.bf16.msra.mxu1 %v482_v27 }
  0x22   :  { %242 = vmatmul.mubr.bf16.vlgmr.msra.gmra.mrb[0].mxu0 %v47_v21 }
  0x23   :  { %251 = vmatprep.mubr.bf16.mxu0 %v483_v1  ;;  %446 = vmatmul.mubr.bf16.vlgmr.msra.gmra.mrb[0].mxu1 %v48_v30 }
  0x2a   :  { %252 = vmatmul.mubr.bf16.gmra.mrb[4].mxu0 %v48_v30 }
  0xf5   :  { %v243_v38 = vpop.f32.mrb[0].mxu0 }
  0xf6   :  { %v245_v40 = vpop.f32.mrb[1].mxu0  ;;  %v367_v43 = vadd.f32 %v355_v37, %v243_v38  ;;  %v447_v45 = vpop.f32.mrb[0].mxu1 }
  0xf7   :  { %v247_v41 = vpop.f32.mrb[2].mxu0  ;;  %v368_v46 = vadd.f32 %v359_v39, %v245_v40  ;;  %v296_v47 = vpop.f32.mrb[1].mxu1  ;;  %v375_v51 = vadd.f32 %v447_v45, %v363_v42 }
  0xf8   :  { %v249_v44 = vpop.f32.mrb[3].mxu0  ;;  %379 = vst [vmem:[%s632_s3] sm:$0xff] %v367_v43  ;;  %v370_v48 = vadd.f32 %v355_v37, %v247_v41  ;;  %v448_v49 = vpop.f32.mrb[2].mxu1  ;;  %v369_v53 = vadd.f32 %v363_v42, %v296_v47 }
  0xf9   :  { %380 = vst [vmem:[%s632_s3 + $0x8] sm:$0xff] %v368_v46  ;;  %v371_v50 = vadd.f32 %v359_v39, %v249_v44  ;;  %v299_v52 = vpop.f32.mrb[3].mxu1  ;;  %387 = vst [vmem:[%s632_s3 + $0x40] sm:$0xff] %v375_v51  ;;  %v378_v54 = vadd.f32 %v448_v49, %v363_v42 }
  0xfa   :  { %382 = vst [vmem:[%s632_s3 + $0x18] sm:$0xff] %v370_v48  ;;  %381 = vst [vmem:[%s632_s3 + $0x10] sm:$0xff] %v369_v53  ;;  %v372_v56 = vadd.f32 %v363_v42, %v299_v52 }
  0xfb   :  { %383 = vst [vmem:[%s632_s3 + $0x20] sm:$0xff] %v371_v50  ;;  %390 = vst [vmem:[%s632_s3 + $0x58] sm:$0xff] %v378_v54 }
  0xfc   :  { %384 = vst [vmem:[%s632_s3 + $0x28] sm:$0xff] %v372_v56 }
  0xfd   :  { %v253_v55 = vpop.f32.mrb[4].mxu0 }
  0xfe   :  { %v255_v57 = vpop.f32.mrb[5].mxu0  ;;  %v373_v59 = vadd.f32 %v355_v37, %v253_v55 }
  0xff   :  { %v257_v58 = vpop.f32.mrb[6].mxu0  ;;  %v374_v61 = vadd.f32 %v359_v39, %v255_v57 }
 0x100   :  { %v259_v60 = vpop.f32.mrb[7].mxu0  ;;  %385 = vst [vmem:[%s632_s3 + $0x30] sm:$0xff] %v373_v59  ;;  %v376_v62 = vadd.f32 %v355_v37, %v257_v58 }
 0x101   :  { %386 = vst [vmem:[%s632_s3 + $0x38] sm:$0xff] %v374_v61  ;;  %v377_v63 = vadd.f32 %v359_v39, %v259_v60 }
 0x102   :  { %388 = vst [vmem:[%s632_s3 + $0x48] sm:$0xff] %v376_v62 }
 0x103   :  { %389 = vst [vmem:[%s632_s3 + $0x50] sm:$0xff] %v377_v63 }

// kernel: transformer_forward.26
= control target key start
LH: loop header
LB: loop body
LE: loop exit
PB: predicated region body
PF: predicated region fallthrough
CT: control target
= control target key end

     0   :  { %s1253_s12 = smov 0   ;;  %s1255_s13 = smov 0   ;;  %s1425_s0 = inlined_call_operand.vmem [shape: f32[2,16,384], index: 0, kind: input, shape index: {}, may-alias: {0,1,2}]   ;;  %s1426_s1 = inlined_call_operand.vmem [shape: f32[2,16,384], index: 1, kind: input, shape index: {}, may-alias: {0,1,2}]   ;;  %s1427_s2 = inlined_call_operand.vmem [shape: f32[2,16,384], index: 2, kind: input, shape index: {}, may-alias: {0,1,2}]   ;;  %s1428_s3 = inlined_call_operand.vmem [shape: f32[2,16,128], index: 3, kind: output, shape index: {}]  }
   0x1   :  { %s1257_s14 = smov 0   ;;  %s1259_s15 = smov 0  }
   0x2   :  { %s1261_s16 = smov 0  }
   0x3 LB: > { %s25_s17 = sadd.s32 1, %s1222_s15  ;;  %p41_p1 = scmp.ne.s32.totalorder %s1214_s13, %s1210_s12  ;;  %s1226_s16 = sphi %s1261_s16, %s13_s16   ;;  %s1222_s15 = sphi %s1259_s15, %s1433_s15   ;;  %s1218_s14 = sphi %s1257_s14, %s1432_s14   ;;  %s1214_s13 = sphi %s1255_s13, %s1431_s13   ;;  %s1210_s12 = sphi %s1253_s12, %s1430_s12  }
   0x4   : > { %p27_p0 = scmp.ge.s32.totalorder %s25_s17, 2  ;;  %p42_p2 = scmp.eq.s32.totalorder %s1226_s16, 0 }
   0x5   : > { %s34_s20 = sadd.s32 1, %s1214_s13  ;;  %p1018_p5 = scmp.ge.s32.totalorder %s1226_s16, 2 }
   0x6   : > { %s1435_s17 = smov (%p27_p0, %s25_s17), 0  ;;  %p1284_p3 = por %p42_p2, %p41_p1 }
   0x7   : > { %s29_s19 = ssub.s32 %s1222_s15, %s1435_s17  ;;  %147 = sbr.rel (%p1018_p5) target bundleno = 35 (0x23), region = 16 }
   0x8   : > { %p32_p4 = scmp.eq.s32.totalorder %s29_s19, 0 }
   0xa   : > { %s1292_s21 = scalar_select %p32_p4, %s1214_s13, %s34_s20  }
   0xe   : > { %150 = sbr.rel (!%p1284_p3) target bundleno = 21 (0x15), region = 20  ;;  %s152_s22 = sand.u32 (%p1284_p3), 1, %s1214_s13  }
   0xf   : > { %s1110_s23 = smul.u32 (%p1284_p3), 48, %s1222_s15  ;;  %s1019_s24 = sshll.u32 (%p1284_p3), %s152_s22, 4 }
  0x10   : > { %s154_s28 = scalar_lea.vmem (%p1284_p3), [#allocation2], %s1019_s24 }
  0x11   : > { %s160_s27 = scalar_lea.vmem (%p1284_p3), %s1425_s0, %s1110_s23 }
  0x12   : > { %v190_v0 = vld [vmem:[%s160_s27] sm:$0xff] (%p1284_p3)  ;;  %v192_v1 = vld [vmem:[%s160_s27 + $0x18] sm:$0xff] (%p1284_p3) }
  0x13   : > { %191 = vst [vmem:[%s154_s28] sm:$0xff] (%p1284_p3), %v190_v0  ;;  %193 = vst [vmem:[%s154_s28 + $0x8] sm:$0xff] (%p1284_p3), %v192_v1 }
  0x15 PF: > { %199 = sbr.rel (!%p1284_p3) target bundleno = 28 (0x1c), region = 58  ;;  %s201_s29 = sand.u32 (%p1284_p3), 1, %s1214_s13  }
  0x16   : > { %s1022_s30 = smul.u32 (%p1284_p3), 48, %s1222_s15  ;;  %s1021_s4 = sshll.u32 (%p1284_p3), %s201_s29, 4 }
  0x17   : > { %s203_s8 = scalar_lea.vmem (%p1284_p3), [#allocation3], %s1021_s4 }
  0x18   : > { %s926_s7 = scalar_lea.vmem (%p1284_p3), %s1426_s1, %s1022_s30 }
  0x19   : > { %v1023_v2 = vld [vmem:[%s926_s7 + $0x8] sm:$0xff] (%p1284_p3)  ;;  %v1024_v3 = vld [vmem:[%s926_s7 + $0x20] sm:$0xff] (%p1284_p3) }
  0x1a   : > { %238 = vst [vmem:[%s203_s8] sm:$0xff] (%p1284_p3), %v1023_v2  ;;  %240 = vst [vmem:[%s203_s8 + $0x8] sm:$0xff] (%p1284_p3), %v1024_v3 }
  0x1c PF: > { %246 = sbr.rel (!%p1284_p3) target bundleno = 35 (0x23), region = 96  ;;  %s248_s9 = sand.u32 (%p1284_p3), 1, %s1214_s13  }
  0x1d   : > { %s1026_s10 = smul.u32 (%p1284_p3), 48, %s1222_s15  ;;  %s1025_s11 = sshll.u32 (%p1284_p3), %s248_s9, 4 }
  0x1e   : > { %s250_s23 = scalar_lea.vmem (%p1284_p3), [#allocation4], %s1025_s11 }
  0x1f   : > { %s932_s22 = scalar_lea.vmem (%p1284_p3), %s1427_s2, %s1026_s10 }
  0x20   : > { %v1027_v4 = vld [vmem:[%s932_s22 + $0x10] sm:$0xff] (%p1284_p3)  ;;  %v1028_v5 = vld [vmem:[%s932_s22 + $0x28] sm:$0xff] (%p1284_p3) }
  0x21   : > { %285 = vst [vmem:[%s250_s23] sm:$0xff] (%p1284_p3), %v1027_v4  ;;  %287 = vst [vmem:[%s250_s23 + $0x8] sm:$0xff] (%p1284_p3), %v1028_v5 }
  0x23 PF: > { %p1029_p6 = scmp.ge.s32.totalorder %s1226_s16, 1  ;;  %p292_p7 = scmp.lt.s32.totalorder %s1226_s16, 3 }
  0x25   : > { %p293_p8 = pnand %p1029_p6, %p292_p7 }
  0x26   : > { %s299_s18 = sand.u32 (!%p293_p8), 1, %s1210_s12   ;;  %v1228_v6 = vmov (!%p293_p8), 0.0   ;;  %vm1229_vm0 = vmmov (!%p293_p8), 0   ;;  %vm369_vm1 = vcmask (!%p293_p8), 261120   ;;  %vm417_vm2 = vcmask (!%p293_p8), 130048   ;;  %s1230_s26 = smov (!%p293_p8), 96  }
  0x27   : > { %296 = sbr.rel (%p293_p8) target bundleno = 1516 (0x5ec), region = 134  ;;  %1062 = vmatprep.subr.bf16.mxu0 (!%p293_p8), %v1228_v6  ;;  %s1320_s24 = sshll.u32 (!%p293_p8), %s299_s18, 4  ;;  %1064 = vmatprep.mubr.msk.bf16.mxu0 (!%p293_p8), %vm1229_vm0, %v1228_v6  ;;  %vm877_vm3 = vcmask (!%p293_p8), 523264   ;;  %vm880_vm4 = vcmask (!%p293_p8), 785408  }
  0x28   : > { %1068 = vmatprep.subr.bf16.mxu1 (!%p293_p8), %v1228_v6  ;;  %1070 = vmatprep.mubr.msk.bf16.mxu1 (!%p293_p8), %vm1229_vm0, %v1228_v6  ;;  %s308_s25 = scalar_lea.vmem (!%p293_p8), [#allocation3], %s1320_s24  ;;  %s301_s12 = scalar_lea.vmem (!%p293_p8), [#allocation2], %s1320_s24 }
  0x29   : > { %v363_v7 = vld [vmem:[%s308_s25] sm:$0xff] (!%p293_p8)  ;;  %v364_v8 = vld [vmem:[%s308_s25 + $0x8] sm:$0xff] (!%p293_p8)  ;;  %s1231_s27 = smov (!%p293_p8), 32   ;;  %s315_s28 = scalar_lea.vmem (!%p293_p8), [#allocation4], %s1320_s24 }
  0x2a   : > { %v365_v9 = vpack.c.bf16 (!%p293_p8), %v364_v8, %v363_v7  ;;  %v360_v11 = vld [vmem:[%s301_s12] sm:$0xff] (!%p293_p8)  ;;  %v361_v12 = vld [vmem:[%s301_s12 + $0x8] sm:$0xff] (!%p293_p8)  ;;  %s1232_s29 = smov (!%p293_p8), 64   ;;  %p350_p9 = scmp.lt.s32.totalorder (!%p293_p8), %s1218_s14, 1 }
  0x2b   : > { %v362_v13 = vpack.c.bf16 (!%p293_p8), %v361_v12, %v360_v11  ;;  %v366_v30 = vld [vmem:[%s315_s28] sm:$0xff] (!%p293_p8)  ;;  %v367_v31 = vld [vmem:[%s315_s28 + $0x8] sm:$0xff] (!%p293_p8) }
  0x2c   : > { %v374_v10 = vsel (!%p293_p8), %vm369_vm1, %v365_v9, 0  ;;  %v1341_v32 = vpack.c.bf16 (!%p293_p8), %v367_v31, %v366_v30 }
  0x2d   : > { %1063 = vmatpush3.bf16.xpose.msra.mxu0 (!%p293_p8), %v374_v10 }
  0x2e   : > { %1080 = vmatprep.subr.bf16.mxu0 %v1228_v6  ;;  %1069 = vmatpush3.bf16.msra.mxu1 %v1341_v32  ;;  %s1437_s14 = smov (!%p350_p9, %s1218_s14), 1 }
  0x2f   : > { %1074 = vmatprep.subr.bf16.mxu1 %v1228_v6  ;;  %s1045_s30 = sshll.u32 %s1437_s14, 4 }
  0x30   : > { %s357_s6 = scalar_lea.vmem %s1428_s3, %s1045_s30 }
  0x34   : > { %1065 = vmatmul.mubr.msk.bf16.vlgmr.msra.gmra.mrb[0].mxu0 %vm369_vm1, %v362_v13 }
  0x35   : > { %1082 = vmatprep.mubr.msk.bf16.mxu0 %vm1229_vm0, %v1228_v6 }
 0x107   : > { %v410_v14 = vpop.f32.mrb[0].mxu0 }
 0x108   : > { %v1066_v15 = vpop.f32.mrb[1].mxu0  ;;  %v418_v16 = vsel %vm417_vm2, %v410_v14, -inf }
 0x109   : > { %419 = vmax.xlane.f32.xlu0 %v418_v16  ;;  %v413_v17 = vpop.f32.mrb[2].mxu0 }
 0x10a   : > { %v1067_v18 = vpop.f32.mrb[3].mxu0  ;;  %v421_v19 = vsel %vm417_vm2, %v413_v17, -inf }
 0x10d   : > { %422 = vmax.xlane.f32.xlu0 %v421_v19 }
 0x123   : > { %489 = vrot.lane.b32.xlu0 %v365_v9, %s1230_s26 }
 0x127   : > { %732 = vrot.lane.b32.xlu0 %v365_v9, %s1231_s27 }
 0x196   : > { %v420_v20 = vpop.xlane.xlu0 %419 }
 0x197   : > { %v424_v21 = vsub.f32 %v410_v14, %v420_v20 }
 0x199   : > { %v426_v22 = vmul.f32 1.442695, %v424_v21 }
 0x19a   : > { %v423_v23 = vpop.xlane.xlu0 %422 }
 0x19b   : > { %1156 = vpow2.f32 %v426_v22  ;;  %v425_v24 = vsub.f32 %v413_v17, %v423_v23 }
 0x19d   : > { %v428_v25 = vmul.f32 1.442695, %v425_v24 }
 0x19e   : > { %v490_v37 = vpop.permute.xlu0 %489 }
 0x19f   : > { %1158 = vpow2.f32 %v428_v25  ;;  %v495_v41 = vsel %vm369_vm1, %v490_v37, 0 }
 0x1a2   : > { %v733_v45 = vpop.permute.xlu0 %732 }
 0x1a3   : > { %v738_v47 = vsel %vm369_vm1, %v733_v45, 0 }
 0x1a5   : > { %v1157_v26 = vpop.eup %1156 }
 0x1a6   : > { %v430_v27 = vsel %vm417_vm2, %v1157_v26, 0.0 }
 0x1a7   : > { %431 = vadd.xlane.f32.xlu1 %v430_v27 }
 0x1a9   : > { %v1159_v28 = vpop.eup %1158 }
 0x1aa   : > { %v433_v29 = vsel %vm417_vm2, %v1159_v28, 0.0 }
 0x1ab   : > { %434 = vadd.xlane.f32.xlu1 %v433_v29 }
 0x1bc   : > { %486 = vrot.lane.b32.xlu1 %v362_v13, %s1230_s26 }
 0x1c0   : > { %611 = vrot.lane.b32.xlu1 %v365_v9, %s1232_s29 }
 0x1c4   : > { %609 = vrot.lane.b32.xlu1 %v362_v13, %s1232_s29 }
 0x1c8   : > { %730 = vrot.lane.b32.xlu1 %v362_v13, %s1231_s27 }
 0x234   : > { %v432_v33 = vpop.xlane.xlu1 %431 }
 0x235   : > { %1160 = vrcp.f32 %v432_v33 }
 0x238   : > { %v435_v34 = vpop.xlane.xlu1 %434 }
 0x239   : > { %1162 = vrcp.f32 %v435_v34 }
 0x23c   : > { %v487_v40 = vpop.permute.xlu1 %486 }
 0x23f   : > { %v1161_v35 = vpop.eup %1160 }
 0x240   : > { %v438_v38 = vmul.f32 %v1161_v35, %v1157_v26  ;;  %v612_v43 = vpop.permute.xlu1 %611 }
 0x241   : > { %v617_v44 = vsel %vm369_vm1, %v612_v43, 0 }
 0x243   : > { %v1163_v36 = vpop.eup %1162 }
 0x244   : > { %v439_v39 = vmul.f32 %v1163_v36, %v1159_v28  ;;  %v610_v46 = vpop.permute.xlu1 %609 }
 0x246   : > { %v440_v42 = vpack.c.bf16 %v439_v39, %v438_v38 }
 0x248   : > { %1071 = vmatmul.mubr.msk.bf16.vlgmr.msra.gmra.mrb[0].mxu1 %vm417_vm2, %v440_v42  ;;  %v731_v48 = vpop.permute.xlu1 %730 }
 0x249   : > { %1075 = vmatpush3.bf16.xpose.msra.mxu1 %v495_v41  ;;  %1076 = vmatprep.mubr.msk.bf16.mxu1 %vm1229_vm0, %v1228_v6 }
 0x24a   : > { %1086 = vmatprep.subr.bf16.mxu1 %v1228_v6 }
 0x250   : > { %1077 = vmatmul.mubr.msk.bf16.vlgmr.msra.gmra.mrb[4].mxu1 %vm369_vm1, %v487_v40 }
 0x251   : > { %1087 = vmatpush3.bf16.xpose.msra.mxu1 %v617_v44  ;;  %1088 = vmatprep.mubr.msk.bf16.mxu1 %vm1229_vm0, %v1228_v6 }
 0x252   : > { %1098 = vmatprep.subr.bf16.mxu1 %v1228_v6 }
 0x258   : > { %1089 = vmatmul.mubr.msk.bf16.vlgmr.msra.gmra.mrb[8].mxu1 %vm369_vm1, %v610_v46 }
 0x259   : > { %1099 = vmatpush3.bf16.xpose.msra.mxu1 %v738_v47  ;;  %1100 = vmatprep.mubr.msk.bf16.mxu1 %vm1229_vm0, %v1228_v6 }
 0x260   : > { %1101 = vmatmul.mubr.msk.bf16.vlgmr.msra.gmra.mrb[12].mxu1 %vm369_vm1, %v731_v48 }
 0x31b   : > { %v1364_v49 = vpop.f32.mrb[0].mxu1 }
 0x31c   : > { %v1072_v50 = vpop.f32.mrb[1].mxu1 }
 0x31d   : > { %v1366_v51 = vpop.f32.mrb[2].mxu1 }
 0x31e   : > { %v1073_v52 = vpop.f32.mrb[3].mxu1 }
 0x323   : > { %v531_v53 = vpop.f32.mrb[4].mxu1 }
 0x324   : > { %v1078_v54 = vpop.f32.mrb[5].mxu1  ;;  %v538_v55 = vsel %vm417_vm2, %v531_v53, -inf }
 0x325   : > { %539 = vmax.xlane.f32.xlu0 %v538_v55  ;;  %v534_v56 = vpop.f32.mrb[6].mxu1 }
 0x326   : > { %v1079_v57 = vpop.f32.mrb[7].mxu1  ;;  %v541_v58 = vsel %vm417_vm2, %v534_v56, -inf }
 0x327   : > { %542 = vmax.xlane.f32.xlu1 %v541_v58 }
 0x32b   : > { %v653_v59 = vpop.f32.mrb[8].mxu1 }
 0x32c   : > { %v1090_v60 = vpop.f32.mrb[9].mxu1  ;;  %v660_v61 = vsel %vm417_vm2, %v653_v59, -inf }
 0x32d   : > { %661 = vmax.xlane.f32.xlu0 %v660_v61  ;;  %v656_v62 = vpop.f32.mrb[10].mxu1 }
 0x32e   : > { %v1091_v63 = vpop.f32.mrb[11].mxu1  ;;  %v663_v0 = vsel %vm417_vm2, %v656_v62, -inf }
 0x331   : > { %664 = vmax.xlane.f32.xlu0 %v663_v0 }
 0x333   : > { %v774_v1 = vpop.f32.mrb[12].mxu1 }
 0x334   : > { %v1102_v2 = vpop.f32.mrb[13].mxu1  ;;  %v781_v3 = vsel %vm417_vm2, %v774_v1, -inf }
 0x335   : > { %782 = vmax.xlane.f32.xlu0 %v781_v3  ;;  %v777_v4 = vpop.f32.mrb[14].mxu1 }
 0x336   : > { %v784_v5 = vsel %vm417_vm2, %v777_v4, -inf  ;;  %v1103_v7 = vpop.f32.mrb[15].mxu1 }
 0x337   : > { %785 = vmax.xlane.f32.xlu1 %v784_v5 }
 0x3b2   : > { %v540_v8 = vpop.xlane.xlu0 %539 }
 0x3b3   : > { %v544_v9 = vsub.f32 %v531_v53, %v540_v8 }
 0x3b4   : > { %v543_v10 = vpop.xlane.xlu1 %542 }
 0x3b5   : > { %v546_v11 = vmul.f32 1.442695, %v544_v9  ;;  %v545_v12 = vsub.f32 %v534_v56, %v543_v10 }
 0x3b7   : > { %1164 = vpow2.f32 %v546_v11  ;;  %v548_v13 = vmul.f32 1.442695, %v545_v12 }
 0x3b9   : > { %1166 = vpow2.f32 %v548_v13 }
 0x3ba   : > { %v662_v14 = vpop.xlane.xlu0 %661 }
 0x3bb   : > { %v666_v15 = vsub.f32 %v653_v59, %v662_v14 }
 0x3bd   : > { %v668_v16 = vmul.f32 1.442695, %v666_v15 }
 0x3be   : > { %v665_v17 = vpop.xlane.xlu0 %664 }
 0x3bf   : > { %1168 = vpow2.f32 %v668_v16  ;;  %v667_v18 = vsub.f32 %v656_v62, %v665_v17 }
 0x3c1   : > { %v1165_v19 = vpop.eup %1164  ;;  %v670_v20 = vmul.f32 1.442695, %v667_v18 }
 0x3c2   : > { %v783_v21 = vpop.xlane.xlu0 %782  ;;  %v550_v22 = vsel %vm417_vm2, %v1165_v19, 0.0 }
 0x3c3   : > { %v1167_v23 = vpop.eup %1166  ;;  %1170 = vpow2.f32 %v670_v20  ;;  %v787_v24 = vsub.f32 %v774_v1, %v783_v21  ;;  %551 = vadd.xlane.f32.xlu0 %v550_v22 }
 0x3c4   : > { %v553_v25 = vsel %vm417_vm2, %v1167_v23, 0.0  ;;  %v786_v34 = vpop.xlane.xlu1 %785 }
 0x3c5   : > { %v789_v26 = vmul.f32 1.442695, %v787_v24  ;;  %554 = vadd.xlane.f32.xlu1 %v553_v25  ;;  %v788_v35 = vsub.f32 %v777_v4, %v786_v34 }
 0x3c7   : > { %1172 = vpow2.f32 %v789_v26  ;;  %v791_v36 = vmul.f32 1.442695, %v788_v35 }
 0x3c9   : > { %v1169_v27 = vpop.eup %1168  ;;  %1174 = vpow2.f32 %v791_v36 }
 0x3ca   : > { %v672_v28 = vsel %vm417_vm2, %v1169_v27, 0.0 }
 0x3cb   : > { %673 = vadd.xlane.f32.xlu0 %v672_v28 }
 0x3cd   : > { %v1171_v29 = vpop.eup %1170 }
 0x3ce   : > { %v675_v30 = vsel %vm417_vm2, %v1171_v29, 0.0 }
 0x3cf   : > { %676 = vadd.xlane.f32.xlu1 %v675_v30 }
 0x3d1   : > { %v1173_v31 = vpop.eup %1172 }
 0x3d2   : > { %v793_v33 = vsel %vm417_vm2, %v1173_v31, 0.0 }
 0x3d3   : > { %794 = vadd.xlane.f32.xlu0 %v793_v33  ;;  %v1175_v37 = vpop.eup %1174 }
 0x3d4   : > { %v796_v38 = vsel %vm417_vm2, %v1175_v37, 0.0 }
 0x3e0   : > { %683 = vrot.lane.b32.xlu1 %v1341_v32, %s1232_s29 }
 0x3e9   : > { %562 = vrot.lane.b32.xlu0 %v1341_v32, %s1230_s26 }
 0x404   : > { %797 = vadd.xlane.f32.xlu1 %v796_v38 }
 0x415   : > { %804 = vrot.lane.b32.xlu1 %v1341_v32, %s1231_s27 }
 0x450   : > { %v552_v40 = vpop.xlane.xlu0 %551 }
 0x452   : > { %v555_v39 = vpop.xlane.xlu1 %554 }
 0x453   : > { %1176 = vrcp.f32 %v555_v39 }
 0x454   : > { %1178 = vrcp.f32 %v552_v40 }
 0x458   : > { %v674_v41 = vpop.xlane.xlu0 %673 }
 0x45c   : > { %v677_v42 = vpop.xlane.xlu1 %676 }
 0x45d   : > { %1180 = vrcp.f32 %v677_v42  ;;  %v1177_v43 = vpop.eup %1176 }
 0x45e   : > { %1182 = vrcp.f32 %v674_v41  ;;  %v1179_v45 = vpop.eup %1178  ;;  %v559_v46 = vmul.f32 %v1177_v43, %v1167_v23 }
 0x45f   : > { %v558_v47 = vmul.f32 %v1179_v45, %v1165_v19 }
 0x460   : > { %v795_v44 = vpop.xlane.xlu0 %794  ;;  %v684_v32 = vpop.permute.xlu1 %683 }
 0x461   : > { %v560_v50 = vpack.c.bf16 %v559_v46, %v558_v47  ;;  %1184 = vrcp.f32 %v795_v44 }
 0x464   : > { %v563_v48 = vpop.permute.xlu0 %562 }
 0x465   : > { %1081 = vmatpush3.bf16.msra.mxu0 %v563_v48 }
 0x466   : > { %1092 = vmatprep.subr.bf16.mxu0 %v1228_v6 }
 0x467   : > { %v1181_v52 = vpop.eup %1180 }
 0x468   : > { %1083 = vmatmul.mubr.msk.bf16.vlgmr.msra.gmra.mrb[4].mxu0 %vm417_vm2, %v560_v50  ;;  %v1183_v53 = vpop.eup %1182  ;;  %v681_v54 = vmul.f32 %v1181_v52, %v1171_v29 }
 0x469   : > { %1093 = vmatpush3.bf16.msra.mxu0 %v684_v32  ;;  %1094 = vmatprep.mubr.msk.bf16.mxu0 %vm1229_vm0, %v1228_v6  ;;  %v680_v55 = vmul.f32 %v1183_v53, %v1169_v27 }
 0x46a   : > { %1104 = vmatprep.subr.bf16.mxu0 %v1228_v6 }
 0x46b   : > { %v682_v56 = vpack.c.bf16 %v681_v54, %v680_v55  ;;  %v1185_v59 = vpop.eup %1184 }
 0x46c   : > { %v801_v61 = vmul.f32 %v1185_v59, %v1173_v31 }
 0x470   : > { %1095 = vmatmul.mubr.msk.bf16.vlgmr.msra.gmra.mrb[8].mxu0 %vm417_vm2, %v682_v56 }
 0x471   : > { %1106 = vmatprep.mubr.msk.bf16.mxu0 %vm1229_vm0, %v1228_v6 }
 0x491   : > { %v798_v57 = vpop.xlane.xlu1 %797 }
 0x492   : > { %1186 = vrcp.f32 %v798_v57 }
 0x495   : > { %v805_v58 = vpop.permute.xlu1 %804 }
 0x496   : > { %1105 = vmatpush3.bf16.msra.mxu0 %v805_v58 }
 0x49c   : > { %v1187_v60 = vpop.eup %1186 }
 0x49d   : > { %v802_v62 = vmul.f32 %v1187_v60, %v1175_v37 }
 0x49f   : > { %v803_v63 = vpack.c.bf16 %v802_v62, %v801_v61 }
 0x4a1   : > { %1107 = vmatmul.mubr.msk.bf16.vlgmr.msra.gmra.mrb[12].mxu0 %vm417_vm2, %v803_v63 }
 0x53b   : > { %v602_v0 = vpop.f32.mrb[4].mxu0 }
 0x53c   : > { %853 = vrot.lane.b32.xlu1 %v602_v0, %s1231_s27  ;;  %v1084_v1 = vpop.f32.mrb[5].mxu0 }
 0x53d   : > { %v605_v2 = vpop.f32.mrb[6].mxu0 }
 0x53e   : > { %855 = vrot.lane.b32.xlu0 %v605_v2, %s1231_s27  ;;  %v1085_v6 = vpop.f32.mrb[7].mxu0 }
 0x543   : > { %v723_v3 = vpop.f32.mrb[8].mxu0 }
 0x544   : > { %861 = vrot.lane.b32.xlu1 %v723_v3, %s1232_s29  ;;  %v1096_v4 = vpop.f32.mrb[9].mxu0 }
 0x545   : > { %v726_v5 = vpop.f32.mrb[10].mxu0 }
 0x546   : > { %863 = vrot.lane.b32.xlu0 %v726_v5, %s1232_s29  ;;  %v1097_v7 = vpop.f32.mrb[11].mxu0 }
 0x574   : > { %v844_v8 = vpop.f32.mrb[12].mxu0 }
 0x575   : > { %869 = vrot.lane.b32.xlu1 %v844_v8, %s1230_s26  ;;  %v1108_v9 = vpop.f32.mrb[13].mxu0 }
 0x576   : > { %v847_v10 = vpop.f32.mrb[14].mxu0 }
 0x577   : > { %871 = vrot.lane.b32.xlu0 %v847_v10, %s1230_s26  ;;  %v1109_v11 = vpop.f32.mrb[15].mxu0 }
 0x5ae   : > { %v854_v12 = vpop.permute.xlu1 %853 }
 0x5af   : > { %v875_v16 = vsel %vm369_vm1, %v1364_v49, %v854_v12 }
 0x5b0   : > { %v856_v13 = vpop.permute.xlu0 %855 }
 0x5b1   : > { %v876_v19 = vsel %vm369_vm1, %v1366_v51, %v856_v13 }
 0x5b6   : > { %v862_v14 = vpop.permute.xlu1 %861 }
 0x5b7   : > { %v878_v17 = vsel %vm877_vm3, %v875_v16, %v862_v14 }
 0x5b8   : > { %v864_v15 = vpop.permute.xlu0 %863 }
 0x5b9   : > { %v879_v21 = vsel %vm877_vm3, %v876_v19, %v864_v15 }
 0x5e7   : > { %v870_v18 = vpop.permute.xlu1 %869 }
 0x5e8   : > { %v881_v20 = vsel %vm880_vm4, %v878_v17, %v870_v18 }
 0x5e9   : > { %883 = vst [vmem:[%s357_s6] sm:$0xff] %v881_v20  ;;  %v872_v22 = vpop.permute.xlu0 %871 }
 0x5ea   : > { %v882_v23 = vsel %vm880_vm4, %v879_v21, %v872_v22 }
 0x5eb   : > { %884 = vst [vmem:[%s357_s6 + $0x8] sm:$0xff] %v882_v23 }
 0x5ec PF: > { %s13_s16 = sadd.s32 1, %s1226_s16   ;;  %s1430_s12 = smov %s1214_s13 }
 0x5ed   : > { %p10_p10 = scmp.ge.s32.totalorder %s13_s16, 4   ;;  %s1431_s13 = smov %s1292_s21 }
 0x5ee   : > { %s1432_s14 = smov %s1222_s15  ;;  %s1433_s15 = smov %s1435_s17 }
 0x5ef   :  { %12 = sbr.rel (!%p10_p10) target bundleno = 3 (0x3), region = 197 }

// kernel: transformer_forward.37
= control target key start
LH: loop header
LB: loop body
LE: loop exit
PB: predicated region body
PF: predicated region fallthrough
CT: control target
= control target key end

     0   :  { %v307_v1 = vmov 0   ;;  %v219_v23 = vlaneseq  ;;  %s415_s1 = inlined_call_operand.vmem [shape: bf16[128,256], index: 1, kind: input, shape index: {}]   ;;  %s416_s0 = inlined_call_operand.vmem [shape: f32[32,128], index: 0, kind: input, shape index: {}]   ;;  %s417_s2 = inlined_call_operand.vmem [shape: f32[1,256], index: 2, kind: input, shape index: {}]   ;;  %s418_s3 = inlined_call_operand.vmem [shape: f32[32,256], index: 3, kind: output, shape index: {}]  }
   0x1   :  { %v283_v0 = vld [vmem:[%s415_s1 + $0x4] ss:$8 sps:$4 sm:$0xff]   ;;  %169 = vmatprep.mubr.bf16.mxu0 %v307_v1  ;;  %179 = vmatprep.mubr.bf16.mxu1 %v307_v1  ;;  %v285_v2 = vld [vmem:[%s415_s1] ss:$8 sps:$4 sm:$0xff]   ;;  %v286_v3 = vld [vmem:[%s415_s1 + $0x14] ss:$8 sps:$4 sm:$0xff]  }
   0x2   :  { %137 = vmatprep.subr.bf16.mxu0 %v283_v0  ;;  %265 = vmatprep.subr.bf16.mxu1 %v283_v0  ;;  %v288_v4 = vld [vmem:[%s415_s1 + $0x10] ss:$8 sps:$4 sm:$0xff]   ;;  %v289_v5 = vld [vmem:[%s415_s1 + $0x24] ss:$8 sps:$4 sm:$0xff]   ;;  %v291_v6 = vld [vmem:[%s415_s1 + $0x20] ss:$8 sps:$4 sm:$0xff]  }
   0x3   :  { %138 = vmatpush1.bf16.msra.mxu0 %v285_v2  ;;  %273 = vmatpush1.bf16.msra.mxu1 %v285_v2  ;;  %v292_v7 = vld [vmem:[%s415_s1 + $0x34] ss:$8 sps:$4 sm:$0xff]   ;;  %v294_v8 = vld [vmem:[%s415_s1 + $0x30] ss:$8 sps:$4 sm:$0xff]   ;;  %v295_v9 = vld [vmem:[%s415_s1 + $0x44] ss:$8 sps:$4 sm:$0xff]  }
   0x4   :  { %139 = vmatprep.subr.bf16.mxu0 %v286_v3  ;;  %266 = vmatprep.subr.bf16.mxu1 %v286_v3  ;;  %v297_v10 = vld [vmem:[%s415_s1 + $0x40] ss:$8 sps:$4 sm:$0xff]   ;;  %v298_v11 = vld [vmem:[%s415_s1 + $0x54] ss:$8 sps:$4 sm:$0xff]   ;;  %v300_v12 = vld [vmem:[%s415_s1 + $0x50] ss:$8 sps:$4 sm:$0xff]  }
   0x5   :  { %v301_v13 = vld [vmem:[%s415_s1 + $0x64] ss:$8 sps:$4 sm:$0xff]   ;;  %v303_v14 = vld [vmem:[%s415_s1 + $0x60] ss:$8 sps:$4 sm:$0xff]   ;;  %v304_v15 = vld [vmem:[%s415_s1 + $0x74] ss:$8 sps:$4 sm:$0xff]  }
   0x6   :  { %v306_v16 = vld [vmem:[%s415_s1 + $0x70] ss:$8 sps:$4 sm:$0xff]   ;;  %v35_v17 = vld [vmem:[%s416_s0] sm:$0xff]  ;;  %v36_v18 = vld [vmem:[%s416_s0 + $0x8] sm:$0xff]  ;;  %v220_v24 = vshrl.u32 %v219_v23, 7 }
   0x7   :  { %140 = vmatpush1.bf16.msra.mxu0 %v288_v4  ;;  %274 = vmatpush1.bf16.msra.mxu1 %v288_v4  ;;  %v37_v19 = vld [vmem:[%s416_s0 + $0x10] sm:$0xff]  ;;  %v38_v20 = vld [vmem:[%s416_s0 + $0x18] sm:$0xff]  ;;  %v39_v21 = vpack.c.bf16 %v36_v18, %v35_v17  ;;  %v217_v26 = vld [vmem:[%s417_s2] sm:$0x3] }
   0x8   :  { %141 = vmatprep.subr.bf16.mxu0 %v289_v5  ;;  %267 = vmatprep.subr.bf16.mxu1 %v289_v5  ;;  %v40_v22 = vpack.c.bf16 %v38_v20, %v37_v19  ;;  %v221_v25 = vsub.s32 0, %v220_v24  ;;  %v225_v27 = vsub.s32 1, %v220_v24 }
   0xa   :  { %v222_v28 = vrot.slane %v217_v26, %v221_v25  ;;  %v226_v31 = vrot.slane %v217_v26, %v225_v27 }
   0xb   :  { %142 = vmatpush1.bf16.msra.mxu0 %v291_v6  ;;  %275 = vmatpush1.bf16.msra.mxu1 %v291_v6 }
   0xc   :  { %143 = vmatprep.subr.bf16.mxu0 %v292_v7  ;;  %268 = vmatprep.subr.bf16.mxu1 %v292_v7 }
   0xf   :  { %144 = vmatpush1.bf16.msra.mxu0 %v294_v8  ;;  %276 = vmatpush1.bf16.msra.mxu1 %v294_v8 }
  0x10   :  { %145 = vmatprep.subr.bf16.mxu0 %v295_v9  ;;  %269 = vmatprep.subr.bf16.mxu1 %v295_v9 }
  0x13   :  { %146 = vmatpush1.bf16.msra.mxu0 %v297_v10  ;;  %277 = vmatpush1.bf16.msra.mxu1 %v297_v10 }
  0x14   :  { %147 = vmatprep.subr.bf16.mxu0 %v298_v11  ;;  %270 = vmatprep.subr.bf16.mxu1 %v298_v11 }
  0x17   :  { %148 = vmatpush1.bf16.msra.mxu0 %v300_v12  ;;  %278 = vmatpush1.bf16.msra.mxu1 %v300_v12 }
  0x18   :  { %149 = vmatprep.subr.bf16.mxu0 %v301_v13  ;;  %271 = vmatprep.subr.bf16.mxu1 %v301_v13 }
  0x1b   :  { %150 = vmatpush1.bf16.msra.mxu0 %v303_v14  ;;  %279 = vmatpush1.bf16.msra.mxu1 %v303_v14 }
  0x1c   :  { %151 = vmatprep.subr.bf16.mxu0 %v304_v15  ;;  %272 = vmatprep.subr.bf16.mxu1 %v304_v15 }
  0x1f   :  { %152 = vmatpush1.bf16.msra.mxu0 %v306_v16  ;;  %280 = vmatpush1.bf16.msra.mxu1 %v306_v16 }
  0x22   :  { %170 = vmatmul.mubr.bf16.vlgmr.msra.gmra.mrb[0].mxu0 %v39_v21  ;;  %180 = vmatmul.mubr.bf16.vlgmr.msra.gmra.mrb[0].mxu1 %v40_v22 }
  0xf5   :  { %v171_v29 = vpop.f32.mrb[0].mxu0  ;;  %v181_v30 = vpop.f32.mrb[0].mxu1 }
  0xf6   :  { %v173_v32 = vpop.f32.mrb[1].mxu0  ;;  %v183_v33 = vpop.f32.mrb[1].mxu1  ;;  %v229_v36 = vadd.f32 %v222_v28, %v171_v29  ;;  %v233_v37 = vadd.f32 %v222_v28, %v181_v30 }
  0xf7   :  { %v175_v34 = vpop.f32.mrb[2].mxu0  ;;  %v185_v35 = vpop.f32.mrb[2].mxu1  ;;  %v230_v40 = vadd.f32 %v226_v31, %v173_v32  ;;  %v234_v41 = vadd.f32 %v226_v31, %v183_v33 }
  0xf8   :  { %v177_v38 = vpop.f32.mrb[3].mxu0  ;;  %v187_v39 = vpop.f32.mrb[3].mxu1  ;;  %237 = vst [vmem:[%s418_s3] sm:$0xff] %v229_v36  ;;  %241 = vst [vmem:[%s418_s3 + $0x20] sm:$0xff] %v233_v37  ;;  %v231_v42 = vadd.f32 %v222_v28, %v175_v34  ;;  %v235_v43 = vadd.f32 %v222_v28, %v185_v35 }
  0xf9   :  { %238 = vst [vmem:[%s418_s3 + $0x8] sm:$0xff] %v230_v40  ;;  %242 = vst [vmem:[%s418_s3 + $0x28] sm:$0xff] %v234_v41  ;;  %v232_v44 = vadd.f32 %v226_v31, %v177_v38  ;;  %v236_v45 = vadd.f32 %v226_v31, %v187_v39 }
  0xfa   :  { %239 = vst [vmem:[%s418_s3 + $0x10] sm:$0xff] %v231_v42  ;;  %243 = vst [vmem:[%s418_s3 + $0x30] sm:$0xff] %v235_v43 }
  0xfb   :  { %240 = vst [vmem:[%s418_s3 + $0x18] sm:$0xff] %v232_v44  ;;  %244 = vst [vmem:[%s418_s3 + $0x38] sm:$0xff] %v236_v45 }

// kernel: transformer_forward.28
= control target key start
LH: loop header
LB: loop body
LE: loop exit
PB: predicated region body
PF: predicated region fallthrough
CT: control target
= control target key end

     0   :  { %v617_v1 = vmov 0   ;;  %v59_v39 = vlaneseq  ;;  %s806_s1 = inlined_call_operand.vmem [shape: bf16[128,256], index: 1, kind: input, shape index: {}]   ;;  %s807_s3 = inlined_call_operand.vmem [shape: bf16[256,128], index: 3, kind: input, shape index: {}]   ;;  %s808_s0 = inlined_call_operand.vmem [shape: f32[32,128], index: 0, kind: input, shape index: {}]   ;;  %s809_s2 = inlined_call_operand.vmem [shape: f32[1,256], index: 2, kind: input, shape index: {}]   ;;  %s810_s4 = inlined_call_operand.vmem [shape: f32[1,128], index: 4, kind: input, shape index: {}]   ;;  %s811_s5 = inlined_call_operand.vmem [shape: f32[1,128], index: 5, kind: input, shape index: {}]   ;;  %s812_s6 = inlined_call_operand.vmem [shape: f32[1,128], index: 6, kind: input, shape index: {}]   ;;  %s813_s7 = inlined_call_operand.vmem [shape: f32[32,128], index: 7, kind: output, shape index: {}]  }
   0x1   :  { %v569_v0 = vld [vmem:[%s806_s1 + $0x4] ss:$8 sps:$4 sm:$0xff]   ;;  %181 = vmatprep.mubr.bf16.mxu0 %v617_v1  ;;  %v571_v2 = vld [vmem:[%s806_s1] ss:$8 sps:$4 sm:$0xff]   ;;  %v572_v3 = vld [vmem:[%s806_s1 + $0x14] ss:$8 sps:$4 sm:$0xff]  }
   0x2   :  { %149 = vmatprep.subr.bf16.mxu0 %v569_v0  ;;  %v574_v4 = vld [vmem:[%s806_s1 + $0x10] ss:$8 sps:$4 sm:$0xff]   ;;  %v575_v5 = vld [vmem:[%s806_s1 + $0x24] ss:$8 sps:$4 sm:$0xff]   ;;  %v577_v6 = vld [vmem:[%s806_s1 + $0x20] ss:$8 sps:$4 sm:$0xff]  }
   0x3   :  { %150 = vmatpush1.bf16.msra.mxu0 %v571_v2  ;;  %v578_v7 = vld [vmem:[%s806_s1 + $0x34] ss:$8 sps:$4 sm:$0xff]   ;;  %v580_v8 = vld [vmem:[%s806_s1 + $0x30] ss:$8 sps:$4 sm:$0xff]   ;;  %v581_v9 = vld [vmem:[%s806_s1 + $0x44] ss:$8 sps:$4 sm:$0xff]  }
   0x4   :  { %151 = vmatprep.subr.bf16.mxu0 %v572_v3  ;;  %v593_v10 = vld [vmem:[%s807_s3 + $0x40] sm:$0xff]   ;;  %v584_v13 = vld [vmem:[%s806_s1 + $0x54] ss:$8 sps:$4 sm:$0xff]   ;;  %v595_v14 = vld [vmem:[%s807_s3 + $0x48] sm:$0xff]   ;;  %v60_v40 = vshrl.u32 %v59_v39, 7 }
   0x5   :  { %v583_v11 = vld [vmem:[%s806_s1 + $0x40] ss:$8 sps:$4 sm:$0xff]   ;;  %539 = vmatprep.subr.bf16.mxu1 %v593_v10  ;;  %v597_v16 = vld [vmem:[%s807_s3 + $0x50] sm:$0xff]   ;;  %v587_v18 = vld [vmem:[%s806_s1 + $0x64] ss:$8 sps:$4 sm:$0xff]  }
   0x6   :  { %v594_v12 = vld [vmem:[%s807_s3] sm:$0xff]   ;;  %v596_v15 = vld [vmem:[%s807_s3 + $0x8] sm:$0xff]   ;;  %v586_v17 = vld [vmem:[%s806_s1 + $0x50] ss:$8 sps:$4 sm:$0xff]   ;;  %v61_v41 = vsub.s32 0, %v60_v40  ;;  %v65_v43 = vsub.s32 1, %v60_v40 }
   0x7   :  { %152 = vmatpush1.bf16.msra.mxu0 %v574_v4  ;;  %540 = vmatpush3.bf16.msra.mxu1 %v594_v12  ;;  %v598_v19 = vld [vmem:[%s807_s3 + $0x10] sm:$0xff]   ;;  %v599_v20 = vld [vmem:[%s807_s3 + $0x58] sm:$0xff]   ;;  %v589_v21 = vld [vmem:[%s806_s1 + $0x60] ss:$8 sps:$4 sm:$0xff]  }
   0x8   :  { %153 = vmatprep.subr.bf16.mxu0 %v575_v5  ;;  %541 = vmatprep.subr.bf16.mxu1 %v595_v14  ;;  %v590_v22 = vld [vmem:[%s806_s1 + $0x74] ss:$8 sps:$4 sm:$0xff]   ;;  %v601_v24 = vld [vmem:[%s807_s3 + $0x60] sm:$0xff]   ;;  %v592_v25 = vld [vmem:[%s806_s1 + $0x70] ss:$8 sps:$4 sm:$0xff]  }
   0x9   :  { %v600_v23 = vld [vmem:[%s807_s3 + $0x18] sm:$0xff]   ;;  %v736_v26 = vld [vmem:[%s808_s0] sm:$0xff]  ;;  %v741_v27 = vld [vmem:[%s808_s0 + $0x8] sm:$0xff] }
   0xa   :  { %v602_v28 = vld [vmem:[%s807_s3 + $0x20] sm:$0xff]   ;;  %v603_v29 = vld [vmem:[%s807_s3 + $0x68] sm:$0xff]   ;;  %v39_v30 = vpack.c.bf16 %v741_v27, %v736_v26  ;;  %v754_v31 = vld [vmem:[%s808_s0 + $0x10] sm:$0xff] }
   0xb   :  { %154 = vmatpush1.bf16.msra.mxu0 %v577_v6  ;;  %542 = vmatpush3.bf16.msra.mxu1 %v596_v15  ;;  %v759_v32 = vld [vmem:[%s808_s0 + $0x18] sm:$0xff]  ;;  %v604_v34 = vld [vmem:[%s807_s3 + $0x28] sm:$0xff]   ;;  %v605_v35 = vld [vmem:[%s807_s3 + $0x70] sm:$0xff]  }
   0xc   :  { %155 = vmatprep.subr.bf16.mxu0 %v578_v7  ;;  %543 = vmatprep.subr.bf16.mxu1 %v597_v16  ;;  %v40_v33 = vpack.c.bf16 %v759_v32, %v754_v31  ;;  %v606_v36 = vld [vmem:[%s807_s3 + $0x30] sm:$0xff]   ;;  %v607_v37 = vld [vmem:[%s807_s3 + $0x78] sm:$0xff]   ;;  %v57_v42 = vld [vmem:[%s809_s2] sm:$0x3] }
   0xd   :  { %v608_v38 = vld [vmem:[%s807_s3 + $0x38] sm:$0xff]   ;;  %v62_v44 = vrot.slane %v57_v42, %v61_v41  ;;  %v66_v45 = vrot.slane %v57_v42, %v65_v43  ;;  %v536_v15 = vld [vmem:[%s810_s4] ss:$0 sm:$0xff] }
   0xf   :  { %156 = vmatpush1.bf16.msra.mxu0 %v580_v8  ;;  %544 = vmatpush3.bf16.msra.mxu1 %v598_v19 }
  0x10   :  { %157 = vmatprep.subr.bf16.mxu0 %v581_v9  ;;  %545 = vmatprep.subr.bf16.mxu1 %v599_v20 }
  0x13   :  { %158 = vmatpush1.bf16.msra.mxu0 %v583_v11  ;;  %546 = vmatpush3.bf16.msra.mxu1 %v600_v23 }
  0x14   :  { %159 = vmatprep.subr.bf16.mxu0 %v584_v13  ;;  %547 = vmatprep.subr.bf16.mxu1 %v601_v24 }
  0x17   :  { %160 = vmatpush1.bf16.msra.mxu0 %v586_v17  ;;  %548 = vmatpush3.bf16.msra.mxu1 %v602_v28 }
  0x18   :  { %161 = vmatprep.subr.bf16.mxu0 %v587_v18  ;;  %549 = vmatprep.subr.bf16.mxu1 %v603_v29 }
  0x1b   :  { %162 = vmatpush1.bf16.msra.mxu0 %v589_v21  ;;  %550 = vmatpush3.bf16.msra.mxu1 %v604_v34 }
  0x1c   :  { %163 = vmatprep.subr.bf16.mxu0 %v590_v22  ;;  %551 = vmatprep.subr.bf16.mxu1 %v605_v35 }
  0x1f   :  { %164 = vmatpush1.bf16.msra.mxu0 %v592_v25  ;;  %552 = vmatpush3.bf16.msra.mxu1 %v606_v36 }
  0x20   :  { %553 = vmatprep.subr.bf16.mxu1 %v607_v37 }
  0x22   :  { %182 = vmatmul.mubr.bf16.vlgmr.msra.gmra.mrb[0].mxu0 %v39_v30 }
  0x23   :  { %191 = vmatprep.mubr.bf16.mxu0 %v617_v1  ;;  %554 = vmatpush3.bf16.msra.mxu1 %v608_v38 }
  0x2a   :  { %192 = vmatmul.mubr.bf16.gmra.mrb[4].mxu0 %v40_v33 }
  0xf5   :  { %v183_v46 = vpop.f32.mrb[0].mxu0 }
  0xf6   :  { %v184_v47 = vadd.f32 %v183_v46, %v62_v44  ;;  %v185_v48 = vpop.f32.mrb[1].mxu0 }
  0xf7   :  { %v186_v49 = vadd.f32 %v185_v48, %v66_v45  ;;  %v187_v50 = vpop.f32.mrb[2].mxu0 }
  0xf8   :  { %v188_v51 = vadd.f32 %v187_v50, %v62_v44  ;;  %v189_v52 = vpop.f32.mrb[3].mxu0  ;;  %v202_v54 = vmax.f32 %v184_v47, 0.0 }
  0xf9   :  { %v190_v53 = vadd.f32 %v189_v52, %v66_v45  ;;  %v203_v56 = vmax.f32 %v186_v49, 0.0 }
  0xfa   :  { %v204_v55 = vmax.f32 %v188_v51, 0.0 }
  0xfb   :  { %v205_v57 = vmax.f32 %v190_v53, 0.0 }
  0xfc   :  { %v214_v58 = vpack.c.bf16 %v204_v55, %v202_v54 }
  0xfd   :  { %v193_v59 = vpop.f32.mrb[4].mxu0  ;;  %v215_v60 = vpack.c.bf16 %v205_v57, %v203_v56 }
  0xfe   :  { %v194_v61 = vadd.f32 %v193_v59, %v62_v44  ;;  %v195_v62 = vpop.f32.mrb[5].mxu0  ;;  %v537_v59 = vld [vmem:[%s811_s5] ss:$0 sm:$0xff] }
  0xff   :  { %v196_v63 = vadd.f32 %v195_v62, %v66_v45  ;;  %v197_v0 = vpop.f32.mrb[6].mxu0  ;;  %378 = vmatprep.mubr.bf16.mxu1 %v215_v60  ;;  %v538_v62 = vld [vmem:[%s812_s6] ss:$0 sm:$0xff] }
 0x100   :  { %v198_v1 = vadd.f32 %v197_v0, %v62_v44  ;;  %v199_v2 = vpop.f32.mrb[7].mxu0  ;;  %379 = vmatmul.mubr.bf16.vlgmr.msra.gmra.mrb[0].mxu1 %v214_v58  ;;  %v206_v4 = vmax.f32 %v194_v61, 0.0 }
 0x101   :  { %v200_v3 = vadd.f32 %v199_v2, %v66_v45  ;;  %v207_v6 = vmax.f32 %v196_v63, 0.0 }
 0x102   :  { %v208_v5 = vmax.f32 %v198_v1, 0.0 }
 0x103   :  { %v209_v7 = vmax.f32 %v200_v3, 0.0 }
 0x104   :  { %v216_v8 = vpack.c.bf16 %v208_v5, %v206_v4 }
 0x105   :  { %v217_v9 = vpack.c.bf16 %v209_v7, %v207_v6 }
 0x107   :  { %386 = vmatprep.mubr.bf16.mxu1 %v217_v9 }
 0x108   :  { %387 = vmatmul.mubr.bf16.gmra.mrb[4].mxu1 %v216_v8 }
 0x1d3   :  { %v555_v10 = vpop.f32.mrb[0].mxu1 }
 0x1d4   :  { %v556_v11 = vpop.f32.mrb[1].mxu1 }
 0x1d5   :  { %v557_v12 = vadd.f32 %v556_v11, %v555_v10  ;;  %v558_v13 = vpop.f32.mrb[2].mxu1 }
 0x1d6   :  { %v559_v14 = vpop.f32.mrb[3].mxu1 }
 0x1d7   :  { %v560_v16 = vadd.f32 %v559_v14, %v558_v13  ;;  %v417_v17 = vadd.f32 %v557_v12, %v536_v15 }
 0x1d9   :  { %v425_v19 = vadd.f32 %v417_v17, %v736_v26  ;;  %v418_v20 = vadd.f32 %v560_v16, %v536_v15 }
 0x1db   :  { %v561_v18 = vpop.f32.mrb[4].mxu1  ;;  %429 = vadd.xlane.f32.xlu0 %v425_v19  ;;  %v426_v28 = vadd.f32 %v418_v20, %v741_v27 }
 0x1dc   :  { %v562_v21 = vpop.f32.mrb[5].mxu1 }
 0x1dd   :  { %v563_v22 = vadd.f32 %v562_v21, %v561_v18  ;;  %v564_v23 = vpop.f32.mrb[6].mxu1 }
 0x1de   :  { %v565_v24 = vpop.f32.mrb[7].mxu1 }
 0x1df   :  { %v566_v25 = vadd.f32 %v565_v24, %v564_v23  ;;  %431 = vadd.xlane.f32.xlu0 %v426_v28  ;;  %v419_v29 = vadd.f32 %v563_v22, %v536_v15 }
 0x1e1   :  { %v427_v30 = vadd.f32 %v419_v29, %v754_v31  ;;  %v420_v33 = vadd.f32 %v566_v25, %v536_v15 }
 0x1e3   :  { %433 = vadd.xlane.f32.xlu1 %v427_v30  ;;  %v428_v34 = vadd.f32 %v420_v33, %v759_v32 }
 0x1e7   :  { %435 = vadd.xlane.f32.xlu1 %v428_v34 }
 0x268   :  { %v430_v35 = vpop.xlane.xlu0 %429 }
 0x269   :  { %v438_v26 = vmul.f32 0.0078125, %v430_v35 }
 0x26b   :  { %v442_v36 = vsub.f32 %v425_v19, %v438_v26 }
 0x26c   :  { %v432_v37 = vpop.xlane.xlu0 %431 }
 0x26d   :  { %v439_v38 = vmul.f32 0.0078125, %v432_v37  ;;  %v446_v39 = vmul.f32 %v442_v36, %v442_v36 }
 0x26f   :  { %v443_v40 = vsub.f32 %v426_v28, %v439_v38  ;;  %450 = vadd.xlane.f32.xlu0 %v446_v39 }
 0x270   :  { %v434_v41 = vpop.xlane.xlu1 %433 }
 0x271   :  { %v440_v42 = vmul.f32 0.0078125, %v434_v41  ;;  %v447_v27 = vmul.f32 %v443_v40, %v443_v40 }
 0x273   :  { %v444_v43 = vsub.f32 %v427_v30, %v440_v42  ;;  %452 = vadd.xlane.f32.xlu1 %v447_v27 }
 0x274   :  { %v436_v44 = vpop.xlane.xlu1 %435 }
 0x275   :  { %v441_v31 = vmul.f32 0.0078125, %v436_v44  ;;  %v448_v45 = vmul.f32 %v444_v43, %v444_v43 }
 0x277   :  { %v445_v46 = vsub.f32 %v428_v34, %v441_v31  ;;  %454 = vadd.xlane.f32.xlu0 %v448_v45 }
 0x279   :  { %v449_v32 = vmul.f32 %v445_v46, %v445_v46 }
 0x27b   :  { %456 = vadd.xlane.f32.xlu1 %v449_v32 }
 0x2fc   :  { %v451_v47 = vpop.xlane.xlu0 %450 }
 0x2fd   :  { %v458_v48 = vmul.f32 0.0078125, %v451_v47 }
 0x2ff   :  { %v462_v49 = vadd.f32 1e-05, %v458_v48 }
 0x300   :  { %v453_v50 = vpop.xlane.xlu1 %452 }
 0x301   :  { %609 = vrsqrt.f32 %v462_v49  ;;  %v459_v51 = vmul.f32 0.0078125, %v453_v50 }
 0x303   :  { %v463_v52 = vadd.f32 1e-05, %v459_v51 }
 0x304   :  { %v455_v53 = vpop.xlane.xlu0 %454 }
 0x305   :  { %611 = vrsqrt.f32 %v463_v52  ;;  %v460_v54 = vmul.f32 0.0078125, %v455_v53 }
 0x307   :  { %v464_v55 = vadd.f32 1e-05, %v460_v54 }
 0x308   :  { %v457_v56 = vpop.xlane.xlu1 %456 }
 0x309   :  { %613 = vrsqrt.f32 %v464_v55  ;;  %v461_v57 = vmul.f32 0.0078125, %v457_v56 }
 0x30b   :  { %v610_v58 = vpop.eup %609  ;;  %v465_v60 = vadd.f32 1e-05, %v461_v57 }
 0x30c   :  { %v470_v61 = vmul.f32 %v610_v58, %v442_v36 }
 0x30d   :  { %615 = vrsqrt.f32 %v465_v60 }
 0x30e   :  { %v481_v63 = vmul.f32 %v537_v59, %v470_v61 }
 0x30f   :  { %v612_v0 = vpop.eup %611 }
 0x310   :  { %v492_v1 = vadd.f32 %v538_v62, %v481_v63  ;;  %v471_v2 = vmul.f32 %v612_v0, %v443_v40 }
 0x312   :  { %496 = vst [vmem:[%s813_s7] sm:$0xff] %v492_v1  ;;  %v482_v3 = vmul.f32 %v537_v59, %v471_v2 }
 0x313   :  { %v614_v4 = vpop.eup %613 }
 0x314   :  { %v493_v5 = vadd.f32 %v538_v62, %v482_v3  ;;  %v472_v6 = vmul.f32 %v614_v4, %v444_v43 }
 0x316   :  { %497 = vst [vmem:[%s813_s7 + $0x8] sm:$0xff] %v493_v5  ;;  %v483_v7 = vmul.f32 %v537_v59, %v472_v6 }
 0x317   :  { %v616_v8 = vpop.eup %615 }
 0x318   :  { %v494_v9 = vadd.f32 %v538_v62, %v483_v7  ;;  %v473_v10 = vmul.f32 %v616_v8, %v445_v46 }
 0x31a   :  { %498 = vst [vmem:[%s813_s7 + $0x10] sm:$0xff] %v494_v9  ;;  %v484_v11 = vmul.f32 %v537_v59, %v473_v10 }
 0x31c   :  { %v495_v12 = vadd.f32 %v538_v62, %v484_v11 }
 0x31e   :  { %499 = vst [vmem:[%s813_s7 + $0x18] sm:$0xff] %v495_v12 }

// kernel: transformer_forward.38
= control target key start
LH: loop header
LB: loop body
LE: loop exit
PB: predicated region body
PF: predicated region fallthrough
CT: control target
= control target key end

     0   :  { %s1219_s12 = smov 0   ;;  %s1221_s13 = smov 0   ;;  %s1393_s0 = inlined_call_operand.vmem [shape: f32[2,16,128], index: 0, kind: input, shape index: {}]   ;;  %s1394_s1 = inlined_call_operand.vmem [shape: f32[2,16,256], index: 1, kind: input, shape index: {}, may-alias: {1,2}]   ;;  %s1395_s2 = inlined_call_operand.vmem [shape: f32[2,16,256], index: 2, kind: input, shape index: {}, may-alias: {1,2}]   ;;  %s1396_s3 = inlined_call_operand.vmem [shape: f32[2,16,128], index: 3, kind: output, shape index: {}]  }
   0x1   :  { %s1223_s14 = smov 0   ;;  %s1225_s15 = smov 0  }
   0x2   :  { %s1227_s16 = smov 0  }
   0x3 LB: > { %s25_s17 = sadd.s32 1, %s1188_s15  ;;  %p67_p1 = scmp.ne.s32.totalorder %s1180_s13, %s1176_s12  ;;  %s1192_s16 = sphi %s1227_s16, %s13_s16   ;;  %s1188_s15 = sphi %s1225_s15, %s1401_s15   ;;  %s1184_s14 = sphi %s1223_s14, %s1400_s14   ;;  %s1180_s13 = sphi %s1221_s13, %s1399_s13   ;;  %s1176_s12 = sphi %s1219_s12, %s1398_s12  }
   0x4   : > { %p27_p0 = scmp.ge.s32.totalorder %s25_s17, 2  ;;  %p68_p2 = scmp.eq.s32.totalorder %s1192_s16, 0 }
   0x5   : > { %s60_s20 = sadd.s32 1, %s1180_s13  ;;  %p983_p5 = scmp.ge.s32.totalorder %s1192_s16, 2 }
   0x6   : > { %s1403_s17 = smov (%p27_p0, %s25_s17), 0  ;;  %p1250_p3 = por %p68_p2, %p67_p1 }
   0x7   : > { %s57_s19 = ssub.s32 %s1188_s15, %s1403_s17  ;;  %147 = sbr.rel (%p983_p5) target bundleno = 28 (0x1c), region = 16 }
   0x8   : > { %p58_p4 = scmp.eq.s32.totalorder %s57_s19, 0 }
   0xa   : > { %s1258_s21 = scalar_select %p58_p4, %s1180_s13, %s60_s20  }
   0xe   : > { %163 = sbr.rel (!%p1250_p3) target bundleno = 21 (0x15), region = 24  ;;  %s165_s22 = sand.u32 (%p1250_p3), 1, %s1180_s13  }
   0xf   : > { %s1009_s23 = sshll.u32 (%p1250_p3), %s1188_s15, 5  ;;  %s984_s24 = sshll.u32 (%p1250_p3), %s165_s22, 4 }
  0x10   : > { %s170_s27 = scalar_lea.vmem (%p1250_p3), %s1394_s1, %s1009_s23  ;;  %s167_s28 = scalar_lea.vmem (%p1250_p3), [#allocation2], %s984_s24 }
  0x11   : > { %v200_v0 = vld [vmem:[%s170_s27] sm:$0xff] (%p1250_p3)  ;;  %v202_v1 = vld [vmem:[%s170_s27 + $0x10] sm:$0xff] (%p1250_p3) }
  0x12   : > { %201 = vst [vmem:[%s167_s28] sm:$0xff] (%p1250_p3), %v200_v0  ;;  %203 = vst [vmem:[%s167_s28 + $0x8] sm:$0xff] (%p1250_p3), %v202_v1 }
  0x15 PF: > { %209 = sbr.rel (!%p1250_p3) target bundleno = 28 (0x1c), region = 62  ;;  %s211_s29 = sand.u32 (%p1250_p3), 1, %s1180_s13  }
  0x16   : > { %s1010_s30 = sshll.u32 (%p1250_p3), %s1188_s15, 5  ;;  %s987_s4 = sshll.u32 (%p1250_p3), %s211_s29, 4 }
  0x17   : > { %s897_s7 = scalar_lea.vmem (%p1250_p3), %s1395_s2, %s1010_s30  ;;  %s213_s8 = scalar_lea.vmem (%p1250_p3), [#allocation3], %s987_s4 }
  0x18   : > { %v990_v2 = vld [vmem:[%s897_s7 + $0x8] sm:$0xff] (%p1250_p3)  ;;  %v991_v3 = vld [vmem:[%s897_s7 + $0x18] sm:$0xff] (%p1250_p3) }
  0x19   : > { %248 = vst [vmem:[%s213_s8] sm:$0xff] (%p1250_p3), %v990_v2  ;;  %250 = vst [vmem:[%s213_s8 + $0x8] sm:$0xff] (%p1250_p3), %v991_v3 }
  0x1c PF: > { %p992_p6 = scmp.ge.s32.totalorder %s1192_s16, 1  ;;  %p255_p7 = scmp.lt.s32.totalorder %s1192_s16, 3 }
  0x1e   : > { %p256_p8 = pnand %p992_p6, %p255_p7 }
  0x1f   : > { %s262_s9 = sand.u32 (!%p256_p8), 1, %s1176_s12   ;;  %p310_p9 = scmp.lt.s32.totalorder (!%p256_p8), %s1184_s14, 1  ;;  %v1194_v4 = vmov (!%p256_p8), 0.0   ;;  %vm1195_vm0 = vmmov (!%p256_p8), 0   ;;  %vm339_vm1 = vcmask (!%p256_p8), 261120   ;;  %vm387_vm2 = vcmask (!%p256_p8), 130048  }
  0x20   : > { %259 = sbr.rel (%p256_p8) target bundleno = 1509 (0x5e5), region = 100  ;;  %1029 = vmatprep.subr.bf16.mxu0 (!%p256_p8), %v1194_v4  ;;  %s1280_s10 = sshll.u32 (!%p256_p8), %s262_s9, 4  ;;  %1031 = vmatprep.mubr.msk.bf16.mxu0 (!%p256_p8), %vm1195_vm0, %v1194_v4  ;;  %vm847_vm3 = vcmask (!%p256_p8), 523264   ;;  %vm850_vm4 = vcmask (!%p256_p8), 785408  }
  0x21   : > { %1035 = vmatprep.subr.bf16.mxu1 (!%p256_p8), %v1194_v4  ;;  %1037 = vmatprep.mubr.msk.bf16.mxu1 (!%p256_p8), %vm1195_vm0, %v1194_v4  ;;  %s264_s11 = scalar_lea.vmem (!%p256_p8), [#allocation2], %s1280_s10  ;;  %s1196_s22 = smov (!%p256_p8), 96  }
  0x22   : > { %v333_v5 = vld [vmem:[%s264_s11] sm:$0xff] (!%p256_p8)  ;;  %v334_v6 = vld [vmem:[%s264_s11 + $0x8] sm:$0xff] (!%p256_p8)  ;;  %s1197_s23 = smov (!%p256_p8), 32   ;;  %s271_s24 = scalar_lea.vmem (!%p256_p8), [#allocation3], %s1280_s10 }
  0x23   : > { %v335_v7 = vpack.c.bf16 (!%p256_p8), %v334_v6, %v333_v5  ;;  %v336_v28 = vld [vmem:[%s271_s24] sm:$0xff] (!%p256_p8)  ;;  %v337_v29 = vld [vmem:[%s271_s24 + $0x8] sm:$0xff] (!%p256_p8)  ;;  %s1198_s25 = smov (!%p256_p8), 64  }
  0x24   : > { %v1309_v30 = vpack.c.bf16 (!%p256_p8), %v337_v29, %v336_v28 }
  0x25   : > { %v344_v8 = vsel (!%p256_p8), %vm339_vm1, %v335_v7, 0 }
  0x26   : > { %1030 = vmatpush3.bf16.xpose.msra.mxu0 (!%p256_p8), %v344_v8  ;;  %1036 = vmatpush3.bf16.msra.mxu1 (!%p256_p8), %v1309_v30 }
  0x27   : > { %s1405_s14 = smov (!%p310_p9, %s1184_s14), 1  ;;  %1047 = vmatprep.subr.bf16.mxu0 %v1194_v4  ;;  %1041 = vmatprep.subr.bf16.mxu1 %v1194_v4 }
  0x28   : > { %s1011_s12 = sshll.u32 %s1405_s14, 4 }
  0x29   : > { %s317_s20 = scalar_lea.vmem %s1393_s0, %s1011_s12  ;;  %s327_s28 = scalar_lea.vmem %s1396_s3, %s1011_s12 }
  0x2a   : > { %v330_v9 = vld [vmem:[%s317_s20] sm:$0xff]  ;;  %v331_v10 = vld [vmem:[%s317_s20 + $0x8] sm:$0xff] }
  0x2b   : > { %v332_v11 = vpack.c.bf16 %v331_v10, %v330_v9 }
  0x2d   : > { %1032 = vmatmul.mubr.msk.bf16.vlgmr.msra.gmra.mrb[0].mxu0 %vm339_vm1, %v332_v11 }
  0x2e   : > { %1049 = vmatprep.mubr.msk.bf16.mxu0 %vm1195_vm0, %v1194_v4 }
 0x100   : > { %v380_v12 = vpop.f32.mrb[0].mxu0 }
 0x101   : > { %v1033_v13 = vpop.f32.mrb[1].mxu0  ;;  %v388_v14 = vsel %vm387_vm2, %v380_v12, -inf }
 0x102   : > { %389 = vmax.xlane.f32.xlu0 %v388_v14  ;;  %v383_v15 = vpop.f32.mrb[2].mxu0 }
 0x103   : > { %v1034_v16 = vpop.f32.mrb[3].mxu0  ;;  %v391_v17 = vsel %vm387_vm2, %v383_v15, -inf }
 0x106   : > { %392 = vmax.xlane.f32.xlu0 %v391_v17 }
 0x11c   : > { %459 = vrot.lane.b32.xlu0 %v335_v7, %s1196_s22 }
 0x120   : > { %702 = vrot.lane.b32.xlu0 %v335_v7, %s1197_s23 }
 0x18f   : > { %v390_v18 = vpop.xlane.xlu0 %389 }
 0x190   : > { %v394_v19 = vsub.f32 %v380_v12, %v390_v18 }
 0x192   : > { %v396_v20 = vmul.f32 1.442695, %v394_v19 }
 0x193   : > { %v393_v21 = vpop.xlane.xlu0 %392 }
 0x194   : > { %1122 = vpow2.f32 %v396_v20  ;;  %v395_v22 = vsub.f32 %v383_v15, %v393_v21 }
 0x196   : > { %v398_v23 = vmul.f32 1.442695, %v395_v22 }
 0x197   : > { %v460_v35 = vpop.permute.xlu0 %459 }
 0x198   : > { %1124 = vpow2.f32 %v398_v23  ;;  %v465_v39 = vsel %vm339_vm1, %v460_v35, 0 }
 0x19b   : > { %v703_v43 = vpop.permute.xlu0 %702 }
 0x19c   : > { %v708_v45 = vsel %vm339_vm1, %v703_v43, 0 }
 0x19e   : > { %v1123_v24 = vpop.eup %1122 }
 0x19f   : > { %v400_v25 = vsel %vm387_vm2, %v1123_v24, 0.0 }
 0x1a0   : > { %401 = vadd.xlane.f32.xlu1 %v400_v25 }
 0x1a2   : > { %v1125_v26 = vpop.eup %1124 }
 0x1a3   : > { %v403_v27 = vsel %vm387_vm2, %v1125_v26, 0.0 }
 0x1a4   : > { %404 = vadd.xlane.f32.xlu1 %v403_v27 }
 0x1b5   : > { %456 = vrot.lane.b32.xlu1 %v332_v11, %s1196_s22 }
 0x1b9   : > { %581 = vrot.lane.b32.xlu1 %v335_v7, %s1198_s25 }
 0x1bd   : > { %579 = vrot.lane.b32.xlu1 %v332_v11, %s1198_s25 }
 0x1c1   : > { %700 = vrot.lane.b32.xlu1 %v332_v11, %s1197_s23 }
 0x22d   : > { %v402_v31 = vpop.xlane.xlu1 %401 }
 0x22e   : > { %1126 = vrcp.f32 %v402_v31 }
 0x231   : > { %v405_v32 = vpop.xlane.xlu1 %404 }
 0x232   : > { %1128 = vrcp.f32 %v405_v32 }
 0x235   : > { %v457_v38 = vpop.permute.xlu1 %456 }
 0x238   : > { %v1127_v33 = vpop.eup %1126 }
 0x239   : > { %v408_v36 = vmul.f32 %v1127_v33, %v1123_v24  ;;  %v582_v41 = vpop.permute.xlu1 %581 }
 0x23a   : > { %v587_v42 = vsel %vm339_vm1, %v582_v41, 0 }
 0x23c   : > { %v1129_v34 = vpop.eup %1128 }
 0x23d   : > { %v409_v37 = vmul.f32 %v1129_v34, %v1125_v26  ;;  %v580_v44 = vpop.permute.xlu1 %579 }
 0x23f   : > { %v410_v40 = vpack.c.bf16 %v409_v37, %v408_v36 }
 0x241   : > { %1038 = vmatmul.mubr.msk.bf16.vlgmr.msra.gmra.mrb[0].mxu1 %vm387_vm2, %v410_v40  ;;  %v701_v46 = vpop.permute.xlu1 %700 }
 0x242   : > { %1042 = vmatpush3.bf16.xpose.msra.mxu1 %v465_v39  ;;  %1043 = vmatprep.mubr.msk.bf16.mxu1 %vm1195_vm0, %v1194_v4 }
 0x243   : > { %1053 = vmatprep.subr.bf16.mxu1 %v1194_v4 }
 0x249   : > { %1044 = vmatmul.mubr.msk.bf16.vlgmr.msra.gmra.mrb[4].mxu1 %vm339_vm1, %v457_v38 }
 0x24a   : > { %1054 = vmatpush3.bf16.xpose.msra.mxu1 %v587_v42  ;;  %1055 = vmatprep.mubr.msk.bf16.mxu1 %vm1195_vm0, %v1194_v4 }
 0x24b   : > { %1065 = vmatprep.subr.bf16.mxu1 %v1194_v4 }
 0x251   : > { %1056 = vmatmul.mubr.msk.bf16.vlgmr.msra.gmra.mrb[8].mxu1 %vm339_vm1, %v580_v44 }
 0x252   : > { %1066 = vmatpush3.bf16.xpose.msra.mxu1 %v708_v45  ;;  %1067 = vmatprep.mubr.msk.bf16.mxu1 %vm1195_vm0, %v1194_v4 }
 0x259   : > { %1068 = vmatmul.mubr.msk.bf16.vlgmr.msra.gmra.mrb[12].mxu1 %vm339_vm1, %v701_v46 }
 0x314   : > { %v1332_v47 = vpop.f32.mrb[0].mxu1 }
 0x315   : > { %v1039_v48 = vpop.f32.mrb[1].mxu1 }
 0x316   : > { %v1334_v49 = vpop.f32.mrb[2].mxu1 }
 0x317   : > { %v1040_v50 = vpop.f32.mrb[3].mxu1 }
 0x31c   : > { %v501_v51 = vpop.f32.mrb[4].mxu1 }
 0x31d   : > { %v1045_v52 = vpop.f32.mrb[5].mxu1  ;;  %v508_v53 = vsel %vm387_vm2, %v501_v51, -inf }
 0x31e   : > { %509 = vmax.xlane.f32.xlu0 %v508_v53  ;;  %v504_v54 = vpop.f32.mrb[6].mxu1 }
 0x31f   : > { %v1046_v55 = vpop.f32.mrb[7].mxu1  ;;  %v511_v56 = vsel %vm387_vm2, %v504_v54, -inf }
 0x320   : > { %512 = vmax.xlane.f32.xlu1 %v511_v56 }
 0x324   : > { %v623_v57 = vpop.f32.mrb[8].mxu1 }
 0x325   : > { %v1057_v58 = vpop.f32.mrb[9].mxu1  ;;  %v630_v59 = vsel %vm387_vm2, %v623_v57, -inf }
 0x326   : > { %631 = vmax.xlane.f32.xlu0 %v630_v59  ;;  %v626_v60 = vpop.f32.mrb[10].mxu1 }
 0x327   : > { %v1058_v61 = vpop.f32.mrb[11].mxu1  ;;  %v633_v62 = vsel %vm387_vm2, %v626_v60, -inf }
 0x32a   : > { %634 = vmax.xlane.f32.xlu0 %v633_v62 }
 0x32c   : > { %v744_v63 = vpop.f32.mrb[12].mxu1 }
 0x32d   : > { %v1069_v0 = vpop.f32.mrb[13].mxu1  ;;  %v751_v1 = vsel %vm387_vm2, %v744_v63, -inf }
 0x32e   : > { %752 = vmax.xlane.f32.xlu0 %v751_v1  ;;  %v747_v2 = vpop.f32.mrb[14].mxu1 }
 0x32f   : > { %v754_v3 = vsel %vm387_vm2, %v747_v2, -inf  ;;  %v1070_v5 = vpop.f32.mrb[15].mxu1 }
 0x330   : > { %755 = vmax.xlane.f32.xlu1 %v754_v3 }
 0x3ab   : > { %v510_v6 = vpop.xlane.xlu0 %509 }
 0x3ac   : > { %v514_v7 = vsub.f32 %v501_v51, %v510_v6 }
 0x3ad   : > { %v513_v8 = vpop.xlane.xlu1 %512 }
 0x3ae   : > { %v516_v9 = vmul.f32 1.442695, %v514_v7  ;;  %v515_v10 = vsub.f32 %v504_v54, %v513_v8 }
 0x3b0   : > { %1130 = vpow2.f32 %v516_v9  ;;  %v518_v11 = vmul.f32 1.442695, %v515_v10 }
 0x3b2   : > { %1132 = vpow2.f32 %v518_v11 }
 0x3b3   : > { %v632_v12 = vpop.xlane.xlu0 %631 }
 0x3b4   : > { %v636_v13 = vsub.f32 %v623_v57, %v632_v12 }
 0x3b6   : > { %v638_v14 = vmul.f32 1.442695, %v636_v13 }
 0x3b7   : > { %v635_v15 = vpop.xlane.xlu0 %634 }
 0x3b8   : > { %1134 = vpow2.f32 %v638_v14  ;;  %v637_v16 = vsub.f32 %v626_v60, %v635_v15 }
 0x3ba   : > { %v1131_v17 = vpop.eup %1130  ;;  %v640_v18 = vmul.f32 1.442695, %v637_v16 }
 0x3bb   : > { %v753_v19 = vpop.xlane.xlu0 %752  ;;  %v520_v20 = vsel %vm387_vm2, %v1131_v17, 0.0 }
 0x3bc   : > { %v1133_v21 = vpop.eup %1132  ;;  %1136 = vpow2.f32 %v640_v18  ;;  %v757_v22 = vsub.f32 %v744_v63, %v753_v19  ;;  %521 = vadd.xlane.f32.xlu0 %v520_v20 }
 0x3bd   : > { %v523_v23 = vsel %vm387_vm2, %v1133_v21, 0.0  ;;  %v756_v32 = vpop.xlane.xlu1 %755 }
 0x3be   : > { %v759_v24 = vmul.f32 1.442695, %v757_v22  ;;  %524 = vadd.xlane.f32.xlu1 %v523_v23  ;;  %v758_v33 = vsub.f32 %v747_v2, %v756_v32 }
 0x3c0   : > { %1138 = vpow2.f32 %v759_v24  ;;  %v761_v34 = vmul.f32 1.442695, %v758_v33 }
 0x3c2   : > { %v1135_v25 = vpop.eup %1134  ;;  %1140 = vpow2.f32 %v761_v34 }
 0x3c3   : > { %v642_v26 = vsel %vm387_vm2, %v1135_v25, 0.0 }
 0x3c4   : > { %643 = vadd.xlane.f32.xlu0 %v642_v26 }
 0x3c6   : > { %v1137_v27 = vpop.eup %1136 }
 0x3c7   : > { %v645_v28 = vsel %vm387_vm2, %v1137_v27, 0.0 }
 0x3c8   : > { %646 = vadd.xlane.f32.xlu1 %v645_v28 }
 0x3ca   : > { %v1139_v29 = vpop.eup %1138 }
 0x3cb   : > { %v763_v31 = vsel %vm387_vm2, %v1139_v29, 0.0 }
 0x3cc   : > { %764 = vadd.xlane.f32.xlu0 %v763_v31  ;;  %v1141_v35 = vpop.eup %1140 }
 0x3cd   : > { %v766_v36 = vsel %vm387_vm2, %v1141_v35, 0.0 }
 0x3d9   : > { %653 = vrot.lane.b32.xlu1 %v1309_v30, %s1198_s25 }
 0x3e2   : > { %532 = vrot.lane.b32.xlu0 %v1309_v30, %s1196_s22 }
 0x3fd   : > { %767 = vadd.xlane.f32.xlu1 %v766_v36 }
 0x40e   : > { %774 = vrot.lane.b32.xlu1 %v1309_v30, %s1197_s23 }
 0x449   : > { %v522_v38 = vpop.xlane.xlu0 %521 }
 0x44b   : > { %v525_v37 = vpop.xlane.xlu1 %524 }
 0x44c   : > { %1142 = vrcp.f32 %v525_v37 }
 0x44d   : > { %1144 = vrcp.f32 %v522_v38 }
 0x451   : > { %v644_v39 = vpop.xlane.xlu0 %643 }
 0x455   : > { %v647_v40 = vpop.xlane.xlu1 %646 }
 0x456   : > { %1146 = vrcp.f32 %v647_v40  ;;  %v1143_v41 = vpop.eup %1142 }
 0x457   : > { %1148 = vrcp.f32 %v644_v39  ;;  %v1145_v43 = vpop.eup %1144  ;;  %v529_v44 = vmul.f32 %v1143_v41, %v1133_v21 }
 0x458   : > { %v528_v45 = vmul.f32 %v1145_v43, %v1131_v17 }
 0x459   : > { %v765_v42 = vpop.xlane.xlu0 %764  ;;  %v654_v30 = vpop.permute.xlu1 %653 }
 0x45a   : > { %v530_v48 = vpack.c.bf16 %v529_v44, %v528_v45  ;;  %1150 = vrcp.f32 %v765_v42 }
 0x45d   : > { %v533_v46 = vpop.permute.xlu0 %532 }
 0x45e   : > { %1048 = vmatpush3.bf16.msra.mxu0 %v533_v46 }
 0x45f   : > { %1059 = vmatprep.subr.bf16.mxu0 %v1194_v4 }
 0x460   : > { %v1147_v50 = vpop.eup %1146 }
 0x461   : > { %1050 = vmatmul.mubr.msk.bf16.vlgmr.msra.gmra.mrb[4].mxu0 %vm387_vm2, %v530_v48  ;;  %v1149_v51 = vpop.eup %1148  ;;  %v651_v52 = vmul.f32 %v1147_v50, %v1137_v27 }
 0x462   : > { %1060 = vmatpush3.bf16.msra.mxu0 %v654_v30  ;;  %1061 = vmatprep.mubr.msk.bf16.mxu0 %vm1195_vm0, %v1194_v4  ;;  %v650_v53 = vmul.f32 %v1149_v51, %v1135_v25 }
 0x463   : > { %1071 = vmatprep.subr.bf16.mxu0 %v1194_v4 }
 0x464   : > { %v652_v54 = vpack.c.bf16 %v651_v52, %v650_v53  ;;  %v1151_v57 = vpop.eup %1150 }
 0x465   : > { %v771_v59 = vmul.f32 %v1151_v57, %v1139_v29 }
 0x469   : > { %1062 = vmatmul.mubr.msk.bf16.vlgmr.msra.gmra.mrb[8].mxu0 %vm387_vm2, %v652_v54 }
 0x46a   : > { %1073 = vmatprep.mubr.msk.bf16.mxu0 %vm1195_vm0, %v1194_v4 }
 0x48a   : > { %v768_v55 = vpop.xlane.xlu1 %767 }
 0x48b   : > { %1152 = vrcp.f32 %v768_v55 }
 0x48e   : > { %v775_v56 = vpop.permute.xlu1 %774 }
 0x48f   : > { %1072 = vmatpush3.bf16.msra.mxu0 %v775_v56 }
 0x495   : > { %v1153_v58 = vpop.eup %1152 }
 0x496   : > { %v772_v60 = vmul.f32 %v1153_v58, %v1141_v35 }
 0x498   : > { %v773_v61 = vpack.c.bf16 %v772_v60, %v771_v59 }
 0x49a   : > { %1074 = vmatmul.mubr.msk.bf16.vlgmr.msra.gmra.mrb[12].mxu0 %vm387_vm2, %v773_v61 }
 0x534   : > { %v572_v62 = vpop.f32.mrb[4].mxu0 }
 0x535   : > { %823 = vrot.lane.b32.xlu1 %v572_v62, %s1197_s23  ;;  %v1051_v63 = vpop.f32.mrb[5].mxu0 }
 0x536   : > { %v575_v0 = vpop.f32.mrb[6].mxu0 }
 0x537   : > { %825 = vrot.lane.b32.xlu0 %v575_v0, %s1197_s23  ;;  %v1052_v4 = vpop.f32.mrb[7].mxu0 }
 0x53c   : > { %v693_v1 = vpop.f32.mrb[8].mxu0 }
 0x53d   : > { %831 = vrot.lane.b32.xlu1 %v693_v1, %s1198_s25  ;;  %v1063_v2 = vpop.f32.mrb[9].mxu0 }
 0x53e   : > { %v696_v3 = vpop.f32.mrb[10].mxu0 }
 0x53f   : > { %833 = vrot.lane.b32.xlu0 %v696_v3, %s1198_s25  ;;  %v1064_v5 = vpop.f32.mrb[11].mxu0 }
 0x56d   : > { %v814_v6 = vpop.f32.mrb[12].mxu0 }
 0x56e   : > { %839 = vrot.lane.b32.xlu1 %v814_v6, %s1196_s22  ;;  %v1075_v7 = vpop.f32.mrb[13].mxu0 }
 0x56f   : > { %v817_v8 = vpop.f32.mrb[14].mxu0 }
 0x570   : > { %841 = vrot.lane.b32.xlu0 %v817_v8, %s1196_s22  ;;  %v1076_v9 = vpop.f32.mrb[15].mxu0 }
 0x5a7   : > { %v824_v10 = vpop.permute.xlu1 %823 }
 0x5a8   : > { %v845_v14 = vsel %vm339_vm1, %v1332_v47, %v824_v10 }
 0x5a9   : > { %v826_v11 = vpop.permute.xlu0 %825 }
 0x5aa   : > { %v846_v17 = vsel %vm339_vm1, %v1334_v49, %v826_v11 }
 0x5af   : > { %v832_v12 = vpop.permute.xlu1 %831 }
 0x5b0   : > { %v848_v15 = vsel %vm847_vm3, %v845_v14, %v832_v12 }
 0x5b1   : > { %v834_v13 = vpop.permute.xlu0 %833 }
 0x5b2   : > { %v849_v19 = vsel %vm847_vm3, %v846_v17, %v834_v13 }
 0x5e0   : > { %v840_v16 = vpop.permute.xlu1 %839 }
 0x5e1   : > { %v851_v18 = vsel %vm850_vm4, %v848_v15, %v840_v16 }
 0x5e2   : > { %853 = vst [vmem:[%s327_s28] sm:$0xff] %v851_v18  ;;  %v842_v20 = vpop.permute.xlu0 %841 }
 0x5e3   : > { %v852_v21 = vsel %vm850_vm4, %v849_v19, %v842_v20 }
 0x5e4   : > { %854 = vst [vmem:[%s327_s28 + $0x8] sm:$0xff] %v852_v21 }
 0x5e5 PF: > { %s13_s16 = sadd.s32 1, %s1192_s16   ;;  %s1398_s12 = smov %s1180_s13 }
 0x5e6   : > { %p10_p10 = scmp.ge.s32.totalorder %s13_s16, 4   ;;  %s1399_s13 = smov %s1258_s21 }
 0x5e7   : > { %s1400_s14 = smov %s1188_s15  ;;  %s1401_s15 = smov %s1403_s17 }
 0x5e8   :  { %12 = sbr.rel (!%p10_p10) target bundleno = 3 (0x3), region = 154 }

</bundles_post_ra>
